<compile_context>
chip_gen: v7x
topology: tpu7x:2x2x1
jax: 0.10.0
libtpu: 0.0.40
codegen_flags: <defaults>
</compile_context>

<pallas_src>
import jax
import jax.numpy as jnp
from jax.experimental import pallas as pl
from jax.experimental.pallas import tpu as pltpu

# ---- model hyper-parameters (small, consistent with the module's __init__) ----
D_MODEL = 32
N_LAYERS = 2
N_HEADS = 4
D_FF = 64
D_K = D_MODEL // N_HEADS
EPS = 1e-6
MASK_VALUE = -2000000000.0  # float32 path of the reference masked_fill
SCALE = D_K ** (-0.5)


# ---------------------------------------------------------------------------
# in-kernel helpers (traced inside the Pallas kernel body)
# ---------------------------------------------------------------------------
def _layernorm(x, alpha, bias):
    # torch-style LayerNormalization: alpha * (x - mean) / (std + eps) + bias
    # torch .std() is the *unbiased* std (ddof = 1).
    d = x.shape[-1]
    mean = jnp.mean(x, axis=-1, keepdims=True)
    diff = x - mean
    var = jnp.sum(diff * diff, axis=-1, keepdims=True) * (1.0 / (d - 1))
    std = jnp.sqrt(var)
    return alpha * diff * pl.reciprocal(std + EPS, approx=False) + bias


def _attention_core(q, k, v, bias, wo):
    # q: (Rq, D), k/v: (Rk, D) -- already projected, heads packed along lanes.
    # bias: (Rq, Rk) additive mask bias, shared across heads.  wo: (D, D).
    qh = jnp.stack([q[:, h * D_K:(h + 1) * D_K] for h in range(N_HEADS)], axis=0)
    kh = jnp.stack([k[:, h * D_K:(h + 1) * D_K] for h in range(N_HEADS)], axis=0)
    vh = jnp.stack([v[:, h * D_K:(h + 1) * D_K] for h in range(N_HEADS)], axis=0)
    # (H, Rq, Rk) scores; bias broadcasts over the head dim
    s = jnp.einsum('hqd,hkd->hqk', qh, kh,
                   preferred_element_type=jnp.float32) * SCALE + bias
    s = s - jnp.max(s, axis=-1, keepdims=True)
    e = jnp.exp(s)
    p = e * pl.reciprocal(jnp.sum(e, axis=-1, keepdims=True), approx=False)
    ctx = jnp.einsum('hqk,hkd->hqd', p, vh,
                     preferred_element_type=jnp.float32)          # (H, Rq, Dk)
    ctx_flat = jnp.concatenate([ctx[h] for h in range(N_HEADS)], axis=-1)  # (Rq, D)
    return jnp.dot(ctx_flat, wo, preferred_element_type=jnp.float32)


# ---------------------------------------------------------------------------
# one fused kernel per batch element: all decoder layers + final LayerNorm
# ---------------------------------------------------------------------------
def decoder_stack_kernel(x_ref, enc_ref, tgt_bias_ref, src_bias_ref,
                         sa_wqkv_ref, sa_wo_ref,
                         ca_wq_ref, ca_wkv_ref, ca_wo_ref,
                         ff_w1_ref, ff_b1_ref, ff_w2_ref, ff_b2_ref,
                         ln_a_ref, ln_b_ref, fn_a_ref, fn_b_ref,
                         o_ref):
    x = x_ref[...]                      # (T, D) this batch element
    enc = enc_ref[...]                  # (S, D) this batch element
    tgt_bias = tgt_bias_ref[...]        # (T, T) additive mask bias
    src_bias = src_bias_ref[...]        # (T, S) additive mask bias

    for l in range(N_LAYERS):           # static unroll over layers
        lna = ln_a_ref[l]               # (3, 1, D)
        lnb = ln_b_ref[l]

        # residual 0: self attention (q = k = v = norm(x), mask = tgt)
        xn = _layernorm(x, lna[0], lnb[0])
        qkv = jnp.dot(xn, sa_wqkv_ref[l], preferred_element_type=jnp.float32)  # (T, 3D)
        x = x + _attention_core(qkv[:, :D_MODEL],
                                qkv[:, D_MODEL:2 * D_MODEL],
                                qkv[:, 2 * D_MODEL:],
                                tgt_bias, sa_wo_ref[l])

        # residual 1: cross attention (q = norm(x), k = v = encoder output)
        xn = _layernorm(x, lna[1], lnb[1])
        q = jnp.dot(xn, ca_wq_ref[l], preferred_element_type=jnp.float32)      # (T, D)
        kv = jnp.dot(enc, ca_wkv_ref[l], preferred_element_type=jnp.float32)   # (S, 2D)
        x = x + _attention_core(q, kv[:, :D_MODEL], kv[:, D_MODEL:],
                                src_bias, ca_wo_ref[l])

        # residual 2: feed forward (Linear -> ReLU -> Linear)
        xn = _layernorm(x, lna[2], lnb[2])
        hdn = jnp.maximum(
            jnp.dot(xn, ff_w1_ref[l], preferred_element_type=jnp.float32)
            + ff_b1_ref[l], 0.0)
        x = x + jnp.dot(hdn, ff_w2_ref[l], preferred_element_type=jnp.float32) \
              + ff_b2_ref[l]

    # final LayerNorm of the Decoder, fused into the same kernel
    o_ref[...] = _layernorm(x, fn_a_ref[...], fn_b_ref[...])


# ---------------------------------------------------------------------------
# wrapper
# ---------------------------------------------------------------------------
def decoder_forward(x, encoder_output, src_mask, tgt_mask, params):
    # matches Decoder.forward: loop over layers, then self.norm(x)
    # masks follow the usual (B, 1, T, T) / (B, 1, 1, S) convention (head dim = 1).
    B, T, D = x.shape
    S = encoder_output.shape[1]

    # additive mask biases, per batch element (vectorized, no .at[].set chain):
    # 0 where mask != 0, MASK_VALUE where mask == 0 (== masked_fill + softmax).
    tgt_bias = jnp.broadcast_to(
        jnp.where(tgt_mask == 0.0, MASK_VALUE, 0.0).astype(jnp.float32),
        (B, 1, T, T)).reshape(B, T, T)
    src_bias = jnp.broadcast_to(
        jnp.where(src_mask == 0.0, MASK_VALUE, 0.0).astype(jnp.float32),
        (B, 1, T, S)).reshape(B, T, S)

    args = (x, encoder_output, tgt_bias, src_bias,
            params["sa_wqkv"], params["sa_wo"],
            params["ca_wq"], params["ca_wkv"], params["ca_wo"],
            params["ff_w1"], params["ff_b1"], params["ff_w2"], params["ff_b2"],
            params["ln_a"], params["ln_b"],
            params["norm_alpha"], params["norm_bias"])

    def batch_spec(shape):           # one batch element per grid step
        nd = len(shape)
        return pl.BlockSpec((None,) + tuple(shape[1:]),
                            lambda b, _nd=nd: (b,) + (0,) * (_nd - 1))

    def full_spec(a):                # whole array, constant across the grid
        nd = a.ndim
        return pl.BlockSpec(a.shape, lambda b, _nd=nd: (0,) * _nd)

    in_specs = [batch_spec(x.shape), batch_spec(encoder_output.shape),
                batch_spec(tgt_bias.shape), batch_spec(src_bias.shape)]
    in_specs += [full_spec(a) for a in args[4:]]

    return pl.pallas_call(
        decoder_stack_kernel,
        out_shape=jax.ShapeDtypeStruct((B, T, D), jnp.float32),
        grid=(B,),                                    # one TC per batch element on v7x
        in_specs=in_specs,
        out_specs=pl.BlockSpec((None, T, D), lambda b: (b, 0, 0)),
        compiler_params=pltpu.CompilerParams(dimension_semantics=("parallel",)),
    )(*args)


# ---------------------------------------------------------------------------
# deterministic parameter init (shapes from the module's __init__), with the
# attention weights pre-fused (Wq|Wk|Wv and Wk|Wv concatenated along lanes) —
# layout only; kernel math stays identical to the PyTorch module's forward.
# ---------------------------------------------------------------------------
def _xavier(key, shape):
    fan_in, fan_out = shape
    bound = (6.0 / (fan_in + fan_out)) ** 0.5
    return jax.random.uniform(key, shape, jnp.float32, -bound, bound)


def init_params(key):
    sa_wqkv, sa_wo = [], []
    ca_wq, ca_wkv, ca_wo = [], [], []
    ff_w1, ff_b1, ff_w2, ff_b2 = [], [], [], []
    for _ in range(N_LAYERS):
        key, *ks = jax.random.split(key, 13)
        sa = [_xavier(ks[i], (D_MODEL, D_MODEL)) for i in range(4)]      # wq wk wv wo
        ca = [_xavier(ks[4 + i], (D_MODEL, D_MODEL)) for i in range(4)]
        sa_wqkv.append(jnp.concatenate(sa[:3], axis=1))                   # (D, 3D)
        sa_wo.append(sa[3])                                               # (D, D)
        ca_wq.append(ca[0])
        ca_wkv.append(jnp.concatenate(ca[1:3], axis=1))                   # (D, 2D)
        ca_wo.append(ca[3])
        ff_w1.append(_xavier(ks[8], (D_MODEL, D_FF)))
        ff_b1.append(jax.random.uniform(ks[9], (1, D_FF), jnp.float32, -0.1, 0.1))
        ff_w2.append(_xavier(ks[10], (D_FF, D_MODEL)))
        ff_b2.append(jax.random.uniform(ks[11], (1, D_MODEL), jnp.float32, -0.1, 0.1))

    return {
        "sa_wqkv": jnp.stack(sa_wqkv), "sa_wo": jnp.stack(sa_wo),
        "ca_wq": jnp.stack(ca_wq), "ca_wkv": jnp.stack(ca_wkv), "ca_wo": jnp.stack(ca_wo),
        "ff_w1": jnp.stack(ff_w1), "ff_b1": jnp.stack(ff_b1),
        "ff_w2": jnp.stack(ff_w2), "ff_b2": jnp.stack(ff_b2),
        # three ResidualConnection layer norms per layer (alpha=1, bias=0 init)
        "ln_a": jnp.ones((N_LAYERS, 3, 1, D_MODEL), jnp.float32),
        "ln_b": jnp.zeros((N_LAYERS, 3, 1, D_MODEL), jnp.float32),
        # final Decoder norm
        "norm_alpha": jnp.ones((1, D_MODEL), jnp.float32),
        "norm_bias": jnp.zeros((1, D_MODEL), jnp.float32),
    }


# ---------------------------------------------------------------------------
# pure-JAX reference (mirrors the PyTorch module) for a correctness check
# ---------------------------------------------------------------------------
def _layernorm_ref(x, alpha, bias):
    mean = jnp.mean(x, axis=-1, keepdims=True)
    std = jnp.std(x, axis=-1, keepdims=True, ddof=1)
    return alpha * (x - mean) / (std + EPS) + bias


def _mha_ref(q_in, kv_in, wq, wk, wv, wo, mask):
    B, T, _ = q_in.shape
    S = kv_in.shape[1]
    q = (q_in @ wq).reshape(B, T, N_HEADS, D_K).transpose(0, 2, 1, 3)
    k = (kv_in @ wk).reshape(B, S, N_HEADS, D_K).transpose(0, 2, 1, 3)
    v = (kv_in @ wv).reshape(B, S, N_HEADS, D_K).transpose(0, 2, 1, 3)
    s = (q @ k.transpose(0, 1, 3, 2)) * SCALE
    s = jnp.where(mask == 0.0, MASK_VALUE, s)
    p = jax.nn.softmax(s, axis=-1)
    ctx = (p @ v).transpose(0, 2, 1, 3).reshape(B, T, D_MODEL)
    return ctx @ wo


def decoder_ref(x, enc, src_mask, tgt_mask, p):
    for l in range(N_LAYERS):
        wqkv = p["sa_wqkv"][l]
        wq, wk, wv = (wqkv[:, :D_MODEL], wqkv[:, D_MODEL:2 * D_MODEL],
                      wqkv[:, 2 * D_MODEL:])
        xn = _layernorm_ref(x, p["ln_a"][l, 0], p["ln_b"][l, 0])
        x = x + _mha_ref(xn, xn, wq, wk, wv, p["sa_wo"][l], tgt_mask)
        cwkv = p["ca_wkv"][l]
        xn = _layernorm_ref(x, p["ln_a"][l, 1], p["ln_b"][l, 1])
        x = x + _mha_ref(xn, enc, p["ca_wq"][l], cwkv[:, :D_MODEL],
                         cwkv[:, D_MODEL:], p["ca_wo"][l], src_mask)
        xn = _layernorm_ref(x, p["ln_a"][l, 2], p["ln_b"][l, 2])
        h = jax.nn.relu(xn @ p["ff_w1"][l] + p["ff_b1"][l])
        x = x + h @ p["ff_w2"][l] + p["ff_b2"][l]
    return _layernorm_ref(x, p["norm_alpha"], p["norm_bias"])


# ---------------------------------------------------------------------------
if __name__ == "__main__":
    key = jax.random.PRNGKey(0)
    B, T, S = 2, 8, 8
    kx, kenc, kp = jax.random.split(key, 3)

    x = jax.random.normal(kx, (B, T, D_MODEL), jnp.float32)
    encoder_output = jax.random.normal(kenc, (B, S, D_MODEL), jnp.float32)
    # causal target mask, full source mask (float {0,1}, masked_fill where == 0)
    tgt_mask = jnp.tile(jnp.tril(jnp.ones((T, T), jnp.float32))[None, None], (B, 1, 1, 1))
    src_mask = jnp.ones((B, 1, 1, S), jnp.float32)

    params = init_params(kp)

    out = decoder_forward(x, encoder_output, src_mask, tgt_mask, params)
    jax.block_until_ready(out)

    ref = decoder_ref(x, encoder_output, src_mask, tgt_mask, params)
    assert out.shape == (B, T, D_MODEL) and bool(jnp.all(jnp.isfinite(out)))
    assert bool(jnp.allclose(out, ref, atol=2e-3, rtol=2e-3))
    print("KERNEL_OK")
</pallas_src>

<mosaic_0001>
module attributes {stable_mosaic.version = 11 : i64} {
  func.func @decoder_stack_kernel(%arg0: i32, %arg1: memref<1x8x32xf32, #tpu.memory_space<vmem>>, %arg2: memref<1x8x32xf32, #tpu.memory_space<vmem>>, %arg3: memref<1x8x8xf32, #tpu.memory_space<vmem>>, %arg4: memref<1x8x8xf32, #tpu.memory_space<vmem>>, %arg5: memref<2x32x96xf32, #tpu.memory_space<vmem>>, %arg6: memref<2x32x32xf32, #tpu.memory_space<vmem>>, %arg7: memref<2x32x32xf32, #tpu.memory_space<vmem>>, %arg8: memref<2x32x64xf32, #tpu.memory_space<vmem>>, %arg9: memref<2x32x32xf32, #tpu.memory_space<vmem>>, %arg10: memref<2x32x64xf32, #tpu.memory_space<vmem>>, %arg11: memref<2x1x64xf32, #tpu.memory_space<vmem>>, %arg12: memref<2x64x32xf32, #tpu.memory_space<vmem>>, %arg13: memref<2x1x32xf32, #tpu.memory_space<vmem>>, %arg14: memref<2x3x1x32xf32, #tpu.memory_space<vmem>>, %arg15: memref<2x3x1x32xf32, #tpu.memory_space<vmem>>, %arg16: memref<1x32xf32, #tpu.memory_space<vmem>>, %arg17: memref<1x32xf32, #tpu.memory_space<vmem>>, %arg18: memref<1x8x32xf32, #tpu.memory_space<vmem>>) attributes {dimension_semantics = [#tpu.dimension_semantics<parallel>], iteration_bounds = array<i64: 2>, scalar_prefetch = 0 : i64, scratch_operands = 0 : i64, tpu.core_type = #tpu.core_type<tc>, window_params = [{transform_indices = @transform_0, window_bounds = array<i64: 1, 8, 32>}, {transform_indices = @transform_1, window_bounds = array<i64: 1, 8, 32>}, {transform_indices = @transform_2, window_bounds = array<i64: 1, 8, 8>}, {transform_indices = @transform_3, window_bounds = array<i64: 1, 8, 8>}, {pipeline_mode = #tpu.pipeline_mode<synchronous>, transform_indices = @transform_4, window_bounds = array<i64: 2, 32, 96>}, {pipeline_mode = #tpu.pipeline_mode<synchronous>, transform_indices = @transform_5, window_bounds = array<i64: 2, 32, 32>}, {pipeline_mode = #tpu.pipeline_mode<synchronous>, transform_indices = @transform_6, window_bounds = array<i64: 2, 32, 32>}, {pipeline_mode = #tpu.pipeline_mode<synchronous>, transform_indices = @transform_7, window_bounds = array<i64: 2, 32, 64>}, {pipeline_mode = #tpu.pipeline_mode<synchronous>, transform_indices = @transform_8, window_bounds = array<i64: 2, 32, 32>}, {pipeline_mode = #tpu.pipeline_mode<synchronous>, transform_indices = @transform_9, window_bounds = array<i64: 2, 32, 64>}, {pipeline_mode = #tpu.pipeline_mode<synchronous>, transform_indices = @transform_10, window_bounds = array<i64: 2, 1, 64>}, {pipeline_mode = #tpu.pipeline_mode<synchronous>, transform_indices = @transform_11, window_bounds = array<i64: 2, 64, 32>}, {pipeline_mode = #tpu.pipeline_mode<synchronous>, transform_indices = @transform_12, window_bounds = array<i64: 2, 1, 32>}, {pipeline_mode = #tpu.pipeline_mode<synchronous>, transform_indices = @transform_13, window_bounds = array<i64: 2, 3, 1, 32>}, {pipeline_mode = #tpu.pipeline_mode<synchronous>, transform_indices = @transform_14, window_bounds = array<i64: 2, 3, 1, 32>}, {pipeline_mode = #tpu.pipeline_mode<synchronous>, transform_indices = @transform_15, window_bounds = array<i64: 1, 32>}, {pipeline_mode = #tpu.pipeline_mode<synchronous>, transform_indices = @transform_16, window_bounds = array<i64: 1, 32>}, {transform_indices = @transform_17, window_bounds = array<i64: 1, 8, 32>}]} {
    %c0 = arith.constant 0 : index
    %c0_0 = arith.constant 0 : index
    %c0_1 = arith.constant 0 : index
    %0 = vector.load %arg1[%c0, %c0_0, %c0_1] : memref<1x8x32xf32, #tpu.memory_space<vmem>>, vector<1x8x32xf32>
    %1 = vector.shape_cast %0 : vector<1x8x32xf32> to vector<8x32xf32>
    %c0_2 = arith.constant 0 : index
    %c0_3 = arith.constant 0 : index
    %c0_4 = arith.constant 0 : index
    %2 = vector.load %arg2[%c0_2, %c0_3, %c0_4] : memref<1x8x32xf32, #tpu.memory_space<vmem>>, vector<1x8x32xf32>
    %3 = vector.shape_cast %2 : vector<1x8x32xf32> to vector<8x32xf32>
    %c0_5 = arith.constant 0 : index
    %c0_6 = arith.constant 0 : index
    %c0_7 = arith.constant 0 : index
    %4 = vector.load %arg3[%c0_5, %c0_6, %c0_7] : memref<1x8x8xf32, #tpu.memory_space<vmem>>, vector<1x8x8xf32>
    %5 = vector.shape_cast %4 : vector<1x8x8xf32> to vector<8x8xf32>
    %c0_8 = arith.constant 0 : index
    %c0_9 = arith.constant 0 : index
    %c0_10 = arith.constant 0 : index
    %6 = vector.load %arg4[%c0_8, %c0_9, %c0_10] : memref<1x8x8xf32, #tpu.memory_space<vmem>>, vector<1x8x8xf32>
    %7 = vector.shape_cast %6 : vector<1x8x8xf32> to vector<8x8xf32>
    %c0_11 = arith.constant 0 : index
    %c0_12 = arith.constant 0 : index
    %c0_13 = arith.constant 0 : index
    %c0_14 = arith.constant 0 : index
    %8 = vector.load %arg14[%c0_11, %c0_12, %c0_13, %c0_14] : memref<2x3x1x32xf32, #tpu.memory_space<vmem>>, vector<1x3x1x32xf32>
    %9 = vector.shape_cast %8 : vector<1x3x1x32xf32> to vector<3x1x32xf32>
    %c0_15 = arith.constant 0 : index
    %c0_16 = arith.constant 0 : index
    %c0_17 = arith.constant 0 : index
    %c0_18 = arith.constant 0 : index
    %10 = vector.load %arg15[%c0_15, %c0_16, %c0_17, %c0_18] : memref<2x3x1x32xf32, #tpu.memory_space<vmem>>, vector<1x3x1x32xf32>
    %11 = vector.shape_cast %10 : vector<1x3x1x32xf32> to vector<3x1x32xf32>
    %12 = vector.extract_strided_slice %9 {offsets = [0, 0, 0], sizes = [1, 1, 32], strides = [1, 1, 1]} : vector<3x1x32xf32> to vector<1x1x32xf32>
    %13 = vector.shape_cast %12 : vector<1x1x32xf32> to vector<1x32xf32>
    %14 = vector.extract_strided_slice %11 {offsets = [0, 0, 0], sizes = [1, 1, 32], strides = [1, 1, 1]} : vector<3x1x32xf32> to vector<1x1x32xf32>
    %15 = vector.shape_cast %14 : vector<1x1x32xf32> to vector<1x32xf32>
    %cst = arith.constant dense<0.000000e+00> : vector<8xf32>
    %16 = vector.multi_reduction <add>, %1, %cst [1] : vector<8x32xf32> to vector<8xf32>
    %17 = vector.shape_cast %16 : vector<8xf32> to vector<8x1xf32>
    %cst_19 = arith.constant 3.200000e+01 : f32
    %18 = vector.broadcast %cst_19 : f32 to vector<8x1xf32>
    %19 = arith.divf %17, %18 : vector<8x1xf32>
    %20 = vector.broadcast %19 : vector<8x1xf32> to vector<8x32xf32>
    %21 = arith.subf %1, %20 : vector<8x32xf32>
    %22 = arith.mulf %21, %21 : vector<8x32xf32>
    %cst_20 = arith.constant dense<0.000000e+00> : vector<8xf32>
    %23 = vector.multi_reduction <add>, %22, %cst_20 [1] : vector<8x32xf32> to vector<8xf32>
    %24 = vector.shape_cast %23 : vector<8xf32> to vector<8x1xf32>
    %cst_21 = arith.constant 0.0322580636 : f32
    %25 = vector.broadcast %cst_21 : f32 to vector<8x1xf32>
    %26 = arith.mulf %24, %25 : vector<8x1xf32>
    %27 = math.sqrt %26 : vector<8x1xf32>
    %28 = vector.broadcast %13 : vector<1x32xf32> to vector<8x32xf32>
    %29 = arith.mulf %28, %21 : vector<8x32xf32>
    %cst_22 = arith.constant 9.99999997E-7 : f32
    %30 = vector.broadcast %cst_22 : f32 to vector<8x1xf32>
    %31 = arith.addf %27, %30 : vector<8x1xf32>
    %32 = tpu.reciprocal %31 : vector<8x1xf32> -> vector<8x1xf32>
    %33 = vector.broadcast %32 : vector<8x1xf32> to vector<8x32xf32>
    %34 = arith.mulf %29, %33 : vector<8x32xf32>
    %35 = vector.broadcast %15 : vector<1x32xf32> to vector<8x32xf32>
    %36 = arith.addf %34, %35 : vector<8x32xf32>
    %c0_23 = arith.constant 0 : index
    %c0_24 = arith.constant 0 : index
    %c0_25 = arith.constant 0 : index
    %37 = vector.load %arg5[%c0_23, %c0_24, %c0_25] : memref<2x32x96xf32, #tpu.memory_space<vmem>>, vector<1x32x96xf32>
    %38 = vector.shape_cast %37 : vector<1x32x96xf32> to vector<32x96xf32>
    %cst_26 = arith.constant dense<0.000000e+00> : vector<8x96xf32>
    %39 = tpu.matmul %36, %38, %cst_26 {dimension_numbers = #tpu.dot_dimension_numbers<[1], [0], [0], [1], [0, 0, 1, 1], [], []>} : vector<8x32xf32>, vector<32x96xf32>, vector<8x96xf32> -> vector<8x96xf32>
    %40 = vector.extract_strided_slice %39 {offsets = [0, 0], sizes = [8, 32], strides = [1, 1]} : vector<8x96xf32> to vector<8x32xf32>
    %41 = vector.extract_strided_slice %39 {offsets = [0, 32], sizes = [8, 32], strides = [1, 1]} : vector<8x96xf32> to vector<8x32xf32>
    %42 = vector.extract_strided_slice %39 {offsets = [0, 64], sizes = [8, 32], strides = [1, 1]} : vector<8x96xf32> to vector<8x32xf32>
    %c0_27 = arith.constant 0 : index
    %c0_28 = arith.constant 0 : index
    %c0_29 = arith.constant 0 : index
    %43 = vector.load %arg6[%c0_27, %c0_28, %c0_29] : memref<2x32x32xf32, #tpu.memory_space<vmem>>, vector<1x32x32xf32>
    %44 = vector.shape_cast %43 : vector<1x32x32xf32> to vector<32x32xf32>
    %45 = vector.extract_strided_slice %40 {offsets = [0, 0], sizes = [8, 8], strides = [1, 1]} : vector<8x32xf32> to vector<8x8xf32>
    %46 = vector.extract_strided_slice %40 {offsets = [0, 8], sizes = [8, 8], strides = [1, 1]} : vector<8x32xf32> to vector<8x8xf32>
    %47 = vector.extract_strided_slice %40 {offsets = [0, 16], sizes = [8, 8], strides = [1, 1]} : vector<8x32xf32> to vector<8x8xf32>
    %48 = vector.extract_strided_slice %40 {offsets = [0, 24], sizes = [8, 8], strides = [1, 1]} : vector<8x32xf32> to vector<8x8xf32>
    %49 = vector.shape_cast %45 : vector<8x8xf32> to vector<1x8x8xf32>
    %50 = vector.shape_cast %46 : vector<8x8xf32> to vector<1x8x8xf32>
    %51 = vector.shape_cast %47 : vector<8x8xf32> to vector<1x8x8xf32>
    %52 = vector.shape_cast %48 : vector<8x8xf32> to vector<1x8x8xf32>
    %53 = tpu.concatenate %49, %50, %51, %52 in 0 : vector<1x8x8xf32>, vector<1x8x8xf32>, vector<1x8x8xf32>, vector<1x8x8xf32> -> vector<4x8x8xf32>
    %54 = vector.extract_strided_slice %41 {offsets = [0, 0], sizes = [8, 8], strides = [1, 1]} : vector<8x32xf32> to vector<8x8xf32>
    %55 = vector.extract_strided_slice %41 {offsets = [0, 8], sizes = [8, 8], strides = [1, 1]} : vector<8x32xf32> to vector<8x8xf32>
    %56 = vector.extract_strided_slice %41 {offsets = [0, 16], sizes = [8, 8], strides = [1, 1]} : vector<8x32xf32> to vector<8x8xf32>
    %57 = vector.extract_strided_slice %41 {offsets = [0, 24], sizes = [8, 8], strides = [1, 1]} : vector<8x32xf32> to vector<8x8xf32>
    %58 = vector.shape_cast %54 : vector<8x8xf32> to vector<1x8x8xf32>
    %59 = vector.shape_cast %55 : vector<8x8xf32> to vector<1x8x8xf32>
    %60 = vector.shape_cast %56 : vector<8x8xf32> to vector<1x8x8xf32>
    %61 = vector.shape_cast %57 : vector<8x8xf32> to vector<1x8x8xf32>
    %62 = tpu.concatenate %58, %59, %60, %61 in 0 : vector<1x8x8xf32>, vector<1x8x8xf32>, vector<1x8x8xf32>, vector<1x8x8xf32> -> vector<4x8x8xf32>
    %63 = vector.extract_strided_slice %42 {offsets = [0, 0], sizes = [8, 8], strides = [1, 1]} : vector<8x32xf32> to vector<8x8xf32>
    %64 = vector.extract_strided_slice %42 {offsets = [0, 8], sizes = [8, 8], strides = [1, 1]} : vector<8x32xf32> to vector<8x8xf32>
    %65 = vector.extract_strided_slice %42 {offsets = [0, 16], sizes = [8, 8], strides = [1, 1]} : vector<8x32xf32> to vector<8x8xf32>
    %66 = vector.extract_strided_slice %42 {offsets = [0, 24], sizes = [8, 8], strides = [1, 1]} : vector<8x32xf32> to vector<8x8xf32>
    %67 = vector.shape_cast %63 : vector<8x8xf32> to vector<1x8x8xf32>
    %68 = vector.shape_cast %64 : vector<8x8xf32> to vector<1x8x8xf32>
    %69 = vector.shape_cast %65 : vector<8x8xf32> to vector<1x8x8xf32>
    %70 = vector.shape_cast %66 : vector<8x8xf32> to vector<1x8x8xf32>
    %71 = tpu.concatenate %67, %68, %69, %70 in 0 : vector<1x8x8xf32>, vector<1x8x8xf32>, vector<1x8x8xf32>, vector<1x8x8xf32> -> vector<4x8x8xf32>
    "tpu.trace_start"() <{level = 10 : i32, message = "hqd,hkd->hqk"}> : () -> ()
    %cst_30 = arith.constant dense<0.000000e+00> : vector<4x8x8xf32>
    %72 = tpu.matmul %53, %62, %cst_30 {dimension_numbers = #tpu.dot_dimension_numbers<[2], [2], [1], [1], [0, 0, 0, 1, 1, 1], [0], [0]>} : vector<4x8x8xf32>, vector<4x8x8xf32>, vector<4x8x8xf32> -> vector<4x8x8xf32>
    "tpu.trace_stop"() : () -> ()
    %cst_31 = arith.constant 0.353553385 : f32
    %73 = vector.broadcast %cst_31 : f32 to vector<4x8x8xf32>
    %74 = arith.mulf %72, %73 : vector<4x8x8xf32>
    %75 = vector.shape_cast %5 : vector<8x8xf32> to vector<1x8x8xf32>
    %76 = vector.broadcast %75 : vector<1x8x8xf32> to vector<4x8x8xf32>
    %77 = arith.addf %74, %76 : vector<4x8x8xf32>
    %cst_32 = arith.constant dense<0xFF800000> : vector<4x8xf32>
    %78 = vector.multi_reduction <maximumf>, %77, %cst_32 [2] : vector<4x8x8xf32> to vector<4x8xf32>
    %79 = vector.shape_cast %78 : vector<4x8xf32> to vector<4x8x1xf32>
    %80 = vector.broadcast %79 : vector<4x8x1xf32> to vector<4x8x8xf32>
    %81 = arith.subf %77, %80 : vector<4x8x8xf32>
    %82 = math.exp %81 : vector<4x8x8xf32>
    %cst_33 = arith.constant dense<0.000000e+00> : vector<4x8xf32>
    %83 = vector.multi_reduction <add>, %82, %cst_33 [2] : vector<4x8x8xf32> to vector<4x8xf32>
    %84 = vector.shape_cast %83 : vector<4x8xf32> to vector<4x8x1xf32>
    %85 = tpu.reciprocal %84 : vector<4x8x1xf32> -> vector<4x8x1xf32>
    %86 = vector.broadcast %85 : vector<4x8x1xf32> to vector<4x8x8xf32>
    %87 = arith.mulf %82, %86 : vector<4x8x8xf32>
    "tpu.trace_start"() <{level = 10 : i32, message = "hqk,hkd->hqd"}> : () -> ()
    %cst_34 = arith.constant dense<0.000000e+00> : vector<4x8x8xf32>
    %88 = tpu.matmul %87, %71, %cst_34 {dimension_numbers = #tpu.dot_dimension_numbers<[2], [1], [1], [2], [0, 0, 0, 1, 1, 2], [0], [0]>} : vector<4x8x8xf32>, vector<4x8x8xf32>, vector<4x8x8xf32> -> vector<4x8x8xf32>
    "tpu.trace_stop"() : () -> ()
    %89 = vector.extract_strided_slice %88 {offsets = [0, 0, 0], sizes = [1, 8, 8], strides = [1, 1, 1]} : vector<4x8x8xf32> to vector<1x8x8xf32>
    %90 = vector.shape_cast %89 : vector<1x8x8xf32> to vector<8x8xf32>
    %91 = vector.extract_strided_slice %88 {offsets = [1, 0, 0], sizes = [1, 8, 8], strides = [1, 1, 1]} : vector<4x8x8xf32> to vector<1x8x8xf32>
    %92 = vector.shape_cast %91 : vector<1x8x8xf32> to vector<8x8xf32>
    %93 = vector.extract_strided_slice %88 {offsets = [2, 0, 0], sizes = [1, 8, 8], strides = [1, 1, 1]} : vector<4x8x8xf32> to vector<1x8x8xf32>
    %94 = vector.shape_cast %93 : vector<1x8x8xf32> to vector<8x8xf32>
    %95 = vector.extract_strided_slice %88 {offsets = [3, 0, 0], sizes = [1, 8, 8], strides = [1, 1, 1]} : vector<4x8x8xf32> to vector<1x8x8xf32>
    %96 = vector.shape_cast %95 : vector<1x8x8xf32> to vector<8x8xf32>
    %97 = tpu.concatenate %90, %92, %94, %96 in 1 : vector<8x8xf32>, vector<8x8xf32>, vector<8x8xf32>, vector<8x8xf32> -> vector<8x32xf32>
    %cst_35 = arith.constant dense<0.000000e+00> : vector<8x32xf32>
    %98 = tpu.matmul %97, %44, %cst_35 {dimension_numbers = #tpu.dot_dimension_numbers<[1], [0], [0], [1], [0, 0, 1, 1], [], []>} : vector<8x32xf32>, vector<32x32xf32>, vector<8x32xf32> -> vector<8x32xf32>
    %99 = arith.addf %1, %98 : vector<8x32xf32>
    %100 = vector.extract_strided_slice %9 {offsets = [1, 0, 0], sizes = [1, 1, 32], strides = [1, 1, 1]} : vector<3x1x32xf32> to vector<1x1x32xf32>
    %101 = vector.shape_cast %100 : vector<1x1x32xf32> to vector<1x32xf32>
    %102 = vector.extract_strided_slice %11 {offsets = [1, 0, 0], sizes = [1, 1, 32], strides = [1, 1, 1]} : vector<3x1x32xf32> to vector<1x1x32xf32>
    %103 = vector.shape_cast %102 : vector<1x1x32xf32> to vector<1x32xf32>
    %cst_36 = arith.constant dense<0.000000e+00> : vector<8xf32>
    %104 = vector.multi_reduction <add>, %99, %cst_36 [1] : vector<8x32xf32> to vector<8xf32>
    %105 = vector.shape_cast %104 : vector<8xf32> to vector<8x1xf32>
    %cst_37 = arith.constant 3.200000e+01 : f32
    %106 = vector.broadcast %cst_37 : f32 to vector<8x1xf32>
    %107 = arith.divf %105, %106 : vector<8x1xf32>
    %108 = vector.broadcast %107 : vector<8x1xf32> to vector<8x32xf32>
    %109 = arith.subf %99, %108 : vector<8x32xf32>
    %110 = arith.mulf %109, %109 : vector<8x32xf32>
    %cst_38 = arith.constant dense<0.000000e+00> : vector<8xf32>
    %111 = vector.multi_reduction <add>, %110, %cst_38 [1] : vector<8x32xf32> to vector<8xf32>
    %112 = vector.shape_cast %111 : vector<8xf32> to vector<8x1xf32>
    %cst_39 = arith.constant 0.0322580636 : f32
    %113 = vector.broadcast %cst_39 : f32 to vector<8x1xf32>
    %114 = arith.mulf %112, %113 : vector<8x1xf32>
    %115 = math.sqrt %114 : vector<8x1xf32>
    %116 = vector.broadcast %101 : vector<1x32xf32> to vector<8x32xf32>
    %117 = arith.mulf %116, %109 : vector<8x32xf32>
    %cst_40 = arith.constant 9.99999997E-7 : f32
    %118 = vector.broadcast %cst_40 : f32 to vector<8x1xf32>
    %119 = arith.addf %115, %118 : vector<8x1xf32>
    %120 = tpu.reciprocal %119 : vector<8x1xf32> -> vector<8x1xf32>
    %121 = vector.broadcast %120 : vector<8x1xf32> to vector<8x32xf32>
    %122 = arith.mulf %117, %121 : vector<8x32xf32>
    %123 = vector.broadcast %103 : vector<1x32xf32> to vector<8x32xf32>
    %124 = arith.addf %122, %123 : vector<8x32xf32>
    %c0_41 = arith.constant 0 : index
    %c0_42 = arith.constant 0 : index
    %c0_43 = arith.constant 0 : index
    %125 = vector.load %arg7[%c0_41, %c0_42, %c0_43] : memref<2x32x32xf32, #tpu.memory_space<vmem>>, vector<1x32x32xf32>
    %126 = vector.shape_cast %125 : vector<1x32x32xf32> to vector<32x32xf32>
    %cst_44 = arith.constant dense<0.000000e+00> : vector<8x32xf32>
    %127 = tpu.matmul %124, %126, %cst_44 {dimension_numbers = #tpu.dot_dimension_numbers<[1], [0], [0], [1], [0, 0, 1, 1], [], []>} : vector<8x32xf32>, vector<32x32xf32>, vector<8x32xf32> -> vector<8x32xf32>
    %c0_45 = arith.constant 0 : index
    %c0_46 = arith.constant 0 : index
    %c0_47 = arith.constant 0 : index
    %128 = vector.load %arg8[%c0_45, %c0_46, %c0_47] : memref<2x32x64xf32, #tpu.memory_space<vmem>>, vector<1x32x64xf32>
    %129 = vector.shape_cast %128 : vector<1x32x64xf32> to vector<32x64xf32>
    %cst_48 = arith.constant dense<0.000000e+00> : vector<8x64xf32>
    %130 = tpu.matmul %3, %129, %cst_48 {dimension_numbers = #tpu.dot_dimension_numbers<[1], [0], [0], [1], [0, 0, 1, 1], [], []>} : vector<8x32xf32>, vector<32x64xf32>, vector<8x64xf32> -> vector<8x64xf32>
    %131 = vector.extract_strided_slice %130 {offsets = [0, 0], sizes = [8, 32], strides = [1, 1]} : vector<8x64xf32> to vector<8x32xf32>
    %132 = vector.extract_strided_slice %130 {offsets = [0, 32], sizes = [8, 32], strides = [1, 1]} : vector<8x64xf32> to vector<8x32xf32>
    %c0_49 = arith.constant 0 : index
    %c0_50 = arith.constant 0 : index
    %c0_51 = arith.constant 0 : index
    %133 = vector.load %arg9[%c0_49, %c0_50, %c0_51] : memref<2x32x32xf32, #tpu.memory_space<vmem>>, vector<1x32x32xf32>
    %134 = vector.shape_cast %133 : vector<1x32x32xf32> to vector<32x32xf32>
    %135 = vector.extract_strided_slice %127 {offsets = [0, 0], sizes = [8, 8], strides = [1, 1]} : vector<8x32xf32> to vector<8x8xf32>
    %136 = vector.extract_strided_slice %127 {offsets = [0, 8], sizes = [8, 8], strides = [1, 1]} : vector<8x32xf32> to vector<8x8xf32>
    %137 = vector.extract_strided_slice %127 {offsets = [0, 16], sizes = [8, 8], strides = [1, 1]} : vector<8x32xf32> to vector<8x8xf32>
    %138 = vector.extract_strided_slice %127 {offsets = [0, 24], sizes = [8, 8], strides = [1, 1]} : vector<8x32xf32> to vector<8x8xf32>
    %139 = vector.shape_cast %135 : vector<8x8xf32> to vector<1x8x8xf32>
    %140 = vector.shape_cast %136 : vector<8x8xf32> to vector<1x8x8xf32>
    %141 = vector.shape_cast %137 : vector<8x8xf32> to vector<1x8x8xf32>
    %142 = vector.shape_cast %138 : vector<8x8xf32> to vector<1x8x8xf32>
    %143 = tpu.concatenate %139, %140, %141, %142 in 0 : vector<1x8x8xf32>, vector<1x8x8xf32>, vector<1x8x8xf32>, vector<1x8x8xf32> -> vector<4x8x8xf32>
    %144 = vector.extract_strided_slice %131 {offsets = [0, 0], sizes = [8, 8], strides = [1, 1]} : vector<8x32xf32> to vector<8x8xf32>
    %145 = vector.extract_strided_slice %131 {offsets = [0, 8], sizes = [8, 8], strides = [1, 1]} : vector<8x32xf32> to vector<8x8xf32>
    %146 = vector.extract_strided_slice %131 {offsets = [0, 16], sizes = [8, 8], strides = [1, 1]} : vector<8x32xf32> to vector<8x8xf32>
    %147 = vector.extract_strided_slice %131 {offsets = [0, 24], sizes = [8, 8], strides = [1, 1]} : vector<8x32xf32> to vector<8x8xf32>
    %148 = vector.shape_cast %144 : vector<8x8xf32> to vector<1x8x8xf32>
    %149 = vector.shape_cast %145 : vector<8x8xf32> to vector<1x8x8xf32>
    %150 = vector.shape_cast %146 : vector<8x8xf32> to vector<1x8x8xf32>
    %151 = vector.shape_cast %147 : vector<8x8xf32> to vector<1x8x8xf32>
    %152 = tpu.concatenate %148, %149, %150, %151 in 0 : vector<1x8x8xf32>, vector<1x8x8xf32>, vector<1x8x8xf32>, vector<1x8x8xf32> -> vector<4x8x8xf32>
    %153 = vector.extract_strided_slice %132 {offsets = [0, 0], sizes = [8, 8], strides = [1, 1]} : vector<8x32xf32> to vector<8x8xf32>
    %154 = vector.extract_strided_slice %132 {offsets = [0, 8], sizes = [8, 8], strides = [1, 1]} : vector<8x32xf32> to vector<8x8xf32>
    %155 = vector.extract_strided_slice %132 {offsets = [0, 16], sizes = [8, 8], strides = [1, 1]} : vector<8x32xf32> to vector<8x8xf32>
    %156 = vector.extract_strided_slice %132 {offsets = [0, 24], sizes = [8, 8], strides = [1, 1]} : vector<8x32xf32> to vector<8x8xf32>
    %157 = vector.shape_cast %153 : vector<8x8xf32> to vector<1x8x8xf32>
    %158 = vector.shape_cast %154 : vector<8x8xf32> to vector<1x8x8xf32>
    %159 = vector.shape_cast %155 : vector<8x8xf32> to vector<1x8x8xf32>
    %160 = vector.shape_cast %156 : vector<8x8xf32> to vector<1x8x8xf32>
    %161 = tpu.concatenate %157, %158, %159, %160 in 0 : vector<1x8x8xf32>, vector<1x8x8xf32>, vector<1x8x8xf32>, vector<1x8x8xf32> -> vector<4x8x8xf32>
    "tpu.trace_start"() <{level = 10 : i32, message = "hqd,hkd->hqk"}> : () -> ()
    %cst_52 = arith.constant dense<0.000000e+00> : vector<4x8x8xf32>
    %162 = tpu.matmul %143, %152, %cst_52 {dimension_numbers = #tpu.dot_dimension_numbers<[2], [2], [1], [1], [0, 0, 0, 1, 1, 1], [0], [0]>} : vector<4x8x8xf32>, vector<4x8x8xf32>, vector<4x8x8xf32> -> vector<4x8x8xf32>
    "tpu.trace_stop"() : () -> ()
    %cst_53 = arith.constant 0.353553385 : f32
    %163 = vector.broadcast %cst_53 : f32 to vector<4x8x8xf32>
    %164 = arith.mulf %162, %163 : vector<4x8x8xf32>
    %165 = vector.shape_cast %7 : vector<8x8xf32> to vector<1x8x8xf32>
    %166 = vector.broadcast %165 : vector<1x8x8xf32> to vector<4x8x8xf32>
    %167 = arith.addf %164, %166 : vector<4x8x8xf32>
    %cst_54 = arith.constant dense<0xFF800000> : vector<4x8xf32>
    %168 = vector.multi_reduction <maximumf>, %167, %cst_54 [2] : vector<4x8x8xf32> to vector<4x8xf32>
    %169 = vector.shape_cast %168 : vector<4x8xf32> to vector<4x8x1xf32>
    %170 = vector.broadcast %169 : vector<4x8x1xf32> to vector<4x8x8xf32>
    %171 = arith.subf %167, %170 : vector<4x8x8xf32>
    %172 = math.exp %171 : vector<4x8x8xf32>
    %cst_55 = arith.constant dense<0.000000e+00> : vector<4x8xf32>
    %173 = vector.multi_reduction <add>, %172, %cst_55 [2] : vector<4x8x8xf32> to vector<4x8xf32>
    %174 = vector.shape_cast %173 : vector<4x8xf32> to vector<4x8x1xf32>
    %175 = tpu.reciprocal %174 : vector<4x8x1xf32> -> vector<4x8x1xf32>
    %176 = vector.broadcast %175 : vector<4x8x1xf32> to vector<4x8x8xf32>
    %177 = arith.mulf %172, %176 : vector<4x8x8xf32>
    "tpu.trace_start"() <{level = 10 : i32, message = "hqk,hkd->hqd"}> : () -> ()
    %cst_56 = arith.constant dense<0.000000e+00> : vector<4x8x8xf32>
    %178 = tpu.matmul %177, %161, %cst_56 {dimension_numbers = #tpu.dot_dimension_numbers<[2], [1], [1], [2], [0, 0, 0, 1, 1, 2], [0], [0]>} : vector<4x8x8xf32>, vector<4x8x8xf32>, vector<4x8x8xf32> -> vector<4x8x8xf32>
    "tpu.trace_stop"() : () -> ()
    %179 = vector.extract_strided_slice %178 {offsets = [0, 0, 0], sizes = [1, 8, 8], strides = [1, 1, 1]} : vector<4x8x8xf32> to vector<1x8x8xf32>
    %180 = vector.shape_cast %179 : vector<1x8x8xf32> to vector<8x8xf32>
    %181 = vector.extract_strided_slice %178 {offsets = [1, 0, 0], sizes = [1, 8, 8], strides = [1, 1, 1]} : vector<4x8x8xf32> to vector<1x8x8xf32>
    %182 = vector.shape_cast %181 : vector<1x8x8xf32> to vector<8x8xf32>
    %183 = vector.extract_strided_slice %178 {offsets = [2, 0, 0], sizes = [1, 8, 8], strides = [1, 1, 1]} : vector<4x8x8xf32> to vector<1x8x8xf32>
    %184 = vector.shape_cast %183 : vector<1x8x8xf32> to vector<8x8xf32>
    %185 = vector.extract_strided_slice %178 {offsets = [3, 0, 0], sizes = [1, 8, 8], strides = [1, 1, 1]} : vector<4x8x8xf32> to vector<1x8x8xf32>
    %186 = vector.shape_cast %185 : vector<1x8x8xf32> to vector<8x8xf32>
    %187 = tpu.concatenate %180, %182, %184, %186 in 1 : vector<8x8xf32>, vector<8x8xf32>, vector<8x8xf32>, vector<8x8xf32> -> vector<8x32xf32>
    %cst_57 = arith.constant dense<0.000000e+00> : vector<8x32xf32>
    %188 = tpu.matmul %187, %134, %cst_57 {dimension_numbers = #tpu.dot_dimension_numbers<[1], [0], [0], [1], [0, 0, 1, 1], [], []>} : vector<8x32xf32>, vector<32x32xf32>, vector<8x32xf32> -> vector<8x32xf32>
    %189 = arith.addf %99, %188 : vector<8x32xf32>
    %190 = vector.extract_strided_slice %9 {offsets = [2, 0, 0], sizes = [1, 1, 32], strides = [1, 1, 1]} : vector<3x1x32xf32> to vector<1x1x32xf32>
    %191 = vector.shape_cast %190 : vector<1x1x32xf32> to vector<1x32xf32>
    %192 = vector.extract_strided_slice %11 {offsets = [2, 0, 0], sizes = [1, 1, 32], strides = [1, 1, 1]} : vector<3x1x32xf32> to vector<1x1x32xf32>
    %193 = vector.shape_cast %192 : vector<1x1x32xf32> to vector<1x32xf32>
    %cst_58 = arith.constant dense<0.000000e+00> : vector<8xf32>
    %194 = vector.multi_reduction <add>, %189, %cst_58 [1] : vector<8x32xf32> to vector<8xf32>
    %195 = vector.shape_cast %194 : vector<8xf32> to vector<8x1xf32>
    %cst_59 = arith.constant 3.200000e+01 : f32
    %196 = vector.broadcast %cst_59 : f32 to vector<8x1xf32>
    %197 = arith.divf %195, %196 : vector<8x1xf32>
    %198 = vector.broadcast %197 : vector<8x1xf32> to vector<8x32xf32>
    %199 = arith.subf %189, %198 : vector<8x32xf32>
    %200 = arith.mulf %199, %199 : vector<8x32xf32>
    %cst_60 = arith.constant dense<0.000000e+00> : vector<8xf32>
    %201 = vector.multi_reduction <add>, %200, %cst_60 [1] : vector<8x32xf32> to vector<8xf32>
    %202 = vector.shape_cast %201 : vector<8xf32> to vector<8x1xf32>
    %cst_61 = arith.constant 0.0322580636 : f32
    %203 = vector.broadcast %cst_61 : f32 to vector<8x1xf32>
    %204 = arith.mulf %202, %203 : vector<8x1xf32>
    %205 = math.sqrt %204 : vector<8x1xf32>
    %206 = vector.broadcast %191 : vector<1x32xf32> to vector<8x32xf32>
    %207 = arith.mulf %206, %199 : vector<8x32xf32>
    %cst_62 = arith.constant 9.99999997E-7 : f32
    %208 = vector.broadcast %cst_62 : f32 to vector<8x1xf32>
    %209 = arith.addf %205, %208 : vector<8x1xf32>
    %210 = tpu.reciprocal %209 : vector<8x1xf32> -> vector<8x1xf32>
    %211 = vector.broadcast %210 : vector<8x1xf32> to vector<8x32xf32>
    %212 = arith.mulf %207, %211 : vector<8x32xf32>
    %213 = vector.broadcast %193 : vector<1x32xf32> to vector<8x32xf32>
    %214 = arith.addf %212, %213 : vector<8x32xf32>
    %c0_63 = arith.constant 0 : index
    %c0_64 = arith.constant 0 : index
    %c0_65 = arith.constant 0 : index
    %215 = vector.load %arg10[%c0_63, %c0_64, %c0_65] : memref<2x32x64xf32, #tpu.memory_space<vmem>>, vector<1x32x64xf32>
    %216 = vector.shape_cast %215 : vector<1x32x64xf32> to vector<32x64xf32>
    %cst_66 = arith.constant dense<0.000000e+00> : vector<8x64xf32>
    %217 = tpu.matmul %214, %216, %cst_66 {dimension_numbers = #tpu.dot_dimension_numbers<[1], [0], [0], [1], [0, 0, 1, 1], [], []>} : vector<8x32xf32>, vector<32x64xf32>, vector<8x64xf32> -> vector<8x64xf32>
    %c0_67 = arith.constant 0 : index
    %c0_68 = arith.constant 0 : index
    %c0_69 = arith.constant 0 : index
    %218 = vector.load %arg11[%c0_67, %c0_68, %c0_69] : memref<2x1x64xf32, #tpu.memory_space<vmem>>, vector<1x1x64xf32>
    %219 = vector.shape_cast %218 : vector<1x1x64xf32> to vector<1x64xf32>
    %220 = vector.broadcast %219 : vector<1x64xf32> to vector<8x64xf32>
    %221 = arith.addf %217, %220 : vector<8x64xf32>
    %cst_70 = arith.constant 0.000000e+00 : f32
    %222 = vector.broadcast %cst_70 : f32 to vector<8x64xf32>
    %223 = arith.maximumf %221, %222 : vector<8x64xf32>
    %c0_71 = arith.constant 0 : index
    %c0_72 = arith.constant 0 : index
    %c0_73 = arith.constant 0 : index
    %224 = vector.load %arg12[%c0_71, %c0_72, %c0_73] : memref<2x64x32xf32, #tpu.memory_space<vmem>>, vector<1x64x32xf32>
    %225 = vector.shape_cast %224 : vector<1x64x32xf32> to vector<64x32xf32>
    %cst_74 = arith.constant dense<0.000000e+00> : vector<8x32xf32>
    %226 = tpu.matmul %223, %225, %cst_74 {dimension_numbers = #tpu.dot_dimension_numbers<[1], [0], [0], [1], [0, 0, 1, 1], [], []>} : vector<8x64xf32>, vector<64x32xf32>, vector<8x32xf32> -> vector<8x32xf32>
    %227 = arith.addf %189, %226 : vector<8x32xf32>
    %c0_75 = arith.constant 0 : index
    %c0_76 = arith.constant 0 : index
    %c0_77 = arith.constant 0 : index
    %228 = vector.load %arg13[%c0_75, %c0_76, %c0_77] : memref<2x1x32xf32, #tpu.memory_space<vmem>>, vector<1x1x32xf32>
    %229 = vector.shape_cast %228 : vector<1x1x32xf32> to vector<1x32xf32>
    %230 = vector.broadcast %229 : vector<1x32xf32> to vector<8x32xf32>
    %231 = arith.addf %227, %230 : vector<8x32xf32>
    %c1 = arith.constant 1 : index
    %c0_78 = arith.constant 0 : index
    %c0_79 = arith.constant 0 : index
    %c0_80 = arith.constant 0 : index
    %232 = vector.load %arg14[%c1, %c0_78, %c0_79, %c0_80] : memref<2x3x1x32xf32, #tpu.memory_space<vmem>>, vector<1x3x1x32xf32>
    %233 = vector.shape_cast %232 : vector<1x3x1x32xf32> to vector<3x1x32xf32>
    %c1_81 = arith.constant 1 : index
    %c0_82 = arith.constant 0 : index
    %c0_83 = arith.constant 0 : index
    %c0_84 = arith.constant 0 : index
    %234 = vector.load %arg15[%c1_81, %c0_82, %c0_83, %c0_84] : memref<2x3x1x32xf32, #tpu.memory_space<vmem>>, vector<1x3x1x32xf32>
    %235 = vector.shape_cast %234 : vector<1x3x1x32xf32> to vector<3x1x32xf32>
    %236 = vector.extract_strided_slice %233 {offsets = [0, 0, 0], sizes = [1, 1, 32], strides = [1, 1, 1]} : vector<3x1x32xf32> to vector<1x1x32xf32>
    %237 = vector.shape_cast %236 : vector<1x1x32xf32> to vector<1x32xf32>
    %238 = vector.extract_strided_slice %235 {offsets = [0, 0, 0], sizes = [1, 1, 32], strides = [1, 1, 1]} : vector<3x1x32xf32> to vector<1x1x32xf32>
    %239 = vector.shape_cast %238 : vector<1x1x32xf32> to vector<1x32xf32>
    %cst_85 = arith.constant dense<0.000000e+00> : vector<8xf32>
    %240 = vector.multi_reduction <add>, %231, %cst_85 [1] : vector<8x32xf32> to vector<8xf32>
    %241 = vector.shape_cast %240 : vector<8xf32> to vector<8x1xf32>
    %cst_86 = arith.constant 3.200000e+01 : f32
    %242 = vector.broadcast %cst_86 : f32 to vector<8x1xf32>
    %243 = arith.divf %241, %242 : vector<8x1xf32>
    %244 = vector.broadcast %243 : vector<8x1xf32> to vector<8x32xf32>
    %245 = arith.subf %231, %244 : vector<8x32xf32>
    %246 = arith.mulf %245, %245 : vector<8x32xf32>
    %cst_87 = arith.constant dense<0.000000e+00> : vector<8xf32>
    %247 = vector.multi_reduction <add>, %246, %cst_87 [1] : vector<8x32xf32> to vector<8xf32>
    %248 = vector.shape_cast %247 : vector<8xf32> to vector<8x1xf32>
    %cst_88 = arith.constant 0.0322580636 : f32
    %249 = vector.broadcast %cst_88 : f32 to vector<8x1xf32>
    %250 = arith.mulf %248, %249 : vector<8x1xf32>
    %251 = math.sqrt %250 : vector<8x1xf32>
    %252 = vector.broadcast %237 : vector<1x32xf32> to vector<8x32xf32>
    %253 = arith.mulf %252, %245 : vector<8x32xf32>
    %cst_89 = arith.constant 9.99999997E-7 : f32
    %254 = vector.broadcast %cst_89 : f32 to vector<8x1xf32>
    %255 = arith.addf %251, %254 : vector<8x1xf32>
    %256 = tpu.reciprocal %255 : vector<8x1xf32> -> vector<8x1xf32>
    %257 = vector.broadcast %256 : vector<8x1xf32> to vector<8x32xf32>
    %258 = arith.mulf %253, %257 : vector<8x32xf32>
    %259 = vector.broadcast %239 : vector<1x32xf32> to vector<8x32xf32>
    %260 = arith.addf %258, %259 : vector<8x32xf32>
    %c1_90 = arith.constant 1 : index
    %c0_91 = arith.constant 0 : index
    %c0_92 = arith.constant 0 : index
    %261 = vector.load %arg5[%c1_90, %c0_91, %c0_92] : memref<2x32x96xf32, #tpu.memory_space<vmem>>, vector<1x32x96xf32>
    %262 = vector.shape_cast %261 : vector<1x32x96xf32> to vector<32x96xf32>
    %cst_93 = arith.constant dense<0.000000e+00> : vector<8x96xf32>
    %263 = tpu.matmul %260, %262, %cst_93 {dimension_numbers = #tpu.dot_dimension_numbers<[1], [0], [0], [1], [0, 0, 1, 1], [], []>} : vector<8x32xf32>, vector<32x96xf32>, vector<8x96xf32> -> vector<8x96xf32>
    %264 = vector.extract_strided_slice %263 {offsets = [0, 0], sizes = [8, 32], strides = [1, 1]} : vector<8x96xf32> to vector<8x32xf32>
    %265 = vector.extract_strided_slice %263 {offsets = [0, 32], sizes = [8, 32], strides = [1, 1]} : vector<8x96xf32> to vector<8x32xf32>
    %266 = vector.extract_strided_slice %263 {offsets = [0, 64], sizes = [8, 32], strides = [1, 1]} : vector<8x96xf32> to vector<8x32xf32>
    %c1_94 = arith.constant 1 : index
    %c0_95 = arith.constant 0 : index
    %c0_96 = arith.constant 0 : index
    %267 = vector.load %arg6[%c1_94, %c0_95, %c0_96] : memref<2x32x32xf32, #tpu.memory_space<vmem>>, vector<1x32x32xf32>
    %268 = vector.shape_cast %267 : vector<1x32x32xf32> to vector<32x32xf32>
    %269 = vector.extract_strided_slice %264 {offsets = [0, 0], sizes = [8, 8], strides = [1, 1]} : vector<8x32xf32> to vector<8x8xf32>
    %270 = vector.extract_strided_slice %264 {offsets = [0, 8], sizes = [8, 8], strides = [1, 1]} : vector<8x32xf32> to vector<8x8xf32>
    %271 = vector.extract_strided_slice %264 {offsets = [0, 16], sizes = [8, 8], strides = [1, 1]} : vector<8x32xf32> to vector<8x8xf32>
    %272 = vector.extract_strided_slice %264 {offsets = [0, 24], sizes = [8, 8], strides = [1, 1]} : vector<8x32xf32> to vector<8x8xf32>
    %273 = vector.shape_cast %269 : vector<8x8xf32> to vector<1x8x8xf32>
    %274 = vector.shape_cast %270 : vector<8x8xf32> to vector<1x8x8xf32>
    %275 = vector.shape_cast %271 : vector<8x8xf32> to vector<1x8x8xf32>
    %276 = vector.shape_cast %272 : vector<8x8xf32> to vector<1x8x8xf32>
    %277 = tpu.concatenate %273, %274, %275, %276 in 0 : vector<1x8x8xf32>, vector<1x8x8xf32>, vector<1x8x8xf32>, vector<1x8x8xf32> -> vector<4x8x8xf32>
    %278 = vector.extract_strided_slice %265 {offsets = [0, 0], sizes = [8, 8], strides = [1, 1]} : vector<8x32xf32> to vector<8x8xf32>
    %279 = vector.extract_strided_slice %265 {offsets = [0, 8], sizes = [8, 8], strides = [1, 1]} : vector<8x32xf32> to vector<8x8xf32>
    %280 = vector.extract_strided_slice %265 {offsets = [0, 16], sizes = [8, 8], strides = [1, 1]} : vector<8x32xf32> to vector<8x8xf32>
    %281 = vector.extract_strided_slice %265 {offsets = [0, 24], sizes = [8, 8], strides = [1, 1]} : vector<8x32xf32> to vector<8x8xf32>
    %282 = vector.shape_cast %278 : vector<8x8xf32> to vector<1x8x8xf32>
    %283 = vector.shape_cast %279 : vector<8x8xf32> to vector<1x8x8xf32>
    %284 = vector.shape_cast %280 : vector<8x8xf32> to vector<1x8x8xf32>
    %285 = vector.shape_cast %281 : vector<8x8xf32> to vector<1x8x8xf32>
    %286 = tpu.concatenate %282, %283, %284, %285 in 0 : vector<1x8x8xf32>, vector<1x8x8xf32>, vector<1x8x8xf32>, vector<1x8x8xf32> -> vector<4x8x8xf32>
    %287 = vector.extract_strided_slice %266 {offsets = [0, 0], sizes = [8, 8], strides = [1, 1]} : vector<8x32xf32> to vector<8x8xf32>
    %288 = vector.extract_strided_slice %266 {offsets = [0, 8], sizes = [8, 8], strides = [1, 1]} : vector<8x32xf32> to vector<8x8xf32>
    %289 = vector.extract_strided_slice %266 {offsets = [0, 16], sizes = [8, 8], strides = [1, 1]} : vector<8x32xf32> to vector<8x8xf32>
    %290 = vector.extract_strided_slice %266 {offsets = [0, 24], sizes = [8, 8], strides = [1, 1]} : vector<8x32xf32> to vector<8x8xf32>
    %291 = vector.shape_cast %287 : vector<8x8xf32> to vector<1x8x8xf32>
    %292 = vector.shape_cast %288 : vector<8x8xf32> to vector<1x8x8xf32>
    %293 = vector.shape_cast %289 : vector<8x8xf32> to vector<1x8x8xf32>
    %294 = vector.shape_cast %290 : vector<8x8xf32> to vector<1x8x8xf32>
    %295 = tpu.concatenate %291, %292, %293, %294 in 0 : vector<1x8x8xf32>, vector<1x8x8xf32>, vector<1x8x8xf32>, vector<1x8x8xf32> -> vector<4x8x8xf32>
    "tpu.trace_start"() <{level = 10 : i32, message = "hqd,hkd->hqk"}> : () -> ()
    %cst_97 = arith.constant dense<0.000000e+00> : vector<4x8x8xf32>
    %296 = tpu.matmul %277, %286, %cst_97 {dimension_numbers = #tpu.dot_dimension_numbers<[2], [2], [1], [1], [0, 0, 0, 1, 1, 1], [0], [0]>} : vector<4x8x8xf32>, vector<4x8x8xf32>, vector<4x8x8xf32> -> vector<4x8x8xf32>
    "tpu.trace_stop"() : () -> ()
    %cst_98 = arith.constant 0.353553385 : f32
    %297 = vector.broadcast %cst_98 : f32 to vector<4x8x8xf32>
    %298 = arith.mulf %296, %297 : vector<4x8x8xf32>
    %299 = vector.shape_cast %5 : vector<8x8xf32> to vector<1x8x8xf32>
    %300 = vector.broadcast %299 : vector<1x8x8xf32> to vector<4x8x8xf32>
    %301 = arith.addf %298, %300 : vector<4x8x8xf32>
    %cst_99 = arith.constant dense<0xFF800000> : vector<4x8xf32>
    %302 = vector.multi_reduction <maximumf>, %301, %cst_99 [2] : vector<4x8x8xf32> to vector<4x8xf32>
    %303 = vector.shape_cast %302 : vector<4x8xf32> to vector<4x8x1xf32>
    %304 = vector.broadcast %303 : vector<4x8x1xf32> to vector<4x8x8xf32>
    %305 = arith.subf %301, %304 : vector<4x8x8xf32>
    %306 = math.exp %305 : vector<4x8x8xf32>
    %cst_100 = arith.constant dense<0.000000e+00> : vector<4x8xf32>
    %307 = vector.multi_reduction <add>, %306, %cst_100 [2] : vector<4x8x8xf32> to vector<4x8xf32>
    %308 = vector.shape_cast %307 : vector<4x8xf32> to vector<4x8x1xf32>
    %309 = tpu.reciprocal %308 : vector<4x8x1xf32> -> vector<4x8x1xf32>
    %310 = vector.broadcast %309 : vector<4x8x1xf32> to vector<4x8x8xf32>
    %311 = arith.mulf %306, %310 : vector<4x8x8xf32>
    "tpu.trace_start"() <{level = 10 : i32, message = "hqk,hkd->hqd"}> : () -> ()
    %cst_101 = arith.constant dense<0.000000e+00> : vector<4x8x8xf32>
    %312 = tpu.matmul %311, %295, %cst_101 {dimension_numbers = #tpu.dot_dimension_numbers<[2], [1], [1], [2], [0, 0, 0, 1, 1, 2], [0], [0]>} : vector<4x8x8xf32>, vector<4x8x8xf32>, vector<4x8x8xf32> -> vector<4x8x8xf32>
    "tpu.trace_stop"() : () -> ()
    %313 = vector.extract_strided_slice %312 {offsets = [0, 0, 0], sizes = [1, 8, 8], strides = [1, 1, 1]} : vector<4x8x8xf32> to vector<1x8x8xf32>
    %314 = vector.shape_cast %313 : vector<1x8x8xf32> to vector<8x8xf32>
    %315 = vector.extract_strided_slice %312 {offsets = [1, 0, 0], sizes = [1, 8, 8], strides = [1, 1, 1]} : vector<4x8x8xf32> to vector<1x8x8xf32>
    %316 = vector.shape_cast %315 : vector<1x8x8xf32> to vector<8x8xf32>
    %317 = vector.extract_strided_slice %312 {offsets = [2, 0, 0], sizes = [1, 8, 8], strides = [1, 1, 1]} : vector<4x8x8xf32> to vector<1x8x8xf32>
    %318 = vector.shape_cast %317 : vector<1x8x8xf32> to vector<8x8xf32>
    %319 = vector.extract_strided_slice %312 {offsets = [3, 0, 0], sizes = [1, 8, 8], strides = [1, 1, 1]} : vector<4x8x8xf32> to vector<1x8x8xf32>
    %320 = vector.shape_cast %319 : vector<1x8x8xf32> to vector<8x8xf32>
    %321 = tpu.concatenate %314, %316, %318, %320 in 1 : vector<8x8xf32>, vector<8x8xf32>, vector<8x8xf32>, vector<8x8xf32> -> vector<8x32xf32>
    %cst_102 = arith.constant dense<0.000000e+00> : vector<8x32xf32>
    %322 = tpu.matmul %321, %268, %cst_102 {dimension_numbers = #tpu.dot_dimension_numbers<[1], [0], [0], [1], [0, 0, 1, 1], [], []>} : vector<8x32xf32>, vector<32x32xf32>, vector<8x32xf32> -> vector<8x32xf32>
    %323 = arith.addf %231, %322 : vector<8x32xf32>
    %324 = vector.extract_strided_slice %233 {offsets = [1, 0, 0], sizes = [1, 1, 32], strides = [1, 1, 1]} : vector<3x1x32xf32> to vector<1x1x32xf32>
    %325 = vector.shape_cast %324 : vector<1x1x32xf32> to vector<1x32xf32>
    %326 = vector.extract_strided_slice %235 {offsets = [1, 0, 0], sizes = [1, 1, 32], strides = [1, 1, 1]} : vector<3x1x32xf32> to vector<1x1x32xf32>
    %327 = vector.shape_cast %326 : vector<1x1x32xf32> to vector<1x32xf32>
    %cst_103 = arith.constant dense<0.000000e+00> : vector<8xf32>
    %328 = vector.multi_reduction <add>, %323, %cst_103 [1] : vector<8x32xf32> to vector<8xf32>
    %329 = vector.shape_cast %328 : vector<8xf32> to vector<8x1xf32>
    %cst_104 = arith.constant 3.200000e+01 : f32
    %330 = vector.broadcast %cst_104 : f32 to vector<8x1xf32>
    %331 = arith.divf %329, %330 : vector<8x1xf32>
    %332 = vector.broadcast %331 : vector<8x1xf32> to vector<8x32xf32>
    %333 = arith.subf %323, %332 : vector<8x32xf32>
    %334 = arith.mulf %333, %333 : vector<8x32xf32>
    %cst_105 = arith.constant dense<0.000000e+00> : vector<8xf32>
    %335 = vector.multi_reduction <add>, %334, %cst_105 [1] : vector<8x32xf32> to vector<8xf32>
    %336 = vector.shape_cast %335 : vector<8xf32> to vector<8x1xf32>
    %cst_106 = arith.constant 0.0322580636 : f32
    %337 = vector.broadcast %cst_106 : f32 to vector<8x1xf32>
    %338 = arith.mulf %336, %337 : vector<8x1xf32>
    %339 = math.sqrt %338 : vector<8x1xf32>
    %340 = vector.broadcast %325 : vector<1x32xf32> to vector<8x32xf32>
    %341 = arith.mulf %340, %333 : vector<8x32xf32>
    %cst_107 = arith.constant 9.99999997E-7 : f32
    %342 = vector.broadcast %cst_107 : f32 to vector<8x1xf32>
    %343 = arith.addf %339, %342 : vector<8x1xf32>
    %344 = tpu.reciprocal %343 : vector<8x1xf32> -> vector<8x1xf32>
    %345 = vector.broadcast %344 : vector<8x1xf32> to vector<8x32xf32>
    %346 = arith.mulf %341, %345 : vector<8x32xf32>
    %347 = vector.broadcast %327 : vector<1x32xf32> to vector<8x32xf32>
    %348 = arith.addf %346, %347 : vector<8x32xf32>
    %c1_108 = arith.constant 1 : index
    %c0_109 = arith.constant 0 : index
    %c0_110 = arith.constant 0 : index
    %349 = vector.load %arg7[%c1_108, %c0_109, %c0_110] : memref<2x32x32xf32, #tpu.memory_space<vmem>>, vector<1x32x32xf32>
    %350 = vector.shape_cast %349 : vector<1x32x32xf32> to vector<32x32xf32>
    %cst_111 = arith.constant dense<0.000000e+00> : vector<8x32xf32>
    %351 = tpu.matmul %348, %350, %cst_111 {dimension_numbers = #tpu.dot_dimension_numbers<[1], [0], [0], [1], [0, 0, 1, 1], [], []>} : vector<8x32xf32>, vector<32x32xf32>, vector<8x32xf32> -> vector<8x32xf32>
    %c1_112 = arith.constant 1 : index
    %c0_113 = arith.constant 0 : index
    %c0_114 = arith.constant 0 : index
    %352 = vector.load %arg8[%c1_112, %c0_113, %c0_114] : memref<2x32x64xf32, #tpu.memory_space<vmem>>, vector<1x32x64xf32>
    %353 = vector.shape_cast %352 : vector<1x32x64xf32> to vector<32x64xf32>
    %cst_115 = arith.constant dense<0.000000e+00> : vector<8x64xf32>
    %354 = tpu.matmul %3, %353, %cst_115 {dimension_numbers = #tpu.dot_dimension_numbers<[1], [0], [0], [1], [0, 0, 1, 1], [], []>} : vector<8x32xf32>, vector<32x64xf32>, vector<8x64xf32> -> vector<8x64xf32>
    %355 = vector.extract_strided_slice %354 {offsets = [0, 0], sizes = [8, 32], strides = [1, 1]} : vector<8x64xf32> to vector<8x32xf32>
    %356 = vector.extract_strided_slice %354 {offsets = [0, 32], sizes = [8, 32], strides = [1, 1]} : vector<8x64xf32> to vector<8x32xf32>
    %c1_116 = arith.constant 1 : index
    %c0_117 = arith.constant 0 : index
    %c0_118 = arith.constant 0 : index
    %357 = vector.load %arg9[%c1_116, %c0_117, %c0_118] : memref<2x32x32xf32, #tpu.memory_space<vmem>>, vector<1x32x32xf32>
    %358 = vector.shape_cast %357 : vector<1x32x32xf32> to vector<32x32xf32>
    %359 = vector.extract_strided_slice %351 {offsets = [0, 0], sizes = [8, 8], strides = [1, 1]} : vector<8x32xf32> to vector<8x8xf32>
    %360 = vector.extract_strided_slice %351 {offsets = [0, 8], sizes = [8, 8], strides = [1, 1]} : vector<8x32xf32> to vector<8x8xf32>
    %361 = vector.extract_strided_slice %351 {offsets = [0, 16], sizes = [8, 8], strides = [1, 1]} : vector<8x32xf32> to vector<8x8xf32>
    %362 = vector.extract_strided_slice %351 {offsets = [0, 24], sizes = [8, 8], strides = [1, 1]} : vector<8x32xf32> to vector<8x8xf32>
    %363 = vector.shape_cast %359 : vector<8x8xf32> to vector<1x8x8xf32>
    %364 = vector.shape_cast %360 : vector<8x8xf32> to vector<1x8x8xf32>
    %365 = vector.shape_cast %361 : vector<8x8xf32> to vector<1x8x8xf32>
    %366 = vector.shape_cast %362 : vector<8x8xf32> to vector<1x8x8xf32>
    %367 = tpu.concatenate %363, %364, %365, %366 in 0 : vector<1x8x8xf32>, vector<1x8x8xf32>, vector<1x8x8xf32>, vector<1x8x8xf32> -> vector<4x8x8xf32>
    %368 = vector.extract_strided_slice %355 {offsets = [0, 0], sizes = [8, 8], strides = [1, 1]} : vector<8x32xf32> to vector<8x8xf32>
    %369 = vector.extract_strided_slice %355 {offsets = [0, 8], sizes = [8, 8], strides = [1, 1]} : vector<8x32xf32> to vector<8x8xf32>
    %370 = vector.extract_strided_slice %355 {offsets = [0, 16], sizes = [8, 8], strides = [1, 1]} : vector<8x32xf32> to vector<8x8xf32>
    %371 = vector.extract_strided_slice %355 {offsets = [0, 24], sizes = [8, 8], strides = [1, 1]} : vector<8x32xf32> to vector<8x8xf32>
    %372 = vector.shape_cast %368 : vector<8x8xf32> to vector<1x8x8xf32>
    %373 = vector.shape_cast %369 : vector<8x8xf32> to vector<1x8x8xf32>
    %374 = vector.shape_cast %370 : vector<8x8xf32> to vector<1x8x8xf32>
    %375 = vector.shape_cast %371 : vector<8x8xf32> to vector<1x8x8xf32>
    %376 = tpu.concatenate %372, %373, %374, %375 in 0 : vector<1x8x8xf32>, vector<1x8x8xf32>, vector<1x8x8xf32>, vector<1x8x8xf32> -> vector<4x8x8xf32>
    %377 = vector.extract_strided_slice %356 {offsets = [0, 0], sizes = [8, 8], strides = [1, 1]} : vector<8x32xf32> to vector<8x8xf32>
    %378 = vector.extract_strided_slice %356 {offsets = [0, 8], sizes = [8, 8], strides = [1, 1]} : vector<8x32xf32> to vector<8x8xf32>
    %379 = vector.extract_strided_slice %356 {offsets = [0, 16], sizes = [8, 8], strides = [1, 1]} : vector<8x32xf32> to vector<8x8xf32>
    %380 = vector.extract_strided_slice %356 {offsets = [0, 24], sizes = [8, 8], strides = [1, 1]} : vector<8x32xf32> to vector<8x8xf32>
    %381 = vector.shape_cast %377 : vector<8x8xf32> to vector<1x8x8xf32>
    %382 = vector.shape_cast %378 : vector<8x8xf32> to vector<1x8x8xf32>
    %383 = vector.shape_cast %379 : vector<8x8xf32> to vector<1x8x8xf32>
    %384 = vector.shape_cast %380 : vector<8x8xf32> to vector<1x8x8xf32>
    %385 = tpu.concatenate %381, %382, %383, %384 in 0 : vector<1x8x8xf32>, vector<1x8x8xf32>, vector<1x8x8xf32>, vector<1x8x8xf32> -> vector<4x8x8xf32>
    "tpu.trace_start"() <{level = 10 : i32, message = "hqd,hkd->hqk"}> : () -> ()
    %cst_119 = arith.constant dense<0.000000e+00> : vector<4x8x8xf32>
    %386 = tpu.matmul %367, %376, %cst_119 {dimension_numbers = #tpu.dot_dimension_numbers<[2], [2], [1], [1], [0, 0, 0, 1, 1, 1], [0], [0]>} : vector<4x8x8xf32>, vector<4x8x8xf32>, vector<4x8x8xf32> -> vector<4x8x8xf32>
    "tpu.trace_stop"() : () -> ()
    %cst_120 = arith.constant 0.353553385 : f32
    %387 = vector.broadcast %cst_120 : f32 to vector<4x8x8xf32>
    %388 = arith.mulf %386, %387 : vector<4x8x8xf32>
    %389 = vector.shape_cast %7 : vector<8x8xf32> to vector<1x8x8xf32>
    %390 = vector.broadcast %389 : vector<1x8x8xf32> to vector<4x8x8xf32>
    %391 = arith.addf %388, %390 : vector<4x8x8xf32>
    %cst_121 = arith.constant dense<0xFF800000> : vector<4x8xf32>
    %392 = vector.multi_reduction <maximumf>, %391, %cst_121 [2] : vector<4x8x8xf32> to vector<4x8xf32>
    %393 = vector.shape_cast %392 : vector<4x8xf32> to vector<4x8x1xf32>
    %394 = vector.broadcast %393 : vector<4x8x1xf32> to vector<4x8x8xf32>
    %395 = arith.subf %391, %394 : vector<4x8x8xf32>
    %396 = math.exp %395 : vector<4x8x8xf32>
    %cst_122 = arith.constant dense<0.000000e+00> : vector<4x8xf32>
    %397 = vector.multi_reduction <add>, %396, %cst_122 [2] : vector<4x8x8xf32> to vector<4x8xf32>
    %398 = vector.shape_cast %397 : vector<4x8xf32> to vector<4x8x1xf32>
    %399 = tpu.reciprocal %398 : vector<4x8x1xf32> -> vector<4x8x1xf32>
    %400 = vector.broadcast %399 : vector<4x8x1xf32> to vector<4x8x8xf32>
    %401 = arith.mulf %396, %400 : vector<4x8x8xf32>
    "tpu.trace_start"() <{level = 10 : i32, message = "hqk,hkd->hqd"}> : () -> ()
    %cst_123 = arith.constant dense<0.000000e+00> : vector<4x8x8xf32>
    %402 = tpu.matmul %401, %385, %cst_123 {dimension_numbers = #tpu.dot_dimension_numbers<[2], [1], [1], [2], [0, 0, 0, 1, 1, 2], [0], [0]>} : vector<4x8x8xf32>, vector<4x8x8xf32>, vector<4x8x8xf32> -> vector<4x8x8xf32>
    "tpu.trace_stop"() : () -> ()
    %403 = vector.extract_strided_slice %402 {offsets = [0, 0, 0], sizes = [1, 8, 8], strides = [1, 1, 1]} : vector<4x8x8xf32> to vector<1x8x8xf32>
    %404 = vector.shape_cast %403 : vector<1x8x8xf32> to vector<8x8xf32>
    %405 = vector.extract_strided_slice %402 {offsets = [1, 0, 0], sizes = [1, 8, 8], strides = [1, 1, 1]} : vector<4x8x8xf32> to vector<1x8x8xf32>
    %406 = vector.shape_cast %405 : vector<1x8x8xf32> to vector<8x8xf32>
    %407 = vector.extract_strided_slice %402 {offsets = [2, 0, 0], sizes = [1, 8, 8], strides = [1, 1, 1]} : vector<4x8x8xf32> to vector<1x8x8xf32>
    %408 = vector.shape_cast %407 : vector<1x8x8xf32> to vector<8x8xf32>
    %409 = vector.extract_strided_slice %402 {offsets = [3, 0, 0], sizes = [1, 8, 8], strides = [1, 1, 1]} : vector<4x8x8xf32> to vector<1x8x8xf32>
    %410 = vector.shape_cast %409 : vector<1x8x8xf32> to vector<8x8xf32>
    %411 = tpu.concatenate %404, %406, %408, %410 in 1 : vector<8x8xf32>, vector<8x8xf32>, vector<8x8xf32>, vector<8x8xf32> -> vector<8x32xf32>
    %cst_124 = arith.constant dense<0.000000e+00> : vector<8x32xf32>
    %412 = tpu.matmul %411, %358, %cst_124 {dimension_numbers = #tpu.dot_dimension_numbers<[1], [0], [0], [1], [0, 0, 1, 1], [], []>} : vector<8x32xf32>, vector<32x32xf32>, vector<8x32xf32> -> vector<8x32xf32>
    %413 = arith.addf %323, %412 : vector<8x32xf32>
    %414 = vector.extract_strided_slice %233 {offsets = [2, 0, 0], sizes = [1, 1, 32], strides = [1, 1, 1]} : vector<3x1x32xf32> to vector<1x1x32xf32>
    %415 = vector.shape_cast %414 : vector<1x1x32xf32> to vector<1x32xf32>
    %416 = vector.extract_strided_slice %235 {offsets = [2, 0, 0], sizes = [1, 1, 32], strides = [1, 1, 1]} : vector<3x1x32xf32> to vector<1x1x32xf32>
    %417 = vector.shape_cast %416 : vector<1x1x32xf32> to vector<1x32xf32>
    %cst_125 = arith.constant dense<0.000000e+00> : vector<8xf32>
    %418 = vector.multi_reduction <add>, %413, %cst_125 [1] : vector<8x32xf32> to vector<8xf32>
    %419 = vector.shape_cast %418 : vector<8xf32> to vector<8x1xf32>
    %cst_126 = arith.constant 3.200000e+01 : f32
    %420 = vector.broadcast %cst_126 : f32 to vector<8x1xf32>
    %421 = arith.divf %419, %420 : vector<8x1xf32>
    %422 = vector.broadcast %421 : vector<8x1xf32> to vector<8x32xf32>
    %423 = arith.subf %413, %422 : vector<8x32xf32>
    %424 = arith.mulf %423, %423 : vector<8x32xf32>
    %cst_127 = arith.constant dense<0.000000e+00> : vector<8xf32>
    %425 = vector.multi_reduction <add>, %424, %cst_127 [1] : vector<8x32xf32> to vector<8xf32>
    %426 = vector.shape_cast %425 : vector<8xf32> to vector<8x1xf32>
    %cst_128 = arith.constant 0.0322580636 : f32
    %427 = vector.broadcast %cst_128 : f32 to vector<8x1xf32>
    %428 = arith.mulf %426, %427 : vector<8x1xf32>
    %429 = math.sqrt %428 : vector<8x1xf32>
    %430 = vector.broadcast %415 : vector<1x32xf32> to vector<8x32xf32>
    %431 = arith.mulf %430, %423 : vector<8x32xf32>
    %cst_129 = arith.constant 9.99999997E-7 : f32
    %432 = vector.broadcast %cst_129 : f32 to vector<8x1xf32>
    %433 = arith.addf %429, %432 : vector<8x1xf32>
    %434 = tpu.reciprocal %433 : vector<8x1xf32> -> vector<8x1xf32>
    %435 = vector.broadcast %434 : vector<8x1xf32> to vector<8x32xf32>
    %436 = arith.mulf %431, %435 : vector<8x32xf32>
    %437 = vector.broadcast %417 : vector<1x32xf32> to vector<8x32xf32>
    %438 = arith.addf %436, %437 : vector<8x32xf32>
    %c1_130 = arith.constant 1 : index
    %c0_131 = arith.constant 0 : index
    %c0_132 = arith.constant 0 : index
    %439 = vector.load %arg10[%c1_130, %c0_131, %c0_132] : memref<2x32x64xf32, #tpu.memory_space<vmem>>, vector<1x32x64xf32>
    %440 = vector.shape_cast %439 : vector<1x32x64xf32> to vector<32x64xf32>
    %cst_133 = arith.constant dense<0.000000e+00> : vector<8x64xf32>
    %441 = tpu.matmul %438, %440, %cst_133 {dimension_numbers = #tpu.dot_dimension_numbers<[1], [0], [0], [1], [0, 0, 1, 1], [], []>} : vector<8x32xf32>, vector<32x64xf32>, vector<8x64xf32> -> vector<8x64xf32>
    %c1_134 = arith.constant 1 : index
    %c0_135 = arith.constant 0 : index
    %c0_136 = arith.constant 0 : index
    %442 = vector.load %arg11[%c1_134, %c0_135, %c0_136] : memref<2x1x64xf32, #tpu.memory_space<vmem>>, vector<1x1x64xf32>
    %443 = vector.shape_cast %442 : vector<1x1x64xf32> to vector<1x64xf32>
    %444 = vector.broadcast %443 : vector<1x64xf32> to vector<8x64xf32>
    %445 = arith.addf %441, %444 : vector<8x64xf32>
    %cst_137 = arith.constant 0.000000e+00 : f32
    %446 = vector.broadcast %cst_137 : f32 to vector<8x64xf32>
    %447 = arith.maximumf %445, %446 : vector<8x64xf32>
    %c1_138 = arith.constant 1 : index
    %c0_139 = arith.constant 0 : index
    %c0_140 = arith.constant 0 : index
    %448 = vector.load %arg12[%c1_138, %c0_139, %c0_140] : memref<2x64x32xf32, #tpu.memory_space<vmem>>, vector<1x64x32xf32>
    %449 = vector.shape_cast %448 : vector<1x64x32xf32> to vector<64x32xf32>
    %cst_141 = arith.constant dense<0.000000e+00> : vector<8x32xf32>
    %450 = tpu.matmul %447, %449, %cst_141 {dimension_numbers = #tpu.dot_dimension_numbers<[1], [0], [0], [1], [0, 0, 1, 1], [], []>} : vector<8x64xf32>, vector<64x32xf32>, vector<8x32xf32> -> vector<8x32xf32>
    %451 = arith.addf %413, %450 : vector<8x32xf32>
    %c1_142 = arith.constant 1 : index
    %c0_143 = arith.constant 0 : index
    %c0_144 = arith.constant 0 : index
    %452 = vector.load %arg13[%c1_142, %c0_143, %c0_144] : memref<2x1x32xf32, #tpu.memory_space<vmem>>, vector<1x1x32xf32>
    %453 = vector.shape_cast %452 : vector<1x1x32xf32> to vector<1x32xf32>
    %454 = vector.broadcast %453 : vector<1x32xf32> to vector<8x32xf32>
    %455 = arith.addf %451, %454 : vector<8x32xf32>
    %c0_145 = arith.constant 0 : index
    %c0_146 = arith.constant 0 : index
    %456 = vector.load %arg16[%c0_145, %c0_146] : memref<1x32xf32, #tpu.memory_space<vmem>>, vector<1x32xf32>
    %c0_147 = arith.constant 0 : index
    %c0_148 = arith.constant 0 : index
    %457 = vector.load %arg17[%c0_147, %c0_148] : memref<1x32xf32, #tpu.memory_space<vmem>>, vector<1x32xf32>
    %cst_149 = arith.constant dense<0.000000e+00> : vector<8xf32>
    %458 = vector.multi_reduction <add>, %455, %cst_149 [1] : vector<8x32xf32> to vector<8xf32>
    %459 = vector.shape_cast %458 : vector<8xf32> to vector<8x1xf32>
    %cst_150 = arith.constant 3.200000e+01 : f32
    %460 = vector.broadcast %cst_150 : f32 to vector<8x1xf32>
    %461 = arith.divf %459, %460 : vector<8x1xf32>
    %462 = vector.broadcast %461 : vector<8x1xf32> to vector<8x32xf32>
    %463 = arith.subf %455, %462 : vector<8x32xf32>
    %464 = arith.mulf %463, %463 : vector<8x32xf32>
    %cst_151 = arith.constant dense<0.000000e+00> : vector<8xf32>
    %465 = vector.multi_reduction <add>, %464, %cst_151 [1] : vector<8x32xf32> to vector<8xf32>
    %466 = vector.shape_cast %465 : vector<8xf32> to vector<8x1xf32>
    %cst_152 = arith.constant 0.0322580636 : f32
    %467 = vector.broadcast %cst_152 : f32 to vector<8x1xf32>
    %468 = arith.mulf %466, %467 : vector<8x1xf32>
    %469 = math.sqrt %468 : vector<8x1xf32>
    %470 = vector.broadcast %456 : vector<1x32xf32> to vector<8x32xf32>
    %471 = arith.mulf %470, %463 : vector<8x32xf32>
    %cst_153 = arith.constant 9.99999997E-7 : f32
    %472 = vector.broadcast %cst_153 : f32 to vector<8x1xf32>
    %473 = arith.addf %469, %472 : vector<8x1xf32>
    %474 = tpu.reciprocal %473 : vector<8x1xf32> -> vector<8x1xf32>
    %475 = vector.broadcast %474 : vector<8x1xf32> to vector<8x32xf32>
    %476 = arith.mulf %471, %475 : vector<8x32xf32>
    %477 = vector.broadcast %457 : vector<1x32xf32> to vector<8x32xf32>
    %478 = arith.addf %476, %477 : vector<8x32xf32>
    %c0_154 = arith.constant 0 : index
    %c0_155 = arith.constant 0 : index
    %c0_156 = arith.constant 0 : index
    %479 = vector.load %arg18[%c0_154, %c0_155, %c0_156] : memref<1x8x32xf32, #tpu.memory_space<vmem>>, vector<1x8x32xf32>
    %480 = vector.shape_cast %479 : vector<1x8x32xf32> to vector<8x32xf32>
    %481 = vector.shape_cast %478 : vector<8x32xf32> to vector<1x8x32xf32>
    tpu.vector_store %arg18[%c0_154, %c0_155, %c0_156], %481 {strides = array<i32>} : memref<1x8x32xf32, #tpu.memory_space<vmem>>, vector<1x8x32xf32>,
    return
  }
  func.func @transform_0(%arg0: i32) -> (i32, i32, i32) {
    %c0_i32 = arith.constant 0 : i32
    %c0_i32_0 = arith.constant 0 : i32
    %c0_i32_1 = arith.constant 0 : i32
    return %arg0, %c0_i32, %c0_i32_0 : i32, i32, i32
  }
  func.func @transform_1(%arg0: i32) -> (i32, i32, i32) {
    %c0_i32 = arith.constant 0 : i32
    %c0_i32_0 = arith.constant 0 : i32
    %c0_i32_1 = arith.constant 0 : i32
    return %arg0, %c0_i32, %c0_i32_0 : i32, i32, i32
  }
  func.func @transform_2(%arg0: i32) -> (i32, i32, i32) {
    %c0_i32 = arith.constant 0 : i32
    %c0_i32_0 = arith.constant 0 : i32
    %c0_i32_1 = arith.constant 0 : i32
    return %arg0, %c0_i32, %c0_i32_0 : i32, i32, i32
  }
  func.func @transform_3(%arg0: i32) -> (i32, i32, i32) {
    %c0_i32 = arith.constant 0 : i32
    %c0_i32_0 = arith.constant 0 : i32
    %c0_i32_1 = arith.constant 0 : i32
    return %arg0, %c0_i32, %c0_i32_0 : i32, i32, i32
  }
  func.func @transform_4(%arg0: i32) -> (i32, i32, i32) {
    %c0_i32 = arith.constant 0 : i32
    %c0_i32_0 = arith.constant 0 : i32
    %c0_i32_1 = arith.constant 0 : i32
    %c0_i32_2 = arith.constant 0 : i32
    return %c0_i32, %c0_i32_0, %c0_i32_1 : i32, i32, i32
  }
  func.func @transform_5(%arg0: i32) -> (i32, i32, i32) {
    %c0_i32 = arith.constant 0 : i32
    %c0_i32_0 = arith.constant 0 : i32
    %c0_i32_1 = arith.constant 0 : i32
    %c0_i32_2 = arith.constant 0 : i32
    return %c0_i32, %c0_i32_0, %c0_i32_1 : i32, i32, i32
  }
  func.func @transform_6(%arg0: i32) -> (i32, i32, i32) {
    %c0_i32 = arith.constant 0 : i32
    %c0_i32_0 = arith.constant 0 : i32
    %c0_i32_1 = arith.constant 0 : i32
    %c0_i32_2 = arith.constant 0 : i32
    return %c0_i32, %c0_i32_0, %c0_i32_1 : i32, i32, i32
  }
  func.func @transform_7(%arg0: i32) -> (i32, i32, i32) {
    %c0_i32 = arith.constant 0 : i32
    %c0_i32_0 = arith.constant 0 : i32
    %c0_i32_1 = arith.constant 0 : i32
    %c0_i32_2 = arith.constant 0 : i32
    return %c0_i32, %c0_i32_0, %c0_i32_1 : i32, i32, i32
  }
  func.func @transform_8(%arg0: i32) -> (i32, i32, i32) {
    %c0_i32 = arith.constant 0 : i32
    %c0_i32_0 = arith.constant 0 : i32
    %c0_i32_1 = arith.constant 0 : i32
    %c0_i32_2 = arith.constant 0 : i32
    return %c0_i32, %c0_i32_0, %c0_i32_1 : i32, i32, i32
  }
  func.func @transform_9(%arg0: i32) -> (i32, i32, i32) {
    %c0_i32 = arith.constant 0 : i32
    %c0_i32_0 = arith.constant 0 : i32
    %c0_i32_1 = arith.constant 0 : i32
    %c0_i32_2 = arith.constant 0 : i32
    return %c0_i32, %c0_i32_0, %c0_i32_1 : i32, i32, i32
  }
  func.func @transform_10(%arg0: i32) -> (i32, i32, i32) {
    %c0_i32 = arith.constant 0 : i32
    %c0_i32_0 = arith.constant 0 : i32
    %c0_i32_1 = arith.constant 0 : i32
    %c0_i32_2 = arith.constant 0 : i32
    return %c0_i32, %c0_i32_0, %c0_i32_1 : i32, i32, i32
  }
  func.func @transform_11(%arg0: i32) -> (i32, i32, i32) {
    %c0_i32 = arith.constant 0 : i32
    %c0_i32_0 = arith.constant 0 : i32
    %c0_i32_1 = arith.constant 0 : i32
    %c0_i32_2 = arith.constant 0 : i32
    return %c0_i32, %c0_i32_0, %c0_i32_1 : i32, i32, i32
  }
  func.func @transform_12(%arg0: i32) -> (i32, i32, i32) {
    %c0_i32 = arith.constant 0 : i32
    %c0_i32_0 = arith.constant 0 : i32
    %c0_i32_1 = arith.constant 0 : i32
    %c0_i32_2 = arith.constant 0 : i32
    return %c0_i32, %c0_i32_0, %c0_i32_1 : i32, i32, i32
  }
  func.func @transform_13(%arg0: i32) -> (i32, i32, i32, i32) {
    %c0_i32 = arith.constant 0 : i32
    %c0_i32_0 = arith.constant 0 : i32
    %c0_i32_1 = arith.constant 0 : i32
    %c0_i32_2 = arith.constant 0 : i32
    %c0_i32_3 = arith.constant 0 : i32
    return %c0_i32, %c0_i32_0, %c0_i32_1, %c0_i32_2 : i32, i32, i32, i32
  }
  func.func @transform_14(%arg0: i32) -> (i32, i32, i32, i32) {
    %c0_i32 = arith.constant 0 : i32
    %c0_i32_0 = arith.constant 0 : i32
    %c0_i32_1 = arith.constant 0 : i32
    %c0_i32_2 = arith.constant 0 : i32
    %c0_i32_3 = arith.constant 0 : i32
    return %c0_i32, %c0_i32_0, %c0_i32_1, %c0_i32_2 : i32, i32, i32, i32
  }
  func.func @transform_15(%arg0: i32) -> (i32, i32) {
    %c0_i32 = arith.constant 0 : i32
    %c0_i32_0 = arith.constant 0 : i32
    %c0_i32_1 = arith.constant 0 : i32
    return %c0_i32, %c0_i32_0 : i32, i32
  }
  func.func @transform_16(%arg0: i32) -> (i32, i32) {
    %c0_i32 = arith.constant 0 : i32
    %c0_i32_0 = arith.constant 0 : i32
    %c0_i32_1 = arith.constant 0 : i32
    return %c0_i32, %c0_i32_0 : i32, i32
  }
  func.func @transform_17(%arg0: i32) -> (i32, i32, i32) {
    %c0_i32 = arith.constant 0 : i32
    %c0_i32_0 = arith.constant 0 : i32
    %c0_i32_1 = arith.constant 0 : i32
    return %arg0, %c0_i32, %c0_i32_0 : i32, i32, i32
  }
}

</mosaic_0001>

<bundles_post_ra>
// kernel: tpu_custom_call.1
= control target key start
LH: loop header
LB: loop body
LE: loop exit
PB: predicated region body
PF: predicated region fallthrough
CT: control target
= control target key end

     0   :  { %s7292_s0 = inlined_call_operand.hbm [shape: f32[2,8,32], index: 0, kind: input, shape index: {}]   ;;  %s7293_s1 = inlined_call_operand.hbm [shape: f32[2,8,32], index: 1, kind: input, shape index: {}]   ;;  %s7294_s2 = inlined_call_operand.hbm [shape: f32[2,8,8], index: 2, kind: input, shape index: {}]   ;;  %s7295_s3 = inlined_call_operand.hbm [shape: f32[2,8,8], index: 3, kind: input, shape index: {}]   ;;  %s7296_s4 = inlined_call_operand.vmem [shape: f32[2,32,96], index: 4, kind: input, shape index: {}]   ;;  %s7297_s5 = inlined_call_operand.vmem [shape: f32[2,32,32], index: 5, kind: input, shape index: {}]   ;;  %s7298_s6 = inlined_call_operand.vmem [shape: f32[2,32,32], index: 6, kind: input, shape index: {}]   ;;  %s7299_s7 = inlined_call_operand.hbm [shape: f32[2,32,64], index: 7, kind: input, shape index: {}]   ;;  %s7300_s8 = inlined_call_operand.hbm [shape: f32[2,32,32], index: 8, kind: input, shape index: {}]   ;;  %s7301_s9 = inlined_call_operand.hbm [shape: f32[2,32,64], index: 9, kind: input, shape index: {}]   ;;  %s7302_s10 = inlined_call_operand.vmem [shape: f32[2,1,64], index: 10, kind: input, shape index: {}]   ;;  %s7303_s11 = inlined_call_operand.vmem [shape: f32[2,64,32], index: 11, kind: input, shape index: {}]   ;;  %s7304_s12 = inlined_call_operand.vmem [shape: f32[2,1,32], index: 12, kind: input, shape index: {}]   ;;  %s7305_s13 = inlined_call_operand.vmem [shape: f32[2,3,1,32], index: 13, kind: input, shape index: {}]   ;;  %s7306_s14 = inlined_call_operand.vmem [shape: f32[2,3,1,32], index: 14, kind: input, shape index: {}]   ;;  %s7307_s15 = inlined_call_operand.vmem [shape: f32[1,32], index: 15, kind: input, shape index: {}]   ;;  %s7308_s16 = inlined_call_operand.vmem [shape: f32[1,32], index: 16, kind: input, shape index: {}]   ;;  %s7309_s17 = inlined_call_operand.hbm [shape: f32[2,8,32], index: 17, kind: output, shape index: {}]  }
   0x1   :  { %7349 = sst [smem:[#allocation26_spill]] %s7292_s0 }
   0x2   :  { %7350 = sst [smem:[#allocation27_spill]] %s7293_s1 }
   0x3   :  { %7351 = sst [smem:[#allocation28_spill]] %s7294_s2 }
   0x4   :  { %7352 = sst [smem:[#allocation29_spill]] %s7298_s6 }
   0x5   :  { %7353 = sst [smem:[#allocation30_spill]] %s7299_s7 }
   0x6   :  { %7354 = sst [smem:[#allocation31_spill]] %s7300_s8 }
   0x7   :  { %7355 = sst [smem:[#allocation32_spill]] %s7302_s10 }
   0x8   :  { %7356 = sst [smem:[#allocation33_spill]] %s7303_s11 }
   0x9   :  { %7357 = sst [smem:[#allocation34_spill]] %s7304_s12 }
   0xa   :  { %7358 = sst [smem:[#allocation35_spill]] %s7307_s15 }
   0xb   :  { %7359 = sst [smem:[#allocation36_spill]] %s7308_s16 }
   0xc   :  { %7360 = sst [smem:[#allocation37_spill]] %s7309_s17 }
   0xd   :  { %22 = vsyncpa [#allocation3], 0 }
   0xe   :  { %24 = vsyncpa [#allocation3 + $0x1], 0 }
   0xf   :  { %25 = vsyncpa [#allocation6], 0 }
  0x10   :  { %27 = vsyncpa [#allocation6 + $0x1], 0 }
  0x11   :  { %28 = vsyncpa [#allocation9], 0 }
  0x12   :  { %30 = vsyncpa [#allocation9 + $0x1], 0 }
  0x13   :  { %31 = vsyncpa [#allocation12], 0 }
  0x14   :  { %32 = vsyncpa [#allocation4], 0 }
  0x15   :  { %34 = vsyncpa [#allocation4 + $0x1], 0  ;;  %s6313_s24 = smov 0   ;;  %s6315_s25 = smov 0  }
  0x16   :  { %s6317_s26 = smov 0   ;;  %s6319_s27 = smov 0  }
  0x17 LB: > { %7361 = sst [smem:[#allocation21_spill]] %s6188_s24  ;;  %s6334_s28 = sadd.s32 4294967295, %s6200_s27   ;;  %s6200_s27 = sphi %s6319_s27, %s7414_s27   ;;  %s6196_s26 = sphi %s6317_s26, %s7418_s26   ;;  %s6192_s25 = sphi %s6315_s25, %s7417_s25   ;;  %s6188_s24 = sphi %s6313_s24, %s7416_s24  }
  0x18   : > { %s5014_s29 = sadd.s32 4294967294, %s6200_s27   ;;  %p60_p0 = scmp.ne.s32.totalorder %s6192_s25, %s6188_s24 }
  0x19   : > { %p7315_p1 = scmp.eq.s32.totalorder %s6334_s28, 0  ;;  %p441_p3 = scmp.eq.s32.totalorder %s5014_s29, 1 }
  0x1a   : > { %p5015_p5 = scmp.ge.s32.totalorder %s6200_s27, 1  ;;  %p448_p7 = scmp.lt.s32.totalorder %s6200_s27, 3 }
  0x1b   : > { %p6343_p4 = por %p7315_p1, %p60_p0  ;;  %p6348_p6 = por %p441_p3, %p60_p0 }
  0x1c   : > { %p6353_p8 = pnand %p5015_p5, %p448_p7  ;;  %s6202_s19 = smov [#allocation10]  }
  0x1d   : > { %s7362_s0 = scalar_select %p6343_p4, 1, 0 }
  0x1e   : > { %s7363_s30 = scalar_select %p6348_p6, 1, 0 }
  0x1f   : > { %s7365_s18 = scalar_select %p6353_p8, 1, 0 }
  0x20   : > { %7364 = sst [smem:[#allocation22_spill]] %s7363_s30  ;;  %s469_s1 = sshll.u32 %s6202_s19, 4  ;;  %s6357_s1 = int_to_ptr.vmem [resolvable:$true] %s469_s1 }
  0x21   : > { %p5739_p9 = pneg %p6353_p8  ;;  %s6203_s21 = smov [#allocation11]  }
  0x22   : > { %s482_s22 = sshll.u32 %s6203_s21, 4  ;;  %s7367_s7 = sld [smem:[#allocation30_spill]]  ;;  %s6368_s22 = int_to_ptr.vmem [resolvable:$true] %s482_s22 }
  0x23   : > { %p6364_p11 = pnand %p5739_p9, %p7315_p1 }
  0x25   : > { %s7366_s20 = scalar_select %p6364_p11, 1, 0 }
  0x26   : > { %p6378_p13 = pneg %p6364_p11 }
  0x28   : > { %s5914_s30 = scalar_lea.hbm %s7367_s7, 1024 }
  0x29   : > { %p5915_p12 = scmp.ne.s32.totalorder %s7367_s7, %s5914_s30  ;;  %p5921_p5 = scmp.lt.u32.totalorder %s5914_s30, %s7367_s7 }
  0x2a   : > { %s7368_s17 = scalar_select %p6378_p13, 1, 0 }
  0x2b   : > { %p5917_p0 = pnand %p6378_p13, %p5915_p12 }
  0x2d   : > { %p5918_p3 = pneg %p5917_p0 }
  0x2f   : > { %p5923_p7 = pnand %p5921_p5, %p5918_p3 }
  0x31   : > { %5926 = shalt.err (!%p5923_p7)
}
  0x32   : > { %s5927_s24 = scalar_lea.vmem %s6357_s1, 1024  ;;  %p5935_p2 = scmp.lt.s32.totalorder %s6357_s1, %s6357_s1 }
  0x33   : > { %p5928_p9 = scmp.ne.s32.totalorder %s6357_s1, %s5927_s24  ;;  %p5936_p6 = scmp.lt.s32.totalorder %s5927_s24, %s5927_s24 }
  0x35   : > { %p5930_p10 = pnand %p5928_p9, %p6378_p13  ;;  %p5937_p12 = por %p5936_p6, %p5935_p2 }
  0x37   : > { %p5931_p1 = pneg %p5930_p10 }
  0x39   : > { %p5938_p0 = pnand %p5937_p12, %p5931_p1 }
  0x3b   : > { %5941 = shalt.err (!%p5938_p0)
}
  0x3c   : > { %s7319_s23 = smov 128   ;;  %s7321_s16 = smov 8  }
  0x3d   : > { %5742 = dma.hbm_to_vmem [thread:$0]  (!%p6364_p11), %s7367_s7, 1024, %s6357_s1, [#allocation9], %s7319_s23, %s7319_s23, %s7321_s16  }
  0x3e   : > { %s7369_s8 = sld [smem:[#allocation31_spill]] }
  0x44   : > { %s5942_s24 = scalar_lea.hbm %s7369_s8, 1024 }
  0x45   : > { %p5943_p1 = scmp.ne.s32.totalorder %s7369_s8, %s5942_s24  ;;  %p5949_p10 = scmp.lt.u32.totalorder %s5942_s24, %s7369_s8 }
  0x47   : > { %p5945_p2 = pnand %p5943_p1, %p6378_p13 }
  0x49   : > { %p5946_p6 = pneg %p5945_p2 }
  0x4b   : > { %p5951_p3 = pnand %p5949_p10, %p5946_p6 }
  0x4d   : > { %5954 = shalt.err (!%p5951_p3)
}
  0x4e   : > { %s5955_s1 = scalar_lea.vmem %s6368_s22, 1024  ;;  %p5963_p12 = scmp.lt.s32.totalorder %s6368_s22, %s6368_s22 }
  0x4f   : > { %p5956_p5 = scmp.ne.s32.totalorder %s6368_s22, %s5955_s1  ;;  %p5964_p0 = scmp.lt.s32.totalorder %s5955_s1, %s5955_s1 }
  0x51   : > { %p5958_p7 = pnand %p5956_p5, %p6378_p13  ;;  %p5965_p1 = por %p5964_p0, %p5963_p12 }
  0x53   : > { %p5959_p9 = pneg %p5958_p7 }
  0x55   : > { %p5966_p2 = pnand %p5965_p1, %p5959_p9 }
  0x57   : > { %5969 = shalt.err (!%p5966_p2)
}
  0x58   : > { %5745 = dma.hbm_to_vmem [thread:$0]  (!%p6364_p11), %s7369_s8, 1024, %s6368_s22, [#allocation12], %s7319_s23, %s7319_s23, %s7321_s16  }
  0x59   : > { %s6429_s12 = sadd.s32 1, %s6200_s27   ;;  %s47_s15 = sadd.s32 1, %s6196_s26 }
  0x5a   : > { %7370 = sst [smem:[#allocation23_spill]] %s6429_s12  ;;  %s44_s30 = ssub.s32 %s6200_s27, %s6429_s12 }
  0x5b   : > { %p54_p6 = scmp.ne.s32.totalorder %s6196_s26, %s6192_s25  ;;  %p45_p10 = scmp.eq.s32.totalorder %s44_s30, 0 }
  0x5c   : > { %p55_p3 = scmp.eq.s32.totalorder %s6200_s27, 0  ;;  %p7371_p5 = scmp.eq.s32.totalorder %s6334_s28, 1 }
  0x5d   : > { %p5769_p9 = scmp.lt.s32.totalorder %s6200_s27, 2  ;;  %s7320_s21 = sand.u32 1, %s6196_s26  }
  0x5e   : > { %p6439_p7 = por %p7371_p5, %p54_p6  ;;  %p56_p12 = por %p55_p3, %p54_p6 }
  0x5f   : > { %s6445_s19 = scalar_select %p45_p10, %s6196_s26, %s47_s15  }
  0x60   : > { %s7372_s29 = scalar_select %p6439_p7, 1, 0 }
  0x61   : > { %7374 = sst [smem:[#allocation25_spill]] %s6445_s19  ;;  %s6450_s22 = sshll.u32 %s7320_s21, 3 }
  0x62   : > { %7373 = sst [smem:[#allocation24_spill]] %s7372_s29  ;;  %s6453_s24 = sshll.u32 %s6200_s27, 7 }
  0x63   : > { %p6455_p0 = pnand %p5769_p9, %p56_p12  ;;  %s7328_s10 = sand.u32 1, %s6200_s27  }
  0x64   : > { %s7376_s23 = sld [smem:[#allocation27_spill]]  ;;  %s552_s21 = scalar_lea.vmem [#allocation5], %s6450_s22 }
  0x65   : > { %s7375_s1 = scalar_select %p6455_p0, 1, 0 }
  0x66   : > { %s559_s16 = sshll.u32 %s552_s21, 4  ;;  %s6471_s7 = scalar_lea.sflag [#allocation6], %s7328_s10  ;;  %s6467_s16 = int_to_ptr.vmem [resolvable:$true] %s559_s16 }
  0x67   : > { %p6477_p2 = pneg %p6455_p0 }
  0x6a   : > { %s6464_s15 = scalar_lea.hbm %s7376_s23, %s6453_s24  ;;  %s5975_s21 = scalar_lea.hbm %s7376_s23, 256 }
  0x6b   : > { %s5970_s8 = scalar_lea.hbm %s6464_s15, 128  ;;  %p5976_p3 = scmp.lt.u32.totalorder %s6464_s15, %s7376_s23 }
  0x6c   : > { %p5971_p1 = scmp.ne.s32.totalorder %s6464_s15, %s5970_s8  ;;  %p5977_p5 = scmp.lt.u32.totalorder %s5975_s21, %s5970_s8 }
  0x6d   : > { %p5979_p12 = scmp.lt.u32.totalorder %s5970_s8, %s6464_s15 }
  0x6e   : > { %p5973_p6 = pnand %p6477_p2, %p5971_p1  ;;  %p5978_p9 = por %p5977_p5, %p5976_p3 }
  0x70   : > { %p5974_p10 = pneg %p5973_p6  ;;  %p5980_p7 = por %p5979_p12, %p5978_p9 }
  0x72   : > { %p5981_p4 = pnand %p5980_p7, %p5974_p10 }
  0x74   : > { %5984 = shalt.err (!%p5981_p4)
}
  0x75   : > { %s5985_s10 = scalar_lea.vmem %s6467_s16, 128  ;;  %s6206_s11 = smov [#allocation5]  }
  0x76   : > { %p5986_p1 = scmp.ne.s32.totalorder %s6467_s16, %s5985_s10  ;;  %s5990_s30 = sshll.u32 %s6206_s11, 4  ;;  %s5991_s30 = int_to_ptr.vmem [resolvable:$false] %s5990_s30 }
  0x77   : > { %s5992_s12 = scalar_lea.vmem %s5991_s30, 256  ;;  %p5993_p11 = scmp.lt.s32.totalorder %s6467_s16, %s5991_s30 }
  0x78   : > { %p5988_p6 = pnand %p5986_p1, %p6477_p2  ;;  %p5994_p13 = scmp.lt.s32.totalorder %s5992_s12, %s5985_s10 }
  0x7a   : > { %p5989_p8 = pneg %p5988_p6  ;;  %p5995_p3 = por %p5994_p13, %p5993_p11 }
  0x7c   : > { %p5996_p5 = pnand %p5995_p3, %p5989_p8 }
  0x7e   : > { %5999 = shalt.err (!%p5996_p5)
}
  0x7f   : > { %5755 = dma.hbm_to_vmem [thread:$0]  (!%p6455_p0), %s6464_s15, 128, %s6467_s16, %s6471_s7  }
  0x80   : > { %s6207_s8 = smov [#allocation13]   ;;  %s6000_s11 = scalar_lea.hbm %s7301_s9, 1024 }
  0x81   : > { %s495_s29 = sshll.u32 %s6207_s8, 4  ;;  %p6001_p4 = scmp.ne.s32.totalorder %s7301_s9, %s6000_s11  ;;  %s496_s29 = int_to_ptr.vmem [resolvable:$true] %s495_s29 }
  0x82   : > { %p7378_p8 = scmp.ne.s32.totalorder %s7368_s17, 0  ;;  %p6007_p7 = scmp.lt.u32.totalorder %s6000_s11, %s7301_s9 }
  0x84   : > { %p6003_p11 = pnand %p6001_p4, %p7378_p8 }
  0x86   : > { %p6004_p13 = pneg %p6003_p11 }
  0x88   : > { %p6009_p10 = pnand %p6007_p7, %p6004_p13 }
  0x8a   : > { %6012 = shalt.err (!%p6009_p10)
}
  0x8b   : > { %s6013_s16 = scalar_lea.vmem %s496_s29, 1024  ;;  %p6021_p6 = scmp.lt.s32.totalorder %s496_s29, %s496_s29 }
  0x8c   : > { %p6014_p9 = scmp.ne.s32.totalorder %s496_s29, %s6013_s16  ;;  %p6022_p3 = scmp.lt.s32.totalorder %s6013_s16, %s6013_s16 }
  0x8e   : > { %p6016_p12 = pnand %p6014_p9, %p7378_p8  ;;  %p6023_p5 = por %p6022_p3, %p6021_p6 }
  0x90   : > { %p6017_p1 = pneg %p6016_p12 }
  0x92   : > { %p6024_p0 = pnand %p6023_p5, %p6017_p1 }
  0x94   : > { %6027 = shalt.err (!%p6024_p0)
}
  0x95   : > { %p7379_p4 = scmp.ne.s32.totalorder %s7366_s20, 0  ;;  %s7380_s6 = smov 8  }
  0x96   : > { %s7381_s23 = smov 128   ;;  %s7382_s11 = sld [smem:[#allocation26_spill]] }
  0x97   : > { %5748 = dma.hbm_to_vmem [thread:$0]  (!%p7379_p4), %s7301_s9, 1024, %s496_s29, [#allocation12], %s7381_s23, %s7381_s23, %s7380_s6  }
  0x98   : > { %s534_s20 = scalar_lea.vmem [#allocation2], %s6450_s22  ;;  %s7383_s12 = sand.u32 1, %s6196_s26  }
  0x99   : > { %s541_s10 = sshll.u32 %s534_s20, 4  ;;  %s531_s16 = scalar_lea.sflag [#allocation3], %s7383_s12  ;;  %s542_s10 = int_to_ptr.vmem [resolvable:$true] %s541_s10 }
  0x9c   : > { %s6526_s30 = scalar_lea.hbm %s7382_s11, %s6453_s24  ;;  %s6033_s23 = scalar_lea.hbm %s7382_s11, 256 }
  0x9d   : > { %s6028_s15 = scalar_lea.hbm %s6526_s30, 128  ;;  %p6034_p13 = scmp.lt.u32.totalorder %s6526_s30, %s7382_s11 }
  0x9e   : > { %p6029_p0 = scmp.ne.s32.totalorder %s6526_s30, %s6028_s15  ;;  %p6035_p7 = scmp.lt.u32.totalorder %s6033_s23, %s6028_s15 }
  0x9f   : > { %p6037_p9 = scmp.lt.u32.totalorder %s6028_s15, %s6526_s30 }
  0xa0   : > { %p6031_p8 = pnand %p6029_p0, %p6477_p2  ;;  %p6036_p10 = por %p6035_p7, %p6034_p13 }
  0xa2   : > { %p6032_p11 = pneg %p6031_p8  ;;  %p6038_p12 = por %p6037_p9, %p6036_p10 }
  0xa4   : > { %p6039_p1 = pnand %p6038_p12, %p6032_p11 }
  0xa6   : > { %6042 = shalt.err (!%p6039_p1)
}
  0xa7   : > { %s6043_s21 = scalar_lea.vmem %s542_s10, 128  ;;  %s6208_s20 = smov [#allocation2]  }
  0xa8   : > { %p6044_p6 = scmp.ne.s32.totalorder %s542_s10, %s6043_s21  ;;  %s6048_s12 = sshll.u32 %s6208_s20, 4  ;;  %s6049_s12 = int_to_ptr.vmem [resolvable:$false] %s6048_s12 }
  0xa9   : > { %s6050_s29 = scalar_lea.vmem %s6049_s12, 256  ;;  %p6051_p4 = scmp.lt.s32.totalorder %s542_s10, %s6049_s12 }
  0xaa   : > { %p6046_p3 = pnand %p6044_p6, %p6477_p2  ;;  %p6052_p0 = scmp.lt.s32.totalorder %s6050_s29, %s6043_s21 }
  0xac   : > { %p6047_p5 = pneg %p6046_p3  ;;  %p6053_p8 = por %p6052_p0, %p6051_p4 }
  0xae   : > { %p6054_p7 = pnand %p6053_p8, %p6047_p5 }
  0xb0   : > { %6057 = shalt.err (!%p6054_p7)
}
  0xb1   : > { %p7384_p13 = scmp.ne.s32.totalorder %s7375_s1, 0  ;;  %s7385_s2 = sld [smem:[#allocation28_spill]] }
  0xb2   : > { %s570_s8 = scalar_lea.vmem [#allocation7], %s6450_s22 }
  0xb3   : > { %5752 = dma.hbm_to_vmem [thread:$0]  (!%p7384_p13), %s6526_s30, 128, %s542_s10, %s531_s16  }
  0xb4   : > { %s577_s17 = sshll.u32 %s570_s8, 4  ;;  %s578_s17 = int_to_ptr.vmem [resolvable:$true] %s577_s17 }
  0xb7   : > { %s6552_s23 = scalar_lea.hbm %s7385_s2, %s6453_s24  ;;  %s6063_s30 = scalar_lea.hbm %s7385_s2, 256 }
  0xb8   : > { %s6058_s21 = scalar_lea.hbm %s6552_s23, 128  ;;  %p6064_p12 = scmp.lt.u32.totalorder %s6552_s23, %s7385_s2 }
  0xb9   : > { %p6059_p11 = scmp.ne.s32.totalorder %s6552_s23, %s6058_s21  ;;  %p6065_p1 = scmp.lt.u32.totalorder %s6063_s30, %s6058_s21 }
  0xba   : > { %p6067_p3 = scmp.lt.u32.totalorder %s6058_s21, %s6552_s23 }
  0xbb   : > { %p6061_p10 = pnand %p6059_p11, %p6477_p2  ;;  %p6066_p6 = por %p6065_p1, %p6064_p12 }
  0xbd   : > { %p6062_p9 = pneg %p6061_p10  ;;  %p6068_p5 = por %p6067_p3, %p6066_p6 }
  0xbf   : > { %p6069_p4 = pnand %p6068_p5, %p6062_p9 }
  0xc1   : > { %6072 = shalt.err (!%p6069_p4)
}
  0xc2   : > { %s6073_s29 = scalar_lea.vmem %s578_s17, 128  ;;  %s6209_s15 = smov [#allocation7]  }
  0xc3   : > { %p6074_p0 = scmp.ne.s32.totalorder %s578_s17, %s6073_s29  ;;  %s6078_s6 = sshll.u32 %s6209_s15, 4  ;;  %s6079_s6 = int_to_ptr.vmem [resolvable:$false] %s6078_s6 }
  0xc4   : > { %s6080_s8 = scalar_lea.vmem %s6079_s6, 256  ;;  %p6081_p11 = scmp.lt.s32.totalorder %s578_s17, %s6079_s6 }
  0xc5   : > { %p6076_p8 = pnand %p6074_p0, %p6477_p2  ;;  %p6082_p10 = scmp.lt.s32.totalorder %s6080_s8, %s6073_s29 }
  0xc7   : > { %p6077_p7 = pneg %p6076_p8  ;;  %p6083_p13 = por %p6082_p10, %p6081_p11 }
  0xc9   : > { %p6084_p1 = pnand %p6083_p13, %p6077_p7 }
  0xcb   : > { %6087 = shalt.err (!%p6084_p1)
}
  0xcc   : > { %p7386_p12 = scmp.ne.s32.totalorder %s7375_s1, 0  ;;  %s6577_s12 = scalar_lea.hbm %s7295_s3, %s6453_s24 }
  0xcd   : > { %s588_s30 = scalar_lea.vmem [#allocation8], %s6450_s22  ;;  %s7387_s16 = sand.u32 1, %s6200_s27  }
  0xce   : > { %5758 = dma.hbm_to_vmem [thread:$0]  (!%p7386_p12), %s6552_s23, 128, %s578_s17, %s6471_s7  }
  0xcf   : > { %s595_s10 = sshll.u32 %s588_s30, 4  ;;  %s585_s29 = scalar_lea.sflag [#allocation9], %s7387_s16  ;;  %s596_s10 = int_to_ptr.vmem [resolvable:$true] %s595_s10 }
  0xd0   : > { %s6088_s15 = scalar_lea.hbm %s6577_s12, 128  ;;  %s6093_s17 = scalar_lea.hbm %s7295_s3, 256 }
  0xd1   : > { %p6089_p13 = scmp.ne.s32.totalorder %s6577_s12, %s6088_s15  ;;  %p6094_p3 = scmp.lt.u32.totalorder %s6577_s12, %s7295_s3 }
  0xd2   : > { %p6095_p5 = scmp.lt.u32.totalorder %s6093_s17, %s6088_s15  ;;  %p6097_p0 = scmp.lt.u32.totalorder %s6088_s15, %s6577_s12 }
  0xd3   : > { %p6091_p9 = pnand %p6089_p13, %p6477_p2 }
  0xd4   : > { %p6096_p4 = por %p6095_p5, %p6094_p3 }
  0xd5   : > { %p6092_p6 = pneg %p6091_p9 }
  0xd6   : > { %p6098_p8 = por %p6097_p0, %p6096_p4 }
  0xd8   : > { %p6099_p7 = pnand %p6098_p8, %p6092_p6 }
  0xda   : > { %6102 = shalt.err (!%p6099_p7)
}
  0xdb   : > { %s6103_s22 = scalar_lea.vmem %s596_s10, 128  ;;  %s6210_s8 = smov [#allocation8]  }
  0xdc   : > { %p6104_p11 = scmp.ne.s32.totalorder %s596_s10, %s6103_s22  ;;  %s6108_s21 = sshll.u32 %s6210_s8, 4  ;;  %s6109_s21 = int_to_ptr.vmem [resolvable:$false] %s6108_s21 }
  0xdd   : > { %s6110_s20 = scalar_lea.vmem %s6109_s21, 256  ;;  %p6111_p13 = scmp.lt.s32.totalorder %s596_s10, %s6109_s21 }
  0xde   : > { %p6106_p10 = pnand %p6104_p11, %p6477_p2  ;;  %p6112_p9 = scmp.lt.s32.totalorder %s6110_s20, %s6103_s22 }
  0xe0   : > { %p6107_p1 = pneg %p6106_p10  ;;  %p6113_p12 = por %p6112_p9, %p6111_p13 }
  0xe2   : > { %p6114_p3 = pnand %p6113_p12, %p6107_p1 }
  0xe4   : > { %6117 = shalt.err (!%p6114_p3)
}
  0xe5   : > { %p7388_p5 = scmp.ne.s32.totalorder %s7375_s1, 0  ;;  %p7389_p6 = scmp.ne.s32.totalorder %s7365_s18, 0 }
  0xe6   : > { %s6602_s19 = sand.u32 (!%p7389_p6), 1, %s6192_s25   ;;  %p7390_p2 = scmp.ne.s32.totalorder (!%p7389_p6), %s7362_s0, 0 }
  0xe7   : > { %5761 = dma.hbm_to_vmem [thread:$0]  (!%p7388_p5), %s6577_s12, 128, %s596_s10, %s585_s29  }
  0xe8   : > { %604 = sbr.rel (%p7389_p6) target bundleno = 9270 (0x2436), region = 88  ;;  %s6605_s30 = sshll.u32 (!%p7389_p6), %s6602_s19, 3 }
  0xe9   : > { %s607_s16 = scalar_lea.sflag (!%p7389_p6), [#allocation3], %s6602_s19  ;;  %s610_s15 = scalar_lea.vmem (!%p7389_p6), [#allocation2], %s6605_s30 }
  0xef   : > { %6163 = dma.done.wait (%p7390_p2), %s607_s16, 128  }
  0xf0   : > { %6165 = vsyncadd (%p7390_p2), %s607_s16, 4294967168  ;;  %s615_s18 = sand.u32 1, %s6334_s28   ;;  %s619_s12 = scalar_lea.vmem [#allocation5], %s6605_s30 }
  0xf1   : > { %s616_s1 = scalar_lea.sflag [#allocation6], %s615_s18 }
  0xf2   : > { %6167 = dma.done.wait (%p7390_p2), %s616_s1, 256  }
  0xf3   : > { %6169 = vsyncadd (%p7390_p2), %s616_s1, 4294967040  ;;  %s628_s10 = scalar_lea.vmem [#allocation7], %s6605_s30  ;;  %s634_s29 = scalar_lea.sflag [#allocation9], %s615_s18 }
  0xf4   : > { %s637_s7 = scalar_lea.vmem [#allocation8], %s6605_s30 }
  0xf5   : > { %6171 = dma.done.wait (%p7390_p2), %s634_s29, 128  }
  0xf6   : > { %6173 = vsyncadd (%p7390_p2), %s634_s29, 4294967168  ;;  %p7391_p12 = scmp.eq.s32.totalorder %s6334_s28, 0 }
  0xf8   : > { %6175 = dma.done.wait (%p7391_p12), [#allocation9], 1024   ;;  %p7392_p4 = pmov %p7391_p12 }
  0xfa   : > { %6177 = vsyncadd (%p7392_p4), [#allocation9], 4294966272  ;;  %p7393_p0 = pmov %p7392_p4 }
  0xfc   : > { %6179 = dma.done.wait (%p7393_p0), [#allocation12], 2048   ;;  %p7394_p8 = pmov %p7393_p0 }
  0xfd   : > { %vm725_vm0 = vcmask 261120   ;;  %v6633_v0 = vld [vmem:[%s610_s15] sm:$0xff]  ;;  %v763_v9 = vld [vmem:[%s7296_s4 + $0x10] sm:$0xff]  ;;  %v6211_v10 = vmov 0.0|0.0   ;;  %v764_v12 = vld [vmem:[%s7296_s4 + $0x18] sm:$0xff]  ;;  %vm6212_vm1 = vmmov 0  }
  0xfe   : > { %6181 = vsyncadd (%p7394_p8), [#allocation12], 4294965248  ;;  %v726_v1 = vsel %vm725_vm0, %v6633_v0, 0.0  ;;  %v761_v7 = vld [vmem:[%s7296_s4] sm:$0xff]  ;;  %v762_v8 = vld [vmem:[%s7296_s4 + $0x8] sm:$0xff]  ;;  %5621 = vmatprep.subr.bf16.mxu1 %v6211_v10  ;;  %v6213_v13 = vmov 0.0   ;;  %v5625_v14 = vpack.c.bf16 %v764_v12, %v763_v9 }
  0xff   : > { %727 = vadd.xlane.f32.xlu0 %v726_v1  ;;  %v5622_v11 = vpack.c.bf16 %v762_v8, %v761_v7  ;;  %5299 = vmatprep.mubr.msk.f32.mxu1 %vm6212_vm1, %v6213_v13  ;;  %v5037_v23 = vld [vmem:[%s7305_s13] ss:$0 sm:$0xff]  ;;  %s6214_s1 = smov 104   ;;  %s6215_s29 = smov 120   ;;  %vm851_vm4 = vcmask 64512   ;;  %vm1523_vm5 = vcmask 130048  }
 0x100   : > { %5312 = vmatprep.subr.mxu0 %v6213_v13  ;;  %5314 = vmatprep.mubr.msk.f32.mxu0 %vm6212_vm1, %v6213_v13  ;;  %v5038_v26 = vld [vmem:[%s7306_s14] ss:$0 sm:$0xff]  ;;  %s7347_s0 = smov 112   ;;  %s7345_s23 = smov 96   ;;  %vm1525_vm6 = vcmask 195584   ;;  %vm2675_vm11 = vcmask 523264  }
 0x101   : > { %5623 = vmatpush3.bf16.msra.mxu1 %v5622_v11  ;;  %v6709_v39 = vld [vmem:[%s628_s10] sm:$0xff]  ;;  %s7337_s10 = smov 64   ;;  %s7343_s15 = smov 8  }
 0x102   : > { %5624 = vmatprep.subr.bf16.mxu1 %v6211_v10  ;;  %s7341_s18 = smov 16   ;;  %s7339_s17 = smov 24  }
 0x103   : > { %s7395_s22 = sld [smem:[#allocation29_spill]]  ;;  %s7397_s21 = sld [smem:[#allocation33_spill]] }
 0x104   : > { %s7398_s16 = sld [smem:[#allocation32_spill]]  ;;  %s7400_s20 = smov 64  }
 0x105   : > { %5626 = vmatpush3.bf16.msra.mxu1 %v5625_v14  ;;  %s7403_s24 = smov 112   ;;  %s7407_s6 = sld [smem:[#allocation36_spill]] }
 0x106   : > { %5302 = vmatprep.subr.mxu1 %v6213_v13  ;;  %s5146_s8 = sshll.u32 %s6334_s28, 7  ;;  %s6222_s28 = smov [#allocation14]  }
 0x18c   : > { %v728_v2 = vpop.xlane.xlu0 %727 }
 0x18d   : > { %v730_v3 = vmul.f32 0.03125, %v728_v2 }
 0x18f   : > { %v731_v4 = vsub.f32 %v6633_v0, %v730_v3 }
 0x191   : > { %v732_v5 = vmul.f32 %v731_v4, %v731_v4  ;;  %v750_v24 = vmul.f32 %v5037_v23, %v731_v4 }
 0x193   : > { %v733_v6 = vsel %vm725_vm0, %v732_v5, 0.0 }
 0x194   : > { %734 = vadd.xlane.f32.xlu0 %v733_v6 }
 0x221   : > { %v735_v15 = vpop.xlane.xlu0 %734 }
 0x222   : > { %v736_v16 = vmul.f32 0.032258064, %v735_v15 }
 0x224   : > { %5822 = vrsqrt.f32 %v736_v16  ;;  %vm739_vm2 = vcmp.eq.f32.partialorder %v736_v16, inf  ;;  %v742_v19 = vand.u32 2147483648, %v736_v16  ;;  %vm741_vm3 = vcmp.eq.f32.partialorder %v736_v16, 0.0 }
 0x22e   : > { %v5823_v17 = vpop.eup %5822 }
 0x22f   : > { %v738_v18 = vmul.f32 %v5823_v17, %v736_v16 }
 0x231   : > { %v740_v20 = vsel %vm739_vm2, %v736_v16, %v738_v18 }
 0x232   : > { %v743_v21 = vsel %vm741_vm3, %v742_v19, %v740_v20 }
 0x233   : > { %v751_v22 = vadd.f32 1e-06, %v743_v21 }
 0x235   : > { %5824 = vrcp.f32 %v751_v22 }
 0x23f   : > { %v5825_v25 = vpop.eup %5824 }
 0x240   : > { %v753_v27 = vmul.f32 %v5825_v25, %v750_v24 }
 0x242   : > { %v760_v28 = vadd.f32 %v5038_v26, %v753_v27 }
 0x244   : > { %5300 = vmatmul.mubr.msk.f32.vlgmr.msra.gmra.mrb[0].mxu1 %vm725_vm0, %v760_v28 }
 0x245   : > { %5304 = vmatprep.mubr.msk.f32.mxu1 %vm6212_vm1, %v6213_v13 }
 0x317   : > { %v834_v29 = vpop.f32.mrb[0].mxu1 }
 0x318   : > { %847 = vrot.lane.b32.xlu0 %v834_v29, %s6214_s1  ;;  %843 = vrot.lane.b32.xlu1 %v834_v29, %s6215_s29  ;;  %v5301_v30 = vpop.f32.mrb[1].mxu1 }
 0x31c   : > { %845 = vrot.lane.b32.xlu1 %v834_v29, %s7347_s0 }
 0x320   : > { %849 = vrot.lane.b32.xlu1 %v834_v29, %s7345_s23 }
 0x38a   : > { %v6672_v31 = vpop.permute.xlu1 %843  ;;  %v6680_v33 = vpop.permute.xlu0 %847 }
 0x38b   : > { %926 = vrot.lane.b32.xlu1 %v6672_v31, %s7345_s23 }
 0x38e   : > { %v6676_v32 = vpop.permute.xlu1 %845 }
 0x38f   : > { %1002 = vrot.lane.b32.xlu1 %v6676_v32, %s7345_s23 }
 0x392   : > { %v850_v34 = vpop.permute.xlu1 %849 }
 0x393   : > { %1078 = vrot.lane.b32.xlu1 %v6680_v33, %s7345_s23  ;;  %5303 = vmatpush3.xpose.msk.msra.mxu1 %vm851_vm4, %v850_v34 }
 0x394   : > { %5307 = vmatprep.subr.mxu1 %v6213_v13 }
 0x396   : > { %5305 = vmatmul.mubr.msk.f32.vlgmr.msra.gmra.mrb[2].mxu1 %vm851_vm4, %v834_v29 }
 0x397   : > { %5309 = vmatprep.mubr.msk.f32.mxu1 %vm6212_vm1, %v6213_v13 }
 0x3fd   : > { %v927_v35 = vpop.permute.xlu1 %926 }
 0x3fe   : > { %5308 = vmatpush3.xpose.msk.msra.mxu1 %vm851_vm4, %v927_v35 }
 0x3ff   : > { %5317 = vmatprep.subr.mxu1 %v6213_v13 }
 0x401   : > { %5310 = vmatmul.mubr.msk.f32.vlgmr.msra.gmra.mrb[4].mxu1 %vm851_vm4, %v6672_v31  ;;  %v1003_v36 = vpop.permute.xlu1 %1002 }
 0x402   : > { %5313 = vmatpush3.xpose.msk.msra.mxu0 %vm851_vm4, %v1003_v36  ;;  %5319 = vmatprep.mubr.msk.f32.mxu1 %vm6212_vm1, %v6213_v13  ;;  %v838_v36 = vld [vmem:[%s7297_s5] sm:$0xff] }
 0x403   : > { %5322 = vmatprep.subr.mxu0 %v6213_v13 }
 0x405   : > { %5315 = vmatmul.mubr.msk.f32.vlgmr.msra.gmra.mrb[0].mxu0 %vm851_vm4, %v6676_v32  ;;  %v1079_v37 = vpop.permute.xlu1 %1078 }
 0x406   : > { %5318 = vmatpush3.xpose.msk.msra.mxu1 %vm851_vm4, %v1079_v37  ;;  %5324 = vmatprep.mubr.msk.f32.mxu0 %vm6212_vm1, %v6213_v13  ;;  %v839_v37 = vld [vmem:[%s7297_s5 + $0x8] sm:$0xff] }
 0x407   : > { %5327 = vmatprep.subr.mxu1 %v6213_v13 }
 0x409   : > { %5320 = vmatmul.mubr.msk.f32.vlgmr.msra.gmra.mrb[6].mxu1 %vm851_vm4, %v6680_v33 }
 0x40a   : > { %5329 = vmatprep.mubr.msk.f32.mxu1 %vm6212_vm1, %v6213_v13 }
 0x469   : > { %v922_v38 = vpop.f32.mrb[2].mxu1 }
 0x46a   : > { %v1154_v40 = vmul.f32 0.35355338, %v922_v38  ;;  %v5306_v41 = vpop.f32.mrb[3].mxu1  ;;  %v5628_v38 = vpack.c.bf16 %v839_v37, %v838_v36 }
 0x46b   : > { %v841_v41 = vld [vmem:[%s7297_s5 + $0x18] sm:$0xff] }
 0x46c   : > { %v1158_v42 = vadd.f32 %v1154_v40, %v6709_v39  ;;  %v840_v40 = vld [vmem:[%s7297_s5 + $0x10] sm:$0xff] }
 0x46e   : > { %v1162_v43 = vsel %vm851_vm4, %v1158_v42, -inf }
 0x46f   : > { %1163 = vmax.xlane.f32.xlu1 %v1162_v43 }
 0x4d4   : > { %v998_v44 = vpop.f32.mrb[4].mxu1 }
 0x4d5   : > { %v1155_v45 = vmul.f32 0.35355338, %v998_v44  ;;  %v5311_v46 = vpop.f32.mrb[5].mxu1 }
 0x4d7   : > { %v1159_v47 = vadd.f32 %v1155_v45, %v6709_v39 }
 0x4d8   : > { %v1074_v48 = vpop.f32.mrb[0].mxu0 }
 0x4d9   : > { %v1156_v49 = vmul.f32 0.35355338, %v1074_v48  ;;  %v5316_v50 = vpop.f32.mrb[1].mxu0  ;;  %v1165_v51 = vsel %vm851_vm4, %v1159_v47, -inf }
 0x4da   : > { %1166 = vmax.xlane.f32.xlu0 %v1165_v51 }
 0x4db   : > { %v1160_v52 = vadd.f32 %v1156_v49, %v6709_v39 }
 0x4dc   : > { %v1150_v53 = vpop.f32.mrb[6].mxu1 }
 0x4dd   : > { %v1157_v54 = vmul.f32 0.35355338, %v1150_v53  ;;  %v5321_v55 = vpop.f32.mrb[7].mxu1  ;;  %v1168_v56 = vsel %vm851_vm4, %v1160_v52, -inf }
 0x4de   : > { %1169 = vmax.xlane.f32.xlu1 %v1168_v56 }
 0x4df   : > { %v1161_v57 = vadd.f32 %v1157_v54, %v6709_v39 }
 0x4e1   : > { %v1171_v58 = vsel %vm851_vm4, %v1161_v57, -inf }
 0x4e2   : > { %1172 = vmax.xlane.f32.xlu0 %v1171_v58 }
 0x4ef   : > { %1206 = vrot.lane.b32.xlu1 %v834_v29, %s7337_s10 }
 0x4fc   : > { %v1164_v59 = vpop.xlane.xlu1 %1163 }
 0x4fd   : > { %v1174_v60 = vsub.f32 %v1158_v42, %v1164_v59  ;;  %v5631_v42 = vpack.c.bf16 %v841_v41, %v840_v40  ;;  %v6843_v41 = vld [vmem:[%s637_s7] sm:$0xff]  ;;  %s7396_s7 = smov 24  }
 0x4ff   : > { %v1178_v61 = vmul.f32 1.442695, %v1174_v60 }
 0x501   : > { %5826 = vpow2.f32 %v1178_v61 }
 0x50b   : > { %v5827_v62 = vpop.eup %5826 }
 0x50c   : > { %v1186_v63 = vsel %vm851_vm4, %v5827_v62, 0.0 }
 0x513   : > { %1187 = vadd.xlane.f32.xlu1 %v1186_v63 }
 0x567   : > { %v1167_v1 = vpop.xlane.xlu0 %1166 }
 0x568   : > { %v1175_v2 = vsub.f32 %v1159_v47, %v1167_v1  ;;  %v1712_v1 = vld [vmem:[#allocation10] sm:$0xff] }
 0x56a   : > { %v1180_v3 = vmul.f32 1.442695, %v1175_v2  ;;  %v1713_v2 = vld [vmem:[#allocation10 + $0x8] sm:$0xff] }
 0x56b   : > { %v1170_v4 = vpop.xlane.xlu1 %1169 }
 0x56c   : > { %5828 = vpow2.f32 %v1180_v3  ;;  %v1176_v5 = vsub.f32 %v1160_v52, %v1170_v4  ;;  %v5640_v3 = vpack.c.bf16 %v1713_v2, %v1712_v1  ;;  %v1715_v4 = vld [vmem:[#allocation10 + $0x18] sm:$0xff] }
 0x56e   : > { %v1182_v6 = vmul.f32 1.442695, %v1176_v5 }
 0x56f   : > { %v1207_v7 = vpop.permute.xlu1 %1206  ;;  %v1173_v8 = vpop.xlane.xlu0 %1172 }
 0x570   : > { %5830 = vpow2.f32 %v1182_v6  ;;  %v1177_v9 = vsub.f32 %v1161_v57, %v1173_v8  ;;  %5323 = vmatpush3.msra.mxu0 %v1207_v7  ;;  %v1635_v6 = vld [vmem:[%s7395_s22] sm:$0xff]  ;;  %v1636_v7 = vld [vmem:[%s7395_s22 + $0x8] sm:$0xff]  ;;  %v1637_v8 = vld [vmem:[%s7395_s22 + $0x10] sm:$0xff] }
 0x571   : > { %5332 = vmatprep.subr.mxu0 %v6213_v13 }
 0x572   : > { %v1184_v11 = vmul.f32 1.442695, %v1177_v9  ;;  %v5634_v9 = vpack.c.bf16 %v1636_v7, %v1635_v6 }
 0x574   : > { %5832 = vpow2.f32 %v1184_v11  ;;  %v1638_v11 = vld [vmem:[%s7395_s22 + $0x18] sm:$0xff] }
 0x576   : > { %v5829_v12 = vpop.eup %5828 }
 0x577   : > { %v1189_v14 = vsel %vm851_vm4, %v5829_v12, 0.0 }
 0x578   : > { %1190 = vadd.xlane.f32.xlu0 %v1189_v14  ;;  %v5637_v14 = vpack.c.bf16 %v1638_v11, %v1637_v8 }
 0x57a   : > { %v5831_v15 = vpop.eup %5830 }
 0x57b   : > { %v1192_v16 = vsel %vm851_vm4, %v5831_v15, 0.0 }
 0x57c   : > { %1193 = vadd.xlane.f32.xlu1 %v1192_v16 }
 0x57e   : > { %v5833_v17 = vpop.eup %5832 }
 0x57f   : > { %v1195_v18 = vsel %vm851_vm4, %v5833_v17, 0.0 }
 0x580   : > { %1196 = vadd.xlane.f32.xlu0 %v1195_v18 }
 0x58d   : > { %1358 = vrot.lane.b32.xlu1 %v6676_v32, %s7337_s10 }
 0x591   : > { %1434 = vrot.lane.b32.xlu1 %v6680_v33, %s7337_s10 }
 0x596   : > { %1282 = vrot.lane.b32.xlu0 %v6672_v31, %s7337_s10 }
 0x5a0   : > { %v1188_v19 = vpop.xlane.xlu1 %1187 }
 0x5a1   : > { %5834 = vrcp.f32 %v1188_v19 }
 0x5ab   : > { %v5835_v20 = vpop.eup %5834 }
 0x5ac   : > { %v1202_v21 = vmul.f32 %v5835_v20, %v5827_v62 }
 0x5ae   : > { %5325 = vmatmul.mubr.msk.f32.vlgmr.msra.gmra.mrb[2].mxu0 %vm851_vm4, %v1202_v21 }
 0x5af   : > { %5334 = vmatprep.mubr.msk.f32.mxu0 %vm6212_vm1, %v6213_v13 }
 0x605   : > { %v1191_v22 = vpop.xlane.xlu0 %1190 }
 0x606   : > { %5836 = vrcp.f32 %v1191_v22 }
 0x609   : > { %v1194_v23 = vpop.xlane.xlu1 %1193 }
 0x60a   : > { %5838 = vrcp.f32 %v1194_v23  ;;  %v5053_v23 = vld [vmem:[%s7305_s13 + $0x1] ss:$0 sm:$0xff] }
 0x60d   : > { %v1359_v24 = vpop.permute.xlu1 %1358  ;;  %v1197_v25 = vpop.xlane.xlu0 %1196 }
 0x60e   : > { %5840 = vrcp.f32 %v1197_v25  ;;  %5333 = vmatpush3.msra.mxu0 %v1359_v24 }
 0x60f   : > { %5627 = vmatprep.subr.bf16.mxu0 %v6211_v10 }
 0x610   : > { %v5837_v26 = vpop.eup %5836 }
 0x611   : > { %v1203_v27 = vmul.f32 %v5837_v26, %v5829_v12  ;;  %v1283_v28 = vpop.permute.xlu0 %1282  ;;  %v1435_v29 = vpop.permute.xlu1 %1434  ;;  %v6791_v12 = vld [vmem:[%s619_s12] sm:$0xff]  ;;  %v5054_v26 = vld [vmem:[%s7306_s14 + $0x1] ss:$0 sm:$0xff]  ;;  %s7402_s12 = smov 16  }
 0x612   : > { %5328 = vmatpush3.msra.mxu1 %v1283_v28 }
 0x613   : > { %5330 = vmatmul.mubr.msk.f32.vlgmr.msra.gmra.mrb[8].mxu1 %vm851_vm4, %v1203_v27  ;;  %5337 = vmatprep.subr.mxu1 %v6213_v13 }
 0x614   : > { %v5839_v30 = vpop.eup %5838  ;;  %5338 = vmatpush3.msra.mxu1 %v1435_v29  ;;  %5339 = vmatprep.mubr.msk.f32.mxu1 %vm6212_vm1, %v6213_v13 }
 0x615   : > { %v1204_v31 = vmul.f32 %v5839_v30, %v5831_v15  ;;  %5633 = vmatprep.subr.bf16.mxu1 %v6211_v10 }
 0x617   : > { %5335 = vmatmul.mubr.msk.f32.vlgmr.msra.gmra.mrb[4].mxu0 %vm851_vm4, %v1204_v31 }
 0x618   : > { %v5841_v32 = vpop.eup %5840  ;;  %5350 = vmatprep.mubr.msk.f32.mxu0 %vm6212_vm1, %v6213_v13  ;;  %5629 = vmatpush3.bf16.msra.mxu0 %v5628_v38 }
 0x619   : > { %v1205_v33 = vmul.f32 %v5841_v32, %v5833_v17  ;;  %5630 = vmatprep.subr.bf16.mxu0 %v6211_v10 }
 0x61b   : > { %5340 = vmatmul.mubr.msk.f32.vlgmr.msra.gmra.mrb[10].mxu1 %vm851_vm4, %v1205_v33 }
 0x61c   : > { %5361 = vmatprep.mubr.msk.f32.mxu1 %vm6212_vm1, %v6213_v13  ;;  %5632 = vmatpush3.bf16.msra.mxu0 %v5631_v42 }
 0x61d   : > { %5639 = vmatprep.subr.bf16.mxu0 %v6211_v10  ;;  %5635 = vmatpush3.bf16.msra.mxu1 %v5634_v9 }
 0x61e   : > { %5636 = vmatprep.subr.bf16.mxu1 %v6211_v10 }
 0x621   : > { %5638 = vmatpush3.bf16.msra.mxu1 %v5637_v14 }
 0x622   : > { %5375 = vmatprep.subr.mxu1 %v6213_v13 }
 0x681   : > { %v1278_v34 = vpop.f32.mrb[2].mxu0 }
 0x682   : > { %v5326_v35 = vpop.f32.mrb[3].mxu0 }
 0x6e6   : > { %v1354_v43 = vpop.f32.mrb[8].mxu1 }
 0x6e7   : > { %1511 = vrot.lane.b32.xlu0 %v1354_v43, %s7343_s15  ;;  %v5331_v44 = vpop.f32.mrb[9].mxu1 }
 0x6ea   : > { %v1430_v45 = vpop.f32.mrb[4].mxu0 }
 0x6eb   : > { %1515 = vrot.lane.b32.xlu1 %v1430_v45, %s7341_s18  ;;  %v5336_v46 = vpop.f32.mrb[5].mxu0 }
 0x6ee   : > { %v1506_v47 = vpop.f32.mrb[10].mxu1 }
 0x6ef   : > { %1519 = vrot.lane.b32.xlu0 %v1506_v47, %s7339_s17  ;;  %v5341_v48 = vpop.f32.mrb[11].mxu1  ;;  %s7399_s17 = sld [smem:[#allocation34_spill]] }
 0x759   : > { %v1512_v49 = vpop.permute.xlu0 %1511 }
 0x75a   : > { %v1522_v51 = vsel %vm851_vm4, %v1278_v34, %v1512_v49 }
 0x75d   : > { %v1516_v50 = vpop.permute.xlu1 %1515 }
 0x75e   : > { %v1524_v52 = vsel %vm1523_vm5, %v1522_v51, %v1516_v50 }
 0x761   : > { %v1520_v53 = vpop.permute.xlu0 %1519 }
 0x762   : > { %v1526_v54 = vsel %vm1525_vm6, %v1524_v52, %v1520_v53 }
 0x763   : > { %5351 = vmatmul.mubr.msk.f32.vlgmr.msra.gmra.mrb[6].mxu0 %vm725_vm0, %v1526_v54 }
 0x764   : > { %5372 = vmatprep.mubr.msk.f32.mxu0 %vm6212_vm1, %v6213_v13  ;;  %5641 = vmatpush3.bf16.msra.mxu0 %v5640_v3 }
 0x765   : > { %5642 = vmatprep.subr.bf16.mxu0 %v6211_v10 }
 0x836   : > { %v1596_v55 = vpop.f32.mrb[6].mxu0 }
 0x837   : > { %v6770_v56 = vadd.f32 %v1596_v55, %v6633_v0  ;;  %v5352_v57 = vpop.f32.mrb[7].mxu0  ;;  %v1714_v0 = vld [vmem:[#allocation10 + $0x10] sm:$0xff] }
 0x838   : > { %v5643_v5 = vpack.c.bf16 %v1715_v4, %v1714_v0 }
 0x839   : > { %v1601_v58 = vsel %vm725_vm0, %v6770_v56, 0.0 }
 0x83a   : > { %1602 = vadd.xlane.f32.xlu1 %v1601_v58  ;;  %5644 = vmatpush3.bf16.msra.mxu0 %v5643_v5 }
 0x83b   : > { %5385 = vmatprep.subr.mxu0 %v6213_v13 }
 0x83d   : > { %5373 = vmatmul.mubr.msk.f32.vlgmr.msra.gmra.mrb[8].mxu0 %vm725_vm0, %v6791_v12 }
 0x83e   : > { %5387 = vmatprep.mubr.msk.f32.mxu0 %vm6212_vm1, %v6213_v13 }
 0x8c7   : > { %v1603_v59 = vpop.xlane.xlu1 %1602 }
 0x8c8   : > { %v1604_v60 = vmul.f32 0.03125, %v1603_v59 }
 0x8ca   : > { %v1605_v61 = vsub.f32 %v6770_v56, %v1604_v60 }
 0x8cc   : > { %v1606_v62 = vmul.f32 %v1605_v61, %v1605_v61  ;;  %v1624_v24 = vmul.f32 %v5053_v23, %v1605_v61 }
 0x8ce   : > { %v1607_v63 = vsel %vm725_vm0, %v1606_v62, 0.0 }
 0x8cf   : > { %1608 = vadd.xlane.f32.xlu0 %v1607_v63 }
 0x910   : > { %v1785_v29 = vpop.f32.mrb[8].mxu0 }
 0x911   : > { %1801 = vrot.lane.b32.xlu0 %v1785_v29, %s6215_s29  ;;  %v5374_v30 = vpop.f32.mrb[9].mxu0  ;;  %1803 = vrot.lane.b32.xlu1 %v1785_v29, %s7347_s0 }
 0x915   : > { %1805 = vrot.lane.b32.xlu0 %v1785_v29, %s6214_s1 }
 0x95c   : > { %v1609_v15 = vpop.xlane.xlu0 %1608 }
 0x95d   : > { %v1610_v16 = vmul.f32 0.032258064, %v1609_v15 }
 0x95f   : > { %5842 = vrsqrt.f32 %v1610_v16  ;;  %vm1613_vm7 = vcmp.eq.f32.partialorder %v1610_v16, inf  ;;  %v1616_v19 = vand.u32 2147483648, %v1610_v16  ;;  %vm1615_vm8 = vcmp.eq.f32.partialorder %v1610_v16, 0.0 }
 0x969   : > { %v5843_v17 = vpop.eup %5842 }
 0x96a   : > { %v1612_v18 = vmul.f32 %v5843_v17, %v1610_v16 }
 0x96c   : > { %v1614_v20 = vsel %vm1613_vm7, %v1610_v16, %v1612_v18 }
 0x96d   : > { %v1617_v21 = vsel %vm1615_vm8, %v1616_v19, %v1614_v20 }
 0x96e   : > { %v1625_v22 = vadd.f32 1e-06, %v1617_v21 }
 0x970   : > { %5844 = vrcp.f32 %v1625_v22 }
 0x97a   : > { %v5845_v25 = vpop.eup %5844 }
 0x97b   : > { %v1627_v27 = vmul.f32 %v5845_v25, %v1624_v24 }
 0x97d   : > { %v1634_v28 = vadd.f32 %v5054_v26, %v1627_v27 }
 0x97f   : > { %5362 = vmatmul.mubr.msk.f32.vlgmr.msra.gmra.mrb[12].mxu1 %vm725_vm0, %v1634_v28 }
 0x980   : > { %5377 = vmatprep.mubr.msk.f32.mxu1 %vm6212_vm1, %v6213_v13  ;;  %5376 = vmatpush3.xpose.msk.msra.mxu1 %vm851_vm4, %v1785_v29 }
 0x981   : > { %5380 = vmatprep.subr.mxu1 %v6213_v13 }
 0x983   : > { %v6814_v31 = vpop.permute.xlu1 %1803  ;;  %v1802_v34 = vpop.permute.xlu0 %1801 }
 0x984   : > { %5386 = vmatpush3.xpose.msk.msra.mxu0 %vm851_vm4, %v6814_v31 }
 0x985   : > { %5395 = vmatprep.subr.mxu0 %v6213_v13 }
 0x987   : > { %v6827_v35 = vpop.permute.xlu0 %1805 }
 0xa52   : > { %v1708_v32 = vpop.f32.mrb[12].mxu1 }
 0xa53   : > { %1798 = vrot.lane.b32.xlu0 %v1708_v32, %s6214_s1  ;;  %1794 = vrot.lane.b32.xlu1 %v1708_v32, %s6215_s29  ;;  %v5363_v33 = vpop.f32.mrb[13].mxu1 }
 0xa54   : > { %5378 = vmatmul.mubr.msk.f32.vlgmr.msra.gmra.mrb[14].mxu1 %vm851_vm4, %v1708_v32 }
 0xa55   : > { %5381 = vmatpush3.xpose.msk.msra.mxu1 %vm851_vm4, %v1802_v34  ;;  %5382 = vmatprep.mubr.msk.f32.mxu1 %vm6212_vm1, %v6213_v13 }
 0xa56   : > { %5390 = vmatprep.subr.mxu1 %v6213_v13 }
 0xa57   : > { %1796 = vrot.lane.b32.xlu1 %v1708_v32, %s7347_s0 }
 0xac5   : > { %v1795_v36 = vpop.permute.xlu1 %1794  ;;  %v1799_v37 = vpop.permute.xlu0 %1798 }
 0xac6   : > { %5383 = vmatmul.mubr.msk.f32.vlgmr.msra.gmra.mrb[16].mxu1 %vm851_vm4, %v1795_v36 }
 0xac7   : > { %5391 = vmatpush3.xpose.msk.msra.mxu1 %vm851_vm4, %v6827_v35  ;;  %5392 = vmatprep.mubr.msk.f32.mxu1 %vm6212_vm1, %v6213_v13 }
 0xac8   : > { %5400 = vmatprep.subr.mxu1 %v6213_v13 }
 0xac9   : > { %v1797_v38 = vpop.permute.xlu1 %1796 }
 0xaca   : > { %5388 = vmatmul.mubr.msk.f32.vlgmr.msra.gmra.mrb[10].mxu0 %vm851_vm4, %v1797_v38  ;;  %5393 = vmatmul.mubr.msk.f32.vlgmr.msra.gmra.mrb[18].mxu1 %vm851_vm4, %v1799_v37  ;;  %v1789_v37 = vld [vmem:[#allocation11] sm:$0xff]  ;;  %v1790_v38 = vld [vmem:[#allocation11 + $0x8] sm:$0xff] }
 0xacb   : > { %5397 = vmatprep.mubr.msk.f32.mxu0 %vm6212_vm1, %v6213_v13  ;;  %5402 = vmatprep.mubr.msk.f32.mxu1 %vm6212_vm1, %v6213_v13 }
 0xb27   : > { %v1877_v40 = vpop.f32.mrb[14].mxu1 }
 0xb28   : > { %v2103_v42 = vmul.f32 0.35355338, %v1877_v40  ;;  %v5379_v43 = vpop.f32.mrb[15].mxu1  ;;  %v5646_v40 = vpack.c.bf16 %v1790_v38, %v1789_v37  ;;  %v2674_v37 = vld [vmem:[%s7397_s21 + $0x38] sm:$0xff] }
 0xb2a   : > { %v2107_v44 = vadd.f32 %v2103_v42, %v6843_v41 }
 0xb2c   : > { %v2111_v45 = vsel %vm851_vm4, %v2107_v44, -inf }
 0xb2d   : > { %2112 = vmax.xlane.f32.xlu1 %v2111_v45  ;;  %v1792_v45 = vld [vmem:[#allocation11 + $0x18] sm:$0xff] }
 0xb99   : > { %v1951_v46 = vpop.f32.mrb[16].mxu1 }
 0xb9a   : > { %v2104_v47 = vmul.f32 0.35355338, %v1951_v46  ;;  %v5384_v48 = vpop.f32.mrb[17].mxu1 }
 0xb9c   : > { %v2108_v49 = vadd.f32 %v2104_v47, %v6843_v41 }
 0xb9d   : > { %v2025_v50 = vpop.f32.mrb[10].mxu0  ;;  %v2099_v51 = vpop.f32.mrb[18].mxu1 }
 0xb9e   : > { %v2105_v52 = vmul.f32 0.35355338, %v2025_v50  ;;  %v2106_v53 = vmul.f32 0.35355338, %v2099_v51  ;;  %v5389_v54 = vpop.f32.mrb[11].mxu0  ;;  %v5394_v55 = vpop.f32.mrb[19].mxu1 }
 0xb9f   : > { %v2114_v57 = vsel %vm851_vm4, %v2108_v49, -inf }
 0xba0   : > { %2115 = vmax.xlane.f32.xlu0 %v2114_v57  ;;  %v2109_v58 = vadd.f32 %v2105_v52, %v6843_v41  ;;  %v2110_v59 = vadd.f32 %v2106_v53, %v6843_v41 }
 0xba2   : > { %v2117_v60 = vsel %vm851_vm4, %v2109_v58, -inf  ;;  %v2120_v61 = vsel %vm851_vm4, %v2110_v59, -inf }
 0xba3   : > { %2121 = vmax.xlane.f32.xlu1 %v2120_v61 }
 0xba4   : > { %2118 = vmax.xlane.f32.xlu0 %v2117_v60 }
 0xbb4   : > { %2231 = vrot.lane.b32.xlu1 %v1802_v34, %s7345_s23 }
 0xbba   : > { %2155 = vrot.lane.b32.xlu0 %v1785_v29, %s7345_s23  ;;  %v2113_v62 = vpop.xlane.xlu1 %2112 }
 0xbbb   : > { %v2123_v63 = vsub.f32 %v2107_v44, %v2113_v62  ;;  %v1791_v44 = vld [vmem:[#allocation11 + $0x10] sm:$0xff] }
 0xbbc   : > { %v5649_v46 = vpack.c.bf16 %v1792_v45, %v1791_v44 }
 0xbbd   : > { %v2127_v1 = vmul.f32 1.442695, %v2123_v63 }
 0xbbf   : > { %5846 = vpow2.f32 %v2127_v1 }
 0xbc9   : > { %v5847_v2 = vpop.eup %5846 }
 0xbca   : > { %v2135_v3 = vsel %vm851_vm4, %v5847_v2, 0.0 }
 0xbd9   : > { %2136 = vadd.xlane.f32.xlu0 %v2135_v3 }
 0xc2d   : > { %v2116_v0 = vpop.xlane.xlu0 %2115 }
 0xc2e   : > { %v2124_v4 = vsub.f32 %v2108_v49, %v2116_v0 }
 0xc30   : > { %v2129_v5 = vmul.f32 1.442695, %v2124_v4  ;;  %v2122_v6 = vpop.xlane.xlu1 %2121 }
 0xc31   : > { %v2119_v7 = vpop.xlane.xlu0 %2118  ;;  %v2126_v8 = vsub.f32 %v2110_v59, %v2122_v6  ;;  %v2583_v6 = vld [vmem:[#allocation13 + $0x8] sm:$0xff] }
 0xc32   : > { %5848 = vpow2.f32 %v2129_v5  ;;  %v2125_v9 = vsub.f32 %v2109_v58, %v2119_v7  ;;  %v2582_v5 = vld [vmem:[#allocation13] sm:$0xff]  ;;  %v2584_v7 = vld [vmem:[#allocation13 + $0x10] sm:$0xff] }
 0xc33   : > { %v2133_v11 = vmul.f32 1.442695, %v2126_v8  ;;  %v5652_v8 = vpack.c.bf16 %v2583_v6, %v2582_v5 }
 0xc34   : > { %v2131_v14 = vmul.f32 1.442695, %v2125_v9  ;;  %v2232_v15 = vpop.permute.xlu1 %2231  ;;  %v2585_v9 = vld [vmem:[#allocation13 + $0x18] sm:$0xff] }
 0xc35   : > { %5850 = vpow2.f32 %v2133_v11  ;;  %v2156_v16 = vpop.permute.xlu0 %2155  ;;  %5401 = vmatpush3.msra.mxu1 %v2232_v15  ;;  %v2667_v11 = vld [vmem:[%s7397_s21] sm:$0xff]  ;;  %v2669_v15 = vld [vmem:[%s7397_s21 + $0x10] sm:$0xff] }
 0xc36   : > { %5852 = vpow2.f32 %v2131_v14  ;;  %5396 = vmatpush3.msra.mxu0 %v2156_v16  ;;  %5410 = vmatprep.subr.mxu1 %v6213_v13  ;;  %v2668_v14 = vld [vmem:[%s7397_s21 + $0x8] sm:$0xff] }
 0xc37   : > { %5405 = vmatprep.subr.mxu0 %v6213_v13  ;;  %v5658_v16 = vpack.c.bf16 %v2668_v14, %v2667_v11  ;;  %v5083_v11 = vld [vmem:[%s7306_s14 + $0x3] ss:$0 sm:$0xff] }
 0xc3c   : > { %v5849_v17 = vpop.eup %5848 }
 0xc3d   : > { %v2138_v18 = vsel %vm851_vm4, %v5849_v17, 0.0 }
 0xc3e   : > { %2139 = vadd.xlane.f32.xlu1 %v2138_v18 }
 0xc3f   : > { %v5851_v19 = vpop.eup %5850 }
 0xc40   : > { %v5853_v20 = vpop.eup %5852  ;;  %v2144_v21 = vsel %vm851_vm4, %v5851_v19, 0.0 }
 0xc41   : > { %v2141_v22 = vsel %vm851_vm4, %v5853_v20, 0.0 }
 0xc42   : > { %2142 = vadd.xlane.f32.xlu0 %v2141_v22  ;;  %2145 = vadd.xlane.f32.xlu1 %v2144_v21 }
 0xc53   : > { %2307 = vrot.lane.b32.xlu1 %v6814_v31, %s7345_s23 }
 0xc58   : > { %2383 = vrot.lane.b32.xlu0 %v6827_v35, %s7345_s23 }
 0xc66   : > { %v2137_v23 = vpop.xlane.xlu0 %2136 }
 0xc67   : > { %5854 = vrcp.f32 %v2137_v23 }
 0xc71   : > { %v5855_v24 = vpop.eup %5854 }
 0xc72   : > { %v2151_v25 = vmul.f32 %v5855_v24, %v5847_v2 }
 0xc74   : > { %5398 = vmatmul.mubr.msk.f32.vlgmr.msra.gmra.mrb[12].mxu0 %vm851_vm4, %v2151_v25 }
 0xc75   : > { %5407 = vmatprep.mubr.msk.f32.mxu0 %vm6212_vm1, %v6213_v13 }
 0xccb   : > { %v2140_v26 = vpop.xlane.xlu1 %2139 }
 0xccc   : > { %5856 = vrcp.f32 %v2140_v26 }
 0xccf   : > { %v2143_v27 = vpop.xlane.xlu0 %2142  ;;  %v2146_v28 = vpop.xlane.xlu1 %2145 }
 0xcd0   : > { %5858 = vrcp.f32 %v2143_v27 }
 0xcd1   : > { %5860 = vrcp.f32 %v2146_v28 }
 0xcd3   : > { %v2308_v29 = vpop.permute.xlu1 %2307  ;;  %v2384_v32 = vpop.permute.xlu0 %2383 }
 0xcd4   : > { %5406 = vmatpush3.msra.mxu0 %v2308_v29 }
 0xcd5   : > { %5645 = vmatprep.subr.bf16.mxu0 %v6211_v10 }
 0xcd6   : > { %v5857_v30 = vpop.eup %5856 }
 0xcd7   : > { %v2152_v31 = vmul.f32 %v5857_v30, %v5849_v17  ;;  %v2670_v17 = vld [vmem:[%s7397_s21 + $0x18] sm:$0xff]  ;;  %v5070_v30 = vld [vmem:[%s7305_s13 + $0x2] ss:$0 sm:$0xff] }
 0xcd8   : > { %v5661_v18 = vpack.c.bf16 %v2670_v17, %v2669_v15 }
 0xcd9   : > { %5403 = vmatmul.mubr.msk.f32.vlgmr.msra.gmra.mrb[20].mxu1 %vm851_vm4, %v2152_v31 }
 0xcda   : > { %v5859_v33 = vpop.eup %5858  ;;  %5411 = vmatpush3.msra.mxu1 %v2384_v32  ;;  %5412 = vmatprep.mubr.msk.f32.mxu1 %vm6212_vm1, %v6213_v13 }
 0xcdb   : > { %v5861_v34 = vpop.eup %5860  ;;  %v2153_v35 = vmul.f32 %v5859_v33, %v5853_v20  ;;  %5651 = vmatprep.subr.bf16.mxu1 %v6211_v10  ;;  %v2672_v20 = vld [vmem:[%s7397_s21 + $0x28] sm:$0xff]  ;;  %v5071_v33 = vld [vmem:[%s7306_s14 + $0x2] ss:$0 sm:$0xff] }
 0xcdc   : > { %v2154_v36 = vmul.f32 %v5861_v34, %v5851_v19  ;;  %v2671_v19 = vld [vmem:[%s7397_s21 + $0x20] sm:$0xff] }
 0xcdd   : > { %5408 = vmatmul.mubr.msk.f32.vlgmr.msra.gmra.mrb[14].mxu0 %vm851_vm4, %v2153_v35  ;;  %v5664_v21 = vpack.c.bf16 %v2672_v20, %v2671_v19 }
 0xcde   : > { %5413 = vmatmul.mubr.msk.f32.vlgmr.msra.gmra.mrb[22].mxu1 %vm851_vm4, %v2154_v36  ;;  %5423 = vmatprep.mubr.msk.f32.mxu0 %vm6212_vm1, %v6213_v13  ;;  %v2673_v36 = vld [vmem:[%s7397_s21 + $0x30] sm:$0xff] }
 0xcdf   : > { %5434 = vmatprep.mubr.msk.f32.mxu1 %vm6212_vm1, %v6213_v13  ;;  %5647 = vmatpush3.bf16.msra.mxu0 %v5646_v40  ;;  %v5667_v38 = vpack.c.bf16 %v2674_v37, %v2673_v36  ;;  %v5072_v40 = vld [vmem:[%s7398_s16] ss:$0 sm:$0xff] }
 0xce0   : > { %5648 = vmatprep.subr.bf16.mxu0 %v6211_v10  ;;  %5653 = vmatpush3.bf16.msra.mxu1 %v5652_v8  ;;  %v5082_v8 = vld [vmem:[%s7305_s13 + $0x3] ss:$0 sm:$0xff] }
 0xce1   : > { %5654 = vmatprep.subr.bf16.mxu1 %v6211_v10 }
 0xce3   : > { %5650 = vmatpush3.bf16.msra.mxu0 %v5649_v46 }
 0xce4   : > { %5657 = vmatprep.subr.bf16.mxu0 %v6211_v10 }
 0xd47   : > { %v2227_v42 = vpop.f32.mrb[12].mxu0 }
 0xd48   : > { %v5399_v43 = vpop.f32.mrb[13].mxu0 }
 0xdac   : > { %v2303_v47 = vpop.f32.mrb[20].mxu1 }
 0xdad   : > { %2460 = vrot.lane.b32.xlu1 %v2303_v47, %s7343_s15  ;;  %v5404_v48 = vpop.f32.mrb[21].mxu1  ;;  %v5075_v47 = vld [vmem:[%s7399_s17] ss:$0 sm:$0xff]  ;;  %s7408_s15 = sld [smem:[#allocation37_spill]] }
 0xdb0   : > { %v2379_v49 = vpop.f32.mrb[14].mxu0 }
 0xdb1   : > { %v2455_v50 = vpop.f32.mrb[22].mxu1  ;;  %2464 = vrot.lane.b32.xlu0 %v2379_v49, %s7341_s18  ;;  %v5409_v51 = vpop.f32.mrb[15].mxu0  ;;  %s7401_s18 = smov 8  }
 0xdb2   : > { %2468 = vrot.lane.b32.xlu1 %v2455_v50, %s7396_s7  ;;  %v5414_v52 = vpop.f32.mrb[23].mxu1 }
 0xdb3   : > { %s7247_s2 = scalar_lea.hbm %s7408_s15, %s5146_s8 }
 0xe1f   : > { %v2461_v53 = vpop.permute.xlu1 %2460 }
 0xe20   : > { %v2471_v54 = vsel %vm851_vm4, %v2227_v42, %v2461_v53 }
 0xe23   : > { %v2465_v55 = vpop.permute.xlu0 %2464 }
 0xe24   : > { %v2472_v57 = vsel %vm1523_vm5, %v2471_v54, %v2465_v55  ;;  %v2469_v58 = vpop.permute.xlu1 %2468 }
 0xe25   : > { %v2473_v59 = vsel %vm1525_vm6, %v2472_v57, %v2469_v58  ;;  %v5084_v58 = vld [vmem:[%s7296_s4 + $0x20] sm:$0xff] }
 0xe26   : > { %5424 = vmatmul.mubr.msk.f32.vlgmr.msra.gmra.mrb[16].mxu0 %vm725_vm0, %v2473_v59  ;;  %v5085_v59 = vld [vmem:[%s7296_s4 + $0x28] sm:$0xff] }
 0xe27   : > { %5453 = vmatprep.mubr.msk.f32.mxu0 %vm6212_vm1, %v6213_v13  ;;  %5659 = vmatpush3.bf16.msra.mxu0 %v5658_v16 }
 0xe28   : > { %5660 = vmatprep.subr.bf16.mxu0 %v6211_v10 }
 0xe2b   : > { %5662 = vmatpush3.bf16.msra.mxu0 %v5661_v18 }
 0xe2c   : > { %5663 = vmatprep.subr.bf16.mxu0 %v6211_v10 }
 0xe2f   : > { %5665 = vmatpush3.bf16.msra.mxu0 %v5664_v21 }
 0xe30   : > { %5666 = vmatprep.subr.bf16.mxu0 %v6211_v10 }
 0xe33   : > { %5668 = vmatpush3.bf16.msra.mxu0 %v5667_v38 }
 0xe34   : > { %5477 = vmatprep.subr.mxu0 %v6213_v13 }
 0xef9   : > { %v2543_v60 = vpop.f32.mrb[16].mxu0 }
 0xefa   : > { %v6891_v61 = vadd.f32 %v2543_v60, %v6770_v56  ;;  %v5425_v62 = vpop.f32.mrb[17].mxu0  ;;  %v5655_v56 = vpack.c.bf16 %v2585_v9, %v2584_v7  ;;  %v5086_v60 = vld [vmem:[%s7296_s4 + $0x30] sm:$0xff] }
 0xefb   : > { %v5087_v62 = vld [vmem:[%s7296_s4 + $0x38] sm:$0xff] }
 0xefc   : > { %v2548_v63 = vsel %vm725_vm0, %v6891_v61, 0.0  ;;  %5656 = vmatpush3.bf16.msra.mxu1 %v5655_v56 }
 0xefd   : > { %2549 = vadd.xlane.f32.xlu0 %v2548_v63  ;;  %5669 = vmatprep.subr.bf16.mxu1 %v6211_v10  ;;  %v5673_v63 = vpack.c.bf16 %v5087_v62, %v5086_v60 }
 0xf8a   : > { %v2550_v1 = vpop.xlane.xlu0 %2549 }
 0xf8b   : > { %v2551_v2 = vmul.f32 0.03125, %v2550_v1 }
 0xf8d   : > { %v2552_v3 = vsub.f32 %v6891_v61, %v2551_v2 }
 0xf8f   : > { %v2553_v0 = vmul.f32 %v2552_v3, %v2552_v3  ;;  %v2571_v31 = vmul.f32 %v5070_v30, %v2552_v3 }
 0xf91   : > { %v2554_v4 = vsel %vm725_vm0, %v2553_v0, 0.0 }
 0xf92   : > { %2555 = vadd.xlane.f32.xlu1 %v2554_v4 }
0x101f   : > { %v2556_v22 = vpop.xlane.xlu1 %2555 }
0x1020   : > { %v2557_v23 = vmul.f32 0.032258064, %v2556_v22 }
0x1022   : > { %5862 = vrsqrt.f32 %v2557_v23  ;;  %vm2560_vm9 = vcmp.eq.f32.partialorder %v2557_v23, inf  ;;  %v2563_v26 = vand.u32 2147483648, %v2557_v23  ;;  %vm2562_vm10 = vcmp.eq.f32.partialorder %v2557_v23, 0.0 }
0x102c   : > { %v5863_v24 = vpop.eup %5862 }
0x102d   : > { %v2559_v25 = vmul.f32 %v5863_v24, %v2557_v23 }
0x102f   : > { %v2561_v27 = vsel %vm2560_vm9, %v2557_v23, %v2559_v25 }
0x1030   : > { %v2564_v28 = vsel %vm2562_vm10, %v2563_v26, %v2561_v27 }
0x1031   : > { %v2572_v29 = vadd.f32 1e-06, %v2564_v28 }
0x1033   : > { %5864 = vrcp.f32 %v2572_v29 }
0x103d   : > { %v5865_v32 = vpop.eup %5864 }
0x103e   : > { %v2574_v34 = vmul.f32 %v5865_v32, %v2571_v31 }
0x1040   : > { %v2581_v35 = vadd.f32 %v5071_v33, %v2574_v34 }
0x1042   : > { %5435 = vmatmul.mubr.msk.f32.vlgmr.msra.gmra.mrb[24].mxu1 %vm725_vm0, %v2581_v35 }
0x1043   : > { %5464 = vmatprep.mubr.msk.f32.mxu1 %vm6212_vm1, %v6213_v13 }
0x1115   : > { %v2662_v42 = vpop.f32.mrb[24].mxu1 }
0x1116   : > { %v2663_v43 = vadd.f32 %v5072_v40, %v2662_v42  ;;  %v5436_v44 = vpop.f32.mrb[25].mxu1 }
0x1118   : > { %v2666_v45 = vmax.f32 %v2663_v43, 0.0 }
0x111a   : > { %5454 = vmatmul.mubr.msk.f32.vlgmr.msra.gmra.mrb[18].mxu0 %vm2675_vm11, %v2666_v45 }
0x111b   : > { %5479 = vmatprep.mubr.msk.f32.mxu0 %vm6212_vm1, %v6213_v13 }
0x11ed   : > { %v2745_v46 = vpop.f32.mrb[18].mxu0 }
0x11ee   : > { %v2749_v48 = vadd.f32 %v2745_v46, %v6891_v61  ;;  %v5455_v49 = vpop.f32.mrb[19].mxu0  ;;  %v5670_v61 = vpack.c.bf16 %v5085_v59, %v5084_v58 }
0x11f0   : > { %v6946_v50 = vadd.f32 %v5075_v47, %v2749_v48  ;;  %5671 = vmatpush3.bf16.msra.mxu1 %v5670_v61 }
0x11f1   : > { %5672 = vmatprep.subr.bf16.mxu1 %v6211_v10 }
0x11f2   : > { %v2766_v51 = vsel %vm725_vm0, %v6946_v50, 0.0 }
0x11f3   : > { %2767 = vadd.xlane.f32.xlu0 %v2766_v51 }
0x11f4   : > { %5674 = vmatpush3.bf16.msra.mxu1 %v5673_v63 }
0x11f5   : > { %5467 = vmatprep.subr.mxu1 %v6213_v13 }
0x1280   : > { %v2768_v52 = vpop.xlane.xlu0 %2767 }
0x1281   : > { %v2769_v53 = vmul.f32 0.03125, %v2768_v52 }
0x1283   : > { %v2770_v54 = vsub.f32 %v6946_v50, %v2769_v53 }
0x1285   : > { %v2771_v55 = vmul.f32 %v2770_v54, %v2770_v54  ;;  %v2789_v9 = vmul.f32 %v5082_v8, %v2770_v54 }
0x1287   : > { %v2772_v57 = vsel %vm725_vm0, %v2771_v55, 0.0 }
0x1288   : > { %2773 = vadd.xlane.f32.xlu0 %v2772_v57 }
0x1315   : > { %v2774_v1 = vpop.xlane.xlu0 %2773 }
0x1316   : > { %v2775_v2 = vmul.f32 0.032258064, %v2774_v1 }
0x1318   : > { %5866 = vrsqrt.f32 %v2775_v2  ;;  %vm2778_vm12 = vcmp.eq.f32.partialorder %v2775_v2, inf  ;;  %v2781_v4 = vand.u32 2147483648, %v2775_v2  ;;  %vm2780_vm13 = vcmp.eq.f32.partialorder %v2775_v2, 0.0 }
0x1322   : > { %v5867_v3 = vpop.eup %5866 }
0x1323   : > { %v2777_v0 = vmul.f32 %v5867_v3, %v2775_v2 }
0x1325   : > { %v2779_v5 = vsel %vm2778_vm12, %v2775_v2, %v2777_v0 }
0x1326   : > { %v2782_v6 = vsel %vm2780_vm13, %v2781_v4, %v2779_v5 }
0x1327   : > { %v2790_v7 = vadd.f32 1e-06, %v2782_v6 }
0x1329   : > { %5868 = vrcp.f32 %v2790_v7 }
0x1333   : > { %v5869_v56 = vpop.eup %5868 }
0x1334   : > { %v2792_v14 = vmul.f32 %v5869_v56, %v2789_v9 }
0x1336   : > { %v2799_v15 = vadd.f32 %v5083_v11, %v2792_v14 }
0x1338   : > { %5465 = vmatmul.mubr.msk.f32.vlgmr.msra.gmra.mrb[26].mxu1 %vm725_vm0, %v2799_v15 }
0x1339   : > { %5469 = vmatprep.mubr.msk.f32.mxu1 %vm6212_vm1, %v6213_v13 }
0x140b   : > { %v2874_v16 = vpop.f32.mrb[26].mxu1 }
0x140c   : > { %2886 = vrot.lane.b32.xlu0 %v2874_v16, %s7347_s0  ;;  %2884 = vrot.lane.b32.xlu1 %v2874_v16, %s6215_s29  ;;  %v5466_v17 = vpop.f32.mrb[27].mxu1 }
0x1410   : > { %2888 = vrot.lane.b32.xlu1 %v2874_v16, %s6214_s1 }
0x1414   : > { %2890 = vrot.lane.b32.xlu1 %v2874_v16, %s7345_s23 }
0x147e   : > { %v6979_v18 = vpop.permute.xlu0 %2886  ;;  %v2885_v19 = vpop.permute.xlu1 %2884 }
0x147f   : > { %3042 = vrot.lane.b32.xlu1 %v6979_v18, %s7345_s23  ;;  %2966 = vrot.lane.b32.xlu0 %v2885_v19, %s7345_s23 }
0x1482   : > { %v6984_v20 = vpop.permute.xlu1 %2888 }
0x1483   : > { %3118 = vrot.lane.b32.xlu0 %v6984_v20, %s7345_s23 }
0x1486   : > { %v2891_v21 = vpop.permute.xlu1 %2890 }
0x1487   : > { %5468 = vmatpush3.xpose.msk.msra.mxu1 %vm851_vm4, %v2891_v21 }
0x1488   : > { %5472 = vmatprep.subr.mxu1 %v6213_v13 }
0x148a   : > { %5470 = vmatmul.mubr.msk.f32.vlgmr.msra.gmra.mrb[28].mxu1 %vm851_vm4, %v2874_v16 }
0x148b   : > { %5474 = vmatprep.mubr.msk.f32.mxu1 %vm6212_vm1, %v6213_v13 }
0x14f1   : > { %v2967_v22 = vpop.permute.xlu0 %2966  ;;  %v3043_v23 = vpop.permute.xlu1 %3042 }
0x14f2   : > { %5473 = vmatpush3.xpose.msk.msra.mxu1 %vm851_vm4, %v2967_v22  ;;  %5478 = vmatpush3.xpose.msk.msra.mxu0 %vm851_vm4, %v3043_v23  ;;  %v5089_v22 = vld [vmem:[%s7297_s5 + $0x20] sm:$0xff]  ;;  %v5090_v23 = vld [vmem:[%s7297_s5 + $0x28] sm:$0xff] }
0x14f3   : > { %5482 = vmatprep.subr.mxu1 %v6213_v13  ;;  %5487 = vmatprep.subr.mxu0 %v6213_v13 }
0x14f5   : > { %v3119_v24 = vpop.permute.xlu0 %3118  ;;  %5475 = vmatmul.mubr.msk.f32.vlgmr.msra.gmra.mrb[30].mxu1 %vm851_vm4, %v2885_v19  ;;  %5480 = vmatmul.mubr.msk.f32.vlgmr.msra.gmra.mrb[20].mxu0 %vm851_vm4, %v6979_v18 }
0x14f6   : > { %5483 = vmatpush3.xpose.msk.msra.mxu1 %vm851_vm4, %v3119_v24  ;;  %5484 = vmatprep.mubr.msk.f32.mxu1 %vm6212_vm1, %v6213_v13  ;;  %v5676_v24 = vpack.c.bf16 %v5090_v23, %v5089_v22 }
0x14f7   : > { %5492 = vmatprep.subr.mxu1 %v6213_v13  ;;  %5489 = vmatprep.mubr.msk.f32.mxu0 %vm6212_vm1, %v6213_v13 }
0x14f9   : > { %5485 = vmatmul.mubr.msk.f32.vlgmr.msra.gmra.mrb[32].mxu1 %vm851_vm4, %v6984_v20 }
0x14fa   : > { %5494 = vmatprep.mubr.msk.f32.mxu1 %vm6212_vm1, %v6213_v13 }
0x155d   : > { %v2962_v25 = vpop.f32.mrb[28].mxu1 }
0x155e   : > { %v3194_v26 = vmul.f32 0.35355338, %v2962_v25  ;;  %v5471_v27 = vpop.f32.mrb[29].mxu1 }
0x155f   : > { %v5091_v27 = vld [vmem:[%s7297_s5 + $0x30] sm:$0xff] }
0x1560   : > { %v3198_v28 = vadd.f32 %v3194_v26, %v6709_v39 }
0x1562   : > { %v3202_v29 = vsel %vm851_vm4, %v3198_v28, -inf }
0x1563   : > { %3203 = vmax.xlane.f32.xlu1 %v3202_v29 }
0x15c8   : > { %v3038_v30 = vpop.f32.mrb[30].mxu1  ;;  %v3114_v31 = vpop.f32.mrb[20].mxu0 }
0x15c9   : > { %v3195_v32 = vmul.f32 0.35355338, %v3038_v30  ;;  %v3196_v33 = vmul.f32 0.35355338, %v3114_v31  ;;  %v5476_v34 = vpop.f32.mrb[31].mxu1  ;;  %v5481_v35 = vpop.f32.mrb[21].mxu0 }
0x15cb   : > { %v3199_v36 = vadd.f32 %v3195_v32, %v6709_v39  ;;  %v3200_v43 = vadd.f32 %v3196_v33, %v6709_v39 }
0x15cc   : > { %v3190_v37 = vpop.f32.mrb[32].mxu1 }
0x15cd   : > { %v3197_v38 = vmul.f32 0.35355338, %v3190_v37  ;;  %v5486_v40 = vpop.f32.mrb[33].mxu1  ;;  %v3205_v42 = vsel %vm851_vm4, %v3199_v36, -inf  ;;  %v3208_v45 = vsel %vm851_vm4, %v3200_v43, -inf }
0x15ce   : > { %3206 = vmax.xlane.f32.xlu0 %v3205_v42 }
0x15cf   : > { %v3201_v44 = vadd.f32 %v3197_v38, %v6709_v39 }
0x15d1   : > { %v3211_v46 = vsel %vm851_vm4, %v3201_v44, -inf }
0x15d2   : > { %3209 = vmax.xlane.f32.xlu0 %v3208_v45  ;;  %3212 = vmax.xlane.f32.xlu1 %v3211_v46 }
0x15e3   : > { %3322 = vrot.lane.b32.xlu1 %v2885_v19, %s7400_s20 }
0x15e8   : > { %3246 = vrot.lane.b32.xlu0 %v2874_v16, %s7400_s20 }
0x15f0   : > { %v3204_v47 = vpop.xlane.xlu1 %3203 }
0x15f1   : > { %v3214_v48 = vsub.f32 %v3198_v28, %v3204_v47  ;;  %v5092_v28 = vld [vmem:[%s7297_s5 + $0x38] sm:$0xff] }
0x15f2   : > { %v5679_v29 = vpack.c.bf16 %v5092_v28, %v5091_v27 }
0x15f3   : > { %v3218_v49 = vmul.f32 1.442695, %v3214_v48 }
0x15f5   : > { %5870 = vpow2.f32 %v3218_v49 }
0x15ff   : > { %v5871_v51 = vpop.eup %5870 }
0x1600   : > { %v3226_v52 = vsel %vm851_vm4, %v5871_v51, 0.0 }
0x1607   : > { %3227 = vadd.xlane.f32.xlu0 %v3226_v52 }
0x165b   : > { %v3207_v53 = vpop.xlane.xlu0 %3206 }
0x165c   : > { %v3215_v39 = vsub.f32 %v3199_v36, %v3207_v53 }
0x165e   : > { %v3220_v54 = vmul.f32 1.442695, %v3215_v39  ;;  %v3752_v39 = vld [vmem:[#allocation10 + $0x20] sm:$0xff] }
0x165f   : > { %v3210_v55 = vpop.xlane.xlu0 %3209  ;;  %v3213_v57 = vpop.xlane.xlu1 %3212 }
0x1660   : > { %5872 = vpow2.f32 %v3220_v54  ;;  %v3216_v58 = vsub.f32 %v3200_v43, %v3210_v55  ;;  %v3217_v59 = vsub.f32 %v3201_v44, %v3213_v57  ;;  %v3753_v54 = vld [vmem:[#allocation10 + $0x28] sm:$0xff]  ;;  %v3755_v57 = vld [vmem:[#allocation10 + $0x38] sm:$0xff] }
0x1661   : > { %v5688_v55 = vpack.c.bf16 %v3753_v54, %v3752_v39 }
0x1662   : > { %v3222_v60 = vmul.f32 1.442695, %v3216_v58  ;;  %v3224_v61 = vmul.f32 1.442695, %v3217_v59  ;;  %v5108_v59 = vld [vmem:[%s7395_s22 + $0x20] sm:$0xff] }
0x1663   : > { %v3247_v62 = vpop.permute.xlu0 %3246  ;;  %v3323_v63 = vpop.permute.xlu1 %3322 }
0x1664   : > { %5874 = vpow2.f32 %v3222_v60  ;;  %5488 = vmatpush3.msra.mxu0 %v3247_v62  ;;  %5493 = vmatpush3.msra.mxu1 %v3323_v63  ;;  %v5109_v60 = vld [vmem:[%s7395_s22 + $0x28] sm:$0xff]  ;;  %v5111_v63 = vld [vmem:[%s7395_s22 + $0x38] sm:$0xff] }
0x1665   : > { %5876 = vpow2.f32 %v3224_v61  ;;  %5497 = vmatprep.subr.mxu0 %v6213_v13  ;;  %5502 = vmatprep.subr.mxu1 %v6213_v13  ;;  %v5110_v61 = vld [vmem:[%s7395_s22 + $0x30] sm:$0xff]  ;;  %v5682_v62 = vpack.c.bf16 %v5109_v60, %v5108_v59 }
0x166a   : > { %v5873_v1 = vpop.eup %5872 }
0x166b   : > { %v3229_v2 = vsel %vm851_vm4, %v5873_v1, 0.0 }
0x166c   : > { %3230 = vadd.xlane.f32.xlu1 %v3229_v2 }
0x166e   : > { %v5875_v3 = vpop.eup %5874 }
0x166f   : > { %v5877_v0 = vpop.eup %5876  ;;  %v3232_v4 = vsel %vm851_vm4, %v5875_v3, 0.0 }
0x1670   : > { %3233 = vadd.xlane.f32.xlu0 %v3232_v4  ;;  %v3235_v5 = vsel %vm851_vm4, %v5877_v0, 0.0 }
0x1671   : > { %3236 = vadd.xlane.f32.xlu1 %v3235_v5 }
0x1682   : > { %3398 = vrot.lane.b32.xlu1 %v6979_v18, %s7400_s20 }
0x1686   : > { %3474 = vrot.lane.b32.xlu0 %v6984_v20, %s7400_s20  ;;  %s714_s20 = scalar_lea.vmem [#allocation14], %s6605_s30  ;;  %s6122_s30 = sshll.u32 %s6222_s28, 4  ;;  %s6123_s30 = int_to_ptr.vmem [resolvable:$false] %s6122_s30 }
0x1687   : > { %s4850_s0 = sshll.u32 %s714_s20, 4  ;;  %s7249_s0 = int_to_ptr.vmem [resolvable:$true] %s4850_s0 }
0x1688   : > { %p6125_p13 = scmp.lt.s32.totalorder %s7249_s0, %s6123_s30 }
0x1694   : > { %v3228_v6 = vpop.xlane.xlu0 %3227 }
0x1695   : > { %5878 = vrcp.f32 %v3228_v6 }
0x169f   : > { %v5879_v7 = vpop.eup %5878 }
0x16a0   : > { %v3242_v8 = vmul.f32 %v5879_v7, %v5871_v51 }
0x16a2   : > { %5490 = vmatmul.mubr.msk.f32.vlgmr.msra.gmra.mrb[22].mxu0 %vm851_vm4, %v3242_v8 }
0x16a3   : > { %5499 = vmatprep.mubr.msk.f32.mxu0 %vm6212_vm1, %v6213_v13 }
0x16f9   : > { %v3231_v9 = vpop.xlane.xlu1 %3230 }
0x16fa   : > { %5880 = vrcp.f32 %v3231_v9 }
0x16fd   : > { %v3234_v56 = vpop.xlane.xlu0 %3233 }
0x16fe   : > { %5882 = vrcp.f32 %v3234_v56  ;;  %v3237_v11 = vpop.xlane.xlu1 %3236 }
0x16ff   : > { %5884 = vrcp.f32 %v3237_v11  ;;  %v5107_v11 = vld [vmem:[%s7306_s14 + $0x4] ss:$0 sm:$0xff] }
0x1701   : > { %v3475_v17 = vpop.permute.xlu0 %3474 }
0x1702   : > { %v3399_v14 = vpop.permute.xlu1 %3398 }
0x1703   : > { %5498 = vmatpush3.msra.mxu0 %v3399_v14 }
0x1704   : > { %v5881_v15 = vpop.eup %5880  ;;  %5675 = vmatprep.subr.bf16.mxu0 %v6211_v10 }
0x1705   : > { %v3243_v16 = vmul.f32 %v5881_v15, %v5873_v1  ;;  %v5685_v1 = vpack.c.bf16 %v5111_v63, %v5110_v61 }
0x1707   : > { %5495 = vmatmul.mubr.msk.f32.vlgmr.msra.gmra.mrb[34].mxu1 %vm851_vm4, %v3243_v16 }
0x1708   : > { %v5883_v18 = vpop.eup %5882  ;;  %5503 = vmatpush3.msra.mxu1 %v3475_v17  ;;  %5504 = vmatprep.mubr.msk.f32.mxu1 %vm6212_vm1, %v6213_v13 }
0x1709   : > { %v5885_v19 = vpop.eup %5884  ;;  %v3244_v20 = vmul.f32 %v5883_v18, %v5875_v3  ;;  %5681 = vmatprep.subr.bf16.mxu1 %v6211_v10 }
0x170a   : > { %v3245_v21 = vmul.f32 %v5885_v19, %v5877_v0 }
0x170b   : > { %5500 = vmatmul.mubr.msk.f32.vlgmr.msra.gmra.mrb[24].mxu0 %vm851_vm4, %v3244_v20 }
0x170c   : > { %5505 = vmatmul.mubr.msk.f32.vlgmr.msra.gmra.mrb[36].mxu1 %vm851_vm4, %v3245_v21  ;;  %5515 = vmatprep.mubr.msk.f32.mxu0 %vm6212_vm1, %v6213_v13 }
0x170d   : > { %5526 = vmatprep.mubr.msk.f32.mxu1 %vm6212_vm1, %v6213_v13  ;;  %5677 = vmatpush3.bf16.msra.mxu0 %v5676_v24 }
0x170e   : > { %5678 = vmatprep.subr.bf16.mxu0 %v6211_v10  ;;  %5683 = vmatpush3.bf16.msra.mxu1 %v5682_v62 }
0x170f   : > { %5684 = vmatprep.subr.bf16.mxu1 %v6211_v10 }
0x1711   : > { %5680 = vmatpush3.bf16.msra.mxu0 %v5679_v29 }
0x1712   : > { %5687 = vmatprep.subr.bf16.mxu0 %v6211_v10  ;;  %5686 = vmatpush3.bf16.msra.mxu1 %v5685_v1 }
0x1713   : > { %5540 = vmatprep.subr.mxu1 %v6213_v13 }
0x1775   : > { %v3318_v25 = vpop.f32.mrb[22].mxu0 }
0x1776   : > { %v5491_v26 = vpop.f32.mrb[23].mxu0 }
0x17da   : > { %v3394_v30 = vpop.f32.mrb[34].mxu1 }
0x17db   : > { %3551 = vrot.lane.b32.xlu1 %v3394_v30, %s7401_s18  ;;  %v5496_v31 = vpop.f32.mrb[35].mxu1 }
0x17de   : > { %v3470_v32 = vpop.f32.mrb[24].mxu0 }
0x17df   : > { %v3546_v33 = vpop.f32.mrb[36].mxu1  ;;  %3555 = vrot.lane.b32.xlu0 %v3470_v32, %s7402_s12  ;;  %v5501_v34 = vpop.f32.mrb[25].mxu0 }
0x17e0   : > { %3559 = vrot.lane.b32.xlu1 %v3546_v33, %s7396_s7  ;;  %v5506_v35 = vpop.f32.mrb[37].mxu1 }
0x184d   : > { %v3552_v36 = vpop.permute.xlu1 %3551 }
0x184e   : > { %v3562_v37 = vsel %vm851_vm4, %v3318_v25, %v3552_v36 }
0x1851   : > { %v3556_v38 = vpop.permute.xlu0 %3555 }
0x1852   : > { %v3563_v40 = vsel %vm1523_vm5, %v3562_v37, %v3556_v38  ;;  %v3560_v42 = vpop.permute.xlu1 %3559 }
0x1853   : > { %v3564_v43 = vsel %vm1525_vm6, %v3563_v40, %v3560_v42 }
0x1854   : > { %5516 = vmatmul.mubr.msk.f32.vlgmr.msra.gmra.mrb[26].mxu0 %vm725_vm0, %v3564_v43 }
0x1855   : > { %5537 = vmatprep.mubr.msk.f32.mxu0 %vm6212_vm1, %v6213_v13  ;;  %5689 = vmatpush3.bf16.msra.mxu0 %v5688_v55 }
0x1856   : > { %5690 = vmatprep.subr.bf16.mxu0 %v6211_v10 }
0x1927   : > { %v3634_v44 = vpop.f32.mrb[26].mxu0 }
0x1928   : > { %v7068_v45 = vadd.f32 %v3634_v44, %v6946_v50  ;;  %v5517_v46 = vpop.f32.mrb[27].mxu0  ;;  %v3754_v50 = vld [vmem:[#allocation10 + $0x30] sm:$0xff] }
0x1929   : > { %v5691_v58 = vpack.c.bf16 %v3755_v57, %v3754_v50 }
0x192a   : > { %v3639_v47 = vsel %vm725_vm0, %v7068_v45, 0.0 }
0x192b   : > { %3640 = vadd.xlane.f32.xlu0 %v3639_v47  ;;  %5692 = vmatpush3.bf16.msra.mxu0 %v5691_v58 }
0x192c   : > { %5550 = vmatprep.subr.mxu0 %v6213_v13 }
0x192e   : > { %5538 = vmatmul.mubr.msk.f32.vlgmr.msra.gmra.mrb[28].mxu0 %vm725_vm0, %v6791_v12  ;;  %v5106_v12 = vld [vmem:[%s7305_s13 + $0x4] ss:$0 sm:$0xff] }
0x192f   : > { %5552 = vmatprep.mubr.msk.f32.mxu0 %vm6212_vm1, %v6213_v13 }
0x19b8   : > { %v3641_v48 = vpop.xlane.xlu0 %3640 }
0x19b9   : > { %v3642_v49 = vmul.f32 0.03125, %v3641_v48 }
0x19bb   : > { %v3643_v51 = vsub.f32 %v7068_v45, %v3642_v49 }
0x19bd   : > { %v3644_v52 = vmul.f32 %v3643_v51, %v3643_v51  ;;  %v3662_v9 = vmul.f32 %v5106_v12, %v3643_v51 }
0x19bf   : > { %v3645_v53 = vsel %vm725_vm0, %v3644_v52, 0.0 }
0x19c0   : > { %3646 = vadd.xlane.f32.xlu1 %v3645_v53 }
0x1a01   : > { %v3822_v16 = vpop.f32.mrb[28].mxu0 }
0x1a02   : > { %3839 = vrot.lane.b32.xlu0 %v3822_v16, %s6215_s29  ;;  %v5539_v17 = vpop.f32.mrb[29].mxu0  ;;  %3843 = vrot.lane.b32.xlu1 %v3822_v16, %s6214_s1 }
0x1a06   : > { %3841 = vrot.lane.b32.xlu0 %v3822_v16, %s7403_s24 }
0x1a4d   : > { %v3647_v2 = vpop.xlane.xlu1 %3646 }
0x1a4e   : > { %v3648_v3 = vmul.f32 0.032258064, %v3647_v2 }
0x1a50   : > { %5886 = vrsqrt.f32 %v3648_v3  ;;  %vm3651_vm14 = vcmp.eq.f32.partialorder %v3648_v3, inf  ;;  %v3654_v5 = vand.u32 2147483648, %v3648_v3  ;;  %vm3653_vm15 = vcmp.eq.f32.partialorder %v3648_v3, 0.0 }
0x1a5a   : > { %v5887_v0 = vpop.eup %5886 }
0x1a5b   : > { %v3650_v4 = vmul.f32 %v5887_v0, %v3648_v3 }
0x1a5d   : > { %v3652_v6 = vsel %vm3651_vm14, %v3648_v3, %v3650_v4 }
0x1a5e   : > { %v3655_v7 = vsel %vm3653_vm15, %v3654_v5, %v3652_v6 }
0x1a5f   : > { %v3663_v8 = vadd.f32 1e-06, %v3655_v7 }
0x1a61   : > { %5888 = vrcp.f32 %v3663_v8 }
0x1a6b   : > { %v5889_v56 = vpop.eup %5888 }
0x1a6c   : > { %v3665_v14 = vmul.f32 %v5889_v56, %v3662_v9 }
0x1a6e   : > { %v3672_v15 = vadd.f32 %v5107_v11, %v3665_v14 }
0x1a70   : > { %5527 = vmatmul.mubr.msk.f32.vlgmr.msra.gmra.mrb[38].mxu1 %vm725_vm0, %v3672_v15 }
0x1a71   : > { %5542 = vmatprep.mubr.msk.f32.mxu1 %vm6212_vm1, %v6213_v13  ;;  %5541 = vmatpush3.xpose.msk.msra.mxu1 %vm851_vm4, %v3822_v16 }
0x1a72   : > { %5545 = vmatprep.subr.mxu1 %v6213_v13 }
0x1a74   : > { %v7108_v18 = vpop.permute.xlu0 %3839  ;;  %v7124_v22 = vpop.permute.xlu1 %3843 }
0x1a78   : > { %v7110_v19 = vpop.permute.xlu0 %3841 }
0x1a79   : > { %5551 = vmatpush3.xpose.msk.msra.mxu0 %vm851_vm4, %v7110_v19 }
0x1a7a   : > { %5560 = vmatprep.subr.mxu0 %v6213_v13 }
0x1b43   : > { %v3747_v20 = vpop.f32.mrb[38].mxu1 }
0x1b44   : > { %3834 = vrot.lane.b32.xlu0 %v3747_v20, %s7403_s24  ;;  %3832 = vrot.lane.b32.xlu1 %v3747_v20, %s6215_s29  ;;  %v5528_v21 = vpop.f32.mrb[39].mxu1  ;;  %s7405_s29 = sld [smem:[#allocation35_spill]]  ;;  %s4837_s24 = scalar_lea.sflag [#allocation4], %s6602_s19 }
0x1b45   : > { %5543 = vmatmul.mubr.msk.f32.vlgmr.msra.gmra.mrb[40].mxu1 %vm851_vm4, %v3747_v20  ;;  %v3827_v21 = vld [vmem:[#allocation11 + $0x20] sm:$0xff] }
0x1b46   : > { %5546 = vmatpush3.xpose.msk.msra.mxu1 %vm851_vm4, %v7108_v18  ;;  %5547 = vmatprep.mubr.msk.f32.mxu1 %vm6212_vm1, %v6213_v13 }
0x1b47   : > { %5555 = vmatprep.subr.mxu1 %v6213_v13 }
0x1b48   : > { %3836 = vrot.lane.b32.xlu1 %v3747_v20, %s6214_s1  ;;  %s7404_s1 = smov 96  }
0x1bb6   : > { %v3835_v23 = vpop.permute.xlu0 %3834  ;;  %v3833_v24 = vpop.permute.xlu1 %3832 }
0x1bb7   : > { %5548 = vmatmul.mubr.msk.f32.vlgmr.msra.gmra.mrb[42].mxu1 %vm851_vm4, %v3833_v24  ;;  %5553 = vmatmul.mubr.msk.f32.vlgmr.msra.gmra.mrb[30].mxu0 %vm851_vm4, %v3835_v23 }
0x1bb8   : > { %5556 = vmatpush3.xpose.msk.msra.mxu1 %vm851_vm4, %v7124_v22  ;;  %5557 = vmatprep.mubr.msk.f32.mxu1 %vm6212_vm1, %v6213_v13 }
0x1bb9   : > { %5562 = vmatprep.mubr.msk.f32.mxu0 %vm6212_vm1, %v6213_v13  ;;  %5565 = vmatprep.subr.mxu1 %v6213_v13 }
0x1bba   : > { %v3837_v25 = vpop.permute.xlu1 %3836 }
0x1bbb   : > { %5558 = vmatmul.mubr.msk.f32.vlgmr.msra.gmra.mrb[44].mxu1 %vm851_vm4, %v3837_v25 }
0x1bbc   : > { %5567 = vmatprep.mubr.msk.f32.mxu1 %vm6212_vm1, %v6213_v13 }
0x1c18   : > { %v3915_v26 = vpop.f32.mrb[40].mxu1 }
0x1c19   : > { %v4141_v27 = vmul.f32 0.35355338, %v3915_v26  ;;  %v5544_v28 = vpop.f32.mrb[41].mxu1  ;;  %v3829_v26 = vld [vmem:[#allocation11 + $0x30] sm:$0xff] }
0x1c1b   : > { %v4145_v29 = vadd.f32 %v4141_v27, %v6843_v41  ;;  %v3830_v27 = vld [vmem:[#allocation11 + $0x38] sm:$0xff] }
0x1c1c   : > { %v5697_v28 = vpack.c.bf16 %v3830_v27, %v3829_v26 }
0x1c1d   : > { %v4149_v30 = vsel %vm851_vm4, %v4145_v29, -inf }
0x1c1e   : > { %4150 = vmax.xlane.f32.xlu0 %v4149_v30 }
0x1c8a   : > { %v3989_v31 = vpop.f32.mrb[42].mxu1  ;;  %v4063_v32 = vpop.f32.mrb[30].mxu0 }
0x1c8b   : > { %v4142_v33 = vmul.f32 0.35355338, %v3989_v31  ;;  %v4143_v34 = vmul.f32 0.35355338, %v4063_v32  ;;  %v5549_v35 = vpop.f32.mrb[43].mxu1  ;;  %v5554_v36 = vpop.f32.mrb[31].mxu0 }
0x1c8d   : > { %v4147_v37 = vadd.f32 %v4143_v34, %v6843_v41  ;;  %v4146_v38 = vadd.f32 %v4142_v33, %v6843_v41 }
0x1c8e   : > { %v4137_v40 = vpop.f32.mrb[44].mxu1 }
0x1c8f   : > { %v4144_v42 = vmul.f32 0.35355338, %v4137_v40  ;;  %v5559_v43 = vpop.f32.mrb[45].mxu1  ;;  %v4155_v44 = vsel %vm851_vm4, %v4147_v37, -inf  ;;  %v4152_v46 = vsel %vm851_vm4, %v4146_v38, -inf }
0x1c90   : > { %4156 = vmax.xlane.f32.xlu0 %v4155_v44  ;;  %4153 = vmax.xlane.f32.xlu1 %v4152_v46 }
0x1c91   : > { %v4148_v47 = vadd.f32 %v4144_v42, %v6843_v41 }
0x1c93   : > { %v4158_v48 = vsel %vm851_vm4, %v4148_v47, -inf }
0x1c94   : > { %4159 = vmax.xlane.f32.xlu0 %v4158_v48 }
0x1ca1   : > { %4193 = vrot.lane.b32.xlu1 %v3822_v16, %s7404_s1 }
0x1cab   : > { %v4151_v49 = vpop.xlane.xlu0 %4150 }
0x1cac   : > { %v4161_v51 = vsub.f32 %v4145_v29, %v4151_v49 }
0x1cae   : > { %v4165_v52 = vmul.f32 1.442695, %v4161_v51 }
0x1cb0   : > { %5890 = vpow2.f32 %v4165_v52 }
0x1cba   : > { %v5891_v53 = vpop.eup %5890 }
0x1cbb   : > { %v4173_v39 = vsel %vm851_vm4, %v5891_v53, 0.0 }
0x1cc5   : > { %4174 = vadd.xlane.f32.xlu1 %v4173_v39  ;;  %v4621_v39 = vld [vmem:[#allocation13 + $0x20] sm:$0xff] }
0x1d1d   : > { %v4157_v54 = vpop.xlane.xlu0 %4156  ;;  %v4154_v55 = vpop.xlane.xlu1 %4153 }
0x1d1e   : > { %v4163_v50 = vsub.f32 %v4147_v37, %v4157_v54  ;;  %v4162_v57 = vsub.f32 %v4146_v38, %v4154_v55  ;;  %v4622_v54 = vld [vmem:[#allocation13 + $0x28] sm:$0xff] }
0x1d1f   : > { %v5700_v55 = vpack.c.bf16 %v4622_v54, %v4621_v39 }
0x1d20   : > { %v4169_v58 = vmul.f32 1.442695, %v4163_v50  ;;  %v4167_v59 = vmul.f32 1.442695, %v4162_v57  ;;  %v4624_v50 = vld [vmem:[#allocation13 + $0x38] sm:$0xff]  ;;  %v5132_v57 = vld [vmem:[%s7397_s21 + $0x40] sm:$0xff] }
0x1d21   : > { %v4194_v41 = vpop.permute.xlu1 %4193  ;;  %v4160_v60 = vpop.xlane.xlu0 %4159 }
0x1d22   : > { %5892 = vpow2.f32 %v4169_v58  ;;  %v4164_v61 = vsub.f32 %v4148_v47, %v4160_v60  ;;  %5561 = vmatpush3.msra.mxu0 %v4194_v41  ;;  %v5133_v58 = vld [vmem:[%s7397_s21 + $0x48] sm:$0xff]  ;;  %v5135_v60 = vld [vmem:[%s7397_s21 + $0x58] sm:$0xff] }
0x1d23   : > { %5894 = vpow2.f32 %v4167_v59  ;;  %5570 = vmatprep.subr.mxu0 %v6213_v13  ;;  %v5134_v59 = vld [vmem:[%s7397_s21 + $0x50] sm:$0xff]  ;;  %v5706_v41 = vpack.c.bf16 %v5133_v58, %v5132_v57 }
0x1d24   : > { %v4171_v62 = vmul.f32 1.442695, %v4164_v61  ;;  %v5709_v61 = vpack.c.bf16 %v5135_v60, %v5134_v59 }
0x1d26   : > { %5896 = vpow2.f32 %v4171_v62  ;;  %v5136_v62 = vld [vmem:[%s7397_s21 + $0x60] sm:$0xff] }
0x1d2c   : > { %v5893_v63 = vpop.eup %5892 }
0x1d2d   : > { %v5895_v1 = vpop.eup %5894  ;;  %v4179_v2 = vsel %vm851_vm4, %v5893_v63, 0.0 }
0x1d2e   : > { %4180 = vadd.xlane.f32.xlu1 %v4179_v2  ;;  %v4176_v3 = vsel %vm851_vm4, %v5895_v1, 0.0 }
0x1d2f   : > { %4177 = vadd.xlane.f32.xlu0 %v4176_v3 }
0x1d30   : > { %v5897_v0 = vpop.eup %5896 }
0x1d31   : > { %v4182_v4 = vsel %vm851_vm4, %v5897_v0, 0.0 }
0x1d33   : > { %4183 = vadd.xlane.f32.xlu0 %v4182_v4 }
0x1d3f   : > { %4345 = vrot.lane.b32.xlu1 %v7110_v19, %s7404_s1 }
0x1d43   : > { %4421 = vrot.lane.b32.xlu1 %v7124_v22, %s7404_s1  ;;  %v3828_v22 = vld [vmem:[#allocation11 + $0x28] sm:$0xff] }
0x1d44   : > { %v5694_v23 = vpack.c.bf16 %v3828_v22, %v3827_v21 }
0x1d49   : > { %4269 = vrot.lane.b32.xlu0 %v7108_v18, %s7404_s1  ;;  %s6118_s1 = scalar_lea.vmem %s7249_s0, 128 }
0x1d4a   : > { %p6119_p7 = scmp.ne.s32.totalorder %s7249_s0, %s6118_s1 }
0x1d52   : > { %v4175_v5 = vpop.xlane.xlu1 %4174 }
0x1d53   : > { %5898 = vrcp.f32 %v4175_v5 }
0x1d5d   : > { %v5899_v6 = vpop.eup %5898 }
0x1d5e   : > { %v4189_v7 = vmul.f32 %v5899_v6, %v5891_v53 }
0x1d60   : > { %5563 = vmatmul.mubr.msk.f32.vlgmr.msra.gmra.mrb[32].mxu0 %vm851_vm4, %v4189_v7 }
0x1d61   : > { %5572 = vmatprep.mubr.msk.f32.mxu0 %vm6212_vm1, %v6213_v13 }
0x1dbb   : > { %v4181_v8 = vpop.xlane.xlu1 %4180 }
0x1dbc   : > { %5900 = vrcp.f32 %v4181_v8  ;;  %v4178_v12 = vpop.xlane.xlu0 %4177 }
0x1dbd   : > { %5902 = vrcp.f32 %v4178_v12  ;;  %v5127_v12 = vld [vmem:[%s7305_s13 + $0x5] ss:$0 sm:$0xff] }
0x1dbf   : > { %v4346_v9 = vpop.permute.xlu1 %4345 }
0x1dc0   : > { %v4184_v56 = vpop.xlane.xlu0 %4183  ;;  %5571 = vmatpush3.msra.mxu0 %v4346_v9 }
0x1dc1   : > { %5904 = vrcp.f32 %v4184_v56  ;;  %5693 = vmatprep.subr.bf16.mxu0 %v6211_v10 }
0x1dc3   : > { %v4422_v18 = vpop.permute.xlu1 %4421 }
0x1dc4   : > { %v4270_v11 = vpop.permute.xlu0 %4269 }
0x1dc5   : > { %5566 = vmatpush3.msra.mxu1 %v4270_v11 }
0x1dc6   : > { %v5901_v14 = vpop.eup %5900  ;;  %5575 = vmatprep.subr.mxu1 %v6213_v13 }
0x1dc7   : > { %v5903_v15 = vpop.eup %5902  ;;  %v4191_v16 = vmul.f32 %v5901_v14, %v5893_v63  ;;  %v5137_v63 = vld [vmem:[%s7397_s21 + $0x68] sm:$0xff] }
0x1dc8   : > { %v4190_v17 = vmul.f32 %v5903_v15, %v5895_v1  ;;  %v5712_v1 = vpack.c.bf16 %v5137_v63, %v5136_v62  ;;  %v5138_v15 = vld [vmem:[%s7397_s21 + $0x70] sm:$0xff] }
0x1dc9   : > { %5573 = vmatmul.mubr.msk.f32.vlgmr.msra.gmra.mrb[34].mxu0 %vm851_vm4, %v4191_v16  ;;  %v5139_v16 = vld [vmem:[%s7397_s21 + $0x78] sm:$0xff] }
0x1dca   : > { %5568 = vmatmul.mubr.msk.f32.vlgmr.msra.gmra.mrb[46].mxu1 %vm851_vm4, %v4190_v17  ;;  %5588 = vmatprep.mubr.msk.f32.mxu0 %vm6212_vm1, %v6213_v13  ;;  %v5715_v17 = vpack.c.bf16 %v5139_v16, %v5138_v15 }
0x1dcb   : > { %v5905_v19 = vpop.eup %5904  ;;  %5576 = vmatpush3.msra.mxu1 %v4422_v18  ;;  %5577 = vmatprep.mubr.msk.f32.mxu1 %vm6212_vm1, %v6213_v13  ;;  %v5130_v18 = vld [vmem:[%s7398_s16 + $0x1] ss:$0 sm:$0xff] }
0x1dcc   : > { %v4192_v20 = vmul.f32 %v5905_v19, %v5897_v0  ;;  %5699 = vmatprep.subr.bf16.mxu1 %v6211_v10  ;;  %5695 = vmatpush3.bf16.msra.mxu0 %v5694_v23 }
0x1dcd   : > { %5696 = vmatprep.subr.bf16.mxu0 %v6211_v10 }
0x1dce   : > { %5578 = vmatmul.mubr.msk.f32.vlgmr.msra.gmra.mrb[48].mxu1 %vm851_vm4, %v4192_v20 }
0x1dcf   : > { %5599 = vmatprep.mubr.msk.f32.mxu1 %vm6212_vm1, %v6213_v13  ;;  %5701 = vmatpush3.bf16.msra.mxu1 %v5700_v55 }
0x1dd0   : > { %5698 = vmatpush3.bf16.msra.mxu0 %v5697_v28  ;;  %5702 = vmatprep.subr.bf16.mxu1 %v6211_v10 }
0x1dd1   : > { %5705 = vmatprep.subr.bf16.mxu0 %v6211_v10 }
0x1e33   : > { %v4265_v24 = vpop.f32.mrb[32].mxu0 }
0x1e34   : > { %v5564_v25 = vpop.f32.mrb[33].mxu0 }
0x1e9c   : > { %v4417_v29 = vpop.f32.mrb[34].mxu0 }
0x1e9d   : > { %v4341_v30 = vpop.f32.mrb[46].mxu1  ;;  %4502 = vrot.lane.b32.xlu1 %v4417_v29, %s7402_s12  ;;  %v5574_v31 = vpop.f32.mrb[35].mxu0 }
0x1e9e   : > { %4498 = vrot.lane.b32.xlu0 %v4341_v30, %s7401_s18  ;;  %v5569_v32 = vpop.f32.mrb[47].mxu1 }
0x1ea1   : > { %v4493_v33 = vpop.f32.mrb[48].mxu1 }
0x1ea2   : > { %4506 = vrot.lane.b32.xlu0 %v4493_v33, %s7396_s7  ;;  %v5579_v34 = vpop.f32.mrb[49].mxu1  ;;  %s7406_s7 = sld [smem:[#allocation24_spill]] }
0x1ea8   : > { %p7409_p11 = scmp.ne.s32.totalorder %s7406_s7, 0 }
0x1eaa   : > { %p6120_p10 = pnand %p6119_p7, %p7409_p11 }
0x1eac   : > { %p6121_p1 = pneg %p6120_p10 }
0x1f0f   : > { %v4503_v36 = vpop.permute.xlu1 %4502 }
0x1f10   : > { %v4499_v35 = vpop.permute.xlu0 %4498 }
0x1f11   : > { %v4509_v37 = vsel %vm851_vm4, %v4265_v24, %v4499_v35  ;;  %v5142_v24 = vld [vmem:[%s7399_s17 + $0x1] ss:$0 sm:$0xff] }
0x1f12   : > { %v4510_v38 = vsel %vm1523_vm5, %v4509_v37, %v4503_v36 }
0x1f14   : > { %v4507_v40 = vpop.permute.xlu0 %4506 }
0x1f15   : > { %v4511_v42 = vsel %vm1525_vm6, %v4510_v38, %v4507_v40 }
0x1f16   : > { %5589 = vmatmul.mubr.msk.f32.vlgmr.msra.gmra.mrb[36].mxu0 %vm725_vm0, %v4511_v42 }
0x1f17   : > { %5618 = vmatprep.mubr.msk.f32.mxu0 %vm6212_vm1, %v6213_v13  ;;  %v4623_v13 = vld [vmem:[#allocation13 + $0x30] sm:$0xff]  ;;  %5707 = vmatpush3.bf16.msra.mxu0 %v5706_v41 }
0x1f18   : > { %5708 = vmatprep.subr.bf16.mxu0 %v6211_v10 }
0x1f1b   : > { %5710 = vmatpush3.bf16.msra.mxu0 %v5709_v61 }
0x1f1c   : > { %5711 = vmatprep.subr.bf16.mxu0 %v6211_v10 }
0x1f1f   : > { %5713 = vmatpush3.bf16.msra.mxu0 %v5712_v1 }
0x1f20   : > { %5714 = vmatprep.subr.bf16.mxu0 %v6211_v10  ;;  %v5128_v10 = vld [vmem:[%s7306_s14 + $0x5] ss:$0 sm:$0xff] }
0x1f23   : > { %5716 = vmatpush3.bf16.msra.mxu0 %v5715_v17 }
0x1fe9   : > { %v4581_v43 = vpop.f32.mrb[36].mxu0 }
0x1fea   : > { %v7185_v44 = vadd.f32 %v4581_v43, %v7068_v45  ;;  %v5590_v46 = vpop.f32.mrb[37].mxu0  ;;  %v5703_v45 = vpack.c.bf16 %v4624_v50, %v4623_v13 }
0x1fec   : > { %v4586_v47 = vsel %vm725_vm0, %v7185_v44, 0.0  ;;  %5704 = vmatpush3.bf16.msra.mxu1 %v5703_v45 }
0x1fed   : > { %4587 = vadd.xlane.f32.xlu1 %v4586_v47 }
0x207a   : > { %v4588_v48 = vpop.xlane.xlu1 %4587 }
0x207b   : > { %v4589_v49 = vmul.f32 0.03125, %v4588_v48  ;;  %v5144_v48 = vld [vmem:[%s7407_s6] ss:$0 sm:$0xff] }
0x207d   : > { %v4590_v51 = vsub.f32 %v7185_v44, %v4589_v49 }
0x207f   : > { %v4591_v52 = vmul.f32 %v4590_v51, %v4590_v51  ;;  %v4609_v9 = vmul.f32 %v5127_v12, %v4590_v51 }
0x2081   : > { %v4592_v53 = vsel %vm725_vm0, %v4591_v52, 0.0 }
0x2082   : > { %4593 = vadd.xlane.f32.xlu0 %v4592_v53 }
0x210f   : > { %v4594_v2 = vpop.xlane.xlu0 %4593 }
0x2110   : > { %v4595_v3 = vmul.f32 0.032258064, %v4594_v2 }
0x2112   : > { %5906 = vrsqrt.f32 %v4595_v3  ;;  %vm4598_vm1 = vcmp.eq.f32.partialorder %v4595_v3, inf  ;;  %v4601_v5 = vand.u32 2147483648, %v4595_v3  ;;  %vm4600_vm2 = vcmp.eq.f32.partialorder %v4595_v3, 0.0 }
0x211c   : > { %v5907_v0 = vpop.eup %5906 }
0x211d   : > { %v4597_v4 = vmul.f32 %v5907_v0, %v4595_v3 }
0x211f   : > { %v4599_v6 = vsel %vm4598_vm1, %v4595_v3, %v4597_v4 }
0x2120   : > { %v4602_v7 = vsel %vm4600_vm2, %v4601_v5, %v4599_v6 }
0x2121   : > { %v4610_v8 = vadd.f32 1e-06, %v4602_v7 }
0x2123   : > { %5908 = vrcp.f32 %v4610_v8 }
0x212d   : > { %v5909_v56 = vpop.eup %5908 }
0x212e   : > { %v4612_v11 = vmul.f32 %v5909_v56, %v4609_v9 }
0x2130   : > { %v4619_v14 = vadd.f32 %v5128_v10, %v4612_v11 }
0x2132   : > { %5600 = vmatmul.mubr.msk.f32.vlgmr.msra.gmra.mrb[50].mxu1 %vm725_vm0, %v4619_v14 }
0x2205   : > { %v4702_v19 = vpop.f32.mrb[50].mxu1 }
0x2206   : > { %v4703_v20 = vadd.f32 %v5130_v18, %v4702_v19  ;;  %v5601_v21 = vpop.f32.mrb[51].mxu1 }
0x2208   : > { %v4706_v22 = vmax.f32 %v4703_v20, 0.0 }
0x220a   : > { %5619 = vmatmul.mubr.msk.f32.vlgmr.msra.gmra.mrb[38].mxu0 %vm2675_vm11, %v4706_v22 }
0x22dd   : > { %v4785_v23 = vpop.f32.mrb[38].mxu0 }
0x22de   : > { %v4789_v25 = vadd.f32 %v4785_v23, %v7185_v44  ;;  %v5620_v26 = vpop.f32.mrb[39].mxu0  ;;  %v5143_v44 = vld [vmem:[%s7405_s29] ss:$0 sm:$0xff]  ;;  %s6124_s29 = scalar_lea.vmem %s6123_s30, 256 }
0x22df   : > { %p6126_p9 = scmp.lt.s32.totalorder %s6124_s29, %s6118_s1 }
0x22e0   : > { %v4798_v27 = vadd.f32 %v5142_v24, %v4789_v25 }
0x22e1   : > { %p6127_p3 = por %p6126_p9, %p6125_p13 }
0x22e2   : > { %v4801_v28 = vsel %vm725_vm0, %v4798_v27, 0.0 }
0x22e3   : > { %4802 = vadd.xlane.f32.xlu0 %v4801_v28  ;;  %p6128_p5 = pnand %p6127_p3, %p6121_p1 }
0x2370   : > { %v4803_v29 = vpop.xlane.xlu0 %4802 }
0x2371   : > { %v4804_v30 = vmul.f32 0.03125, %v4803_v29 }
0x2373   : > { %v4805_v31 = vsub.f32 %v4798_v27, %v4804_v30 }
0x2375   : > { %v4806_v32 = vmul.f32 %v4805_v31, %v4805_v31  ;;  %v4824_v46 = vmul.f32 %v5143_v44, %v4805_v31 }
0x2377   : > { %v4807_v33 = vsel %vm725_vm0, %v4806_v32, 0.0 }
0x2378   : > { %4808 = vadd.xlane.f32.xlu1 %v4807_v33 }
0x2405   : > { %v4809_v34 = vpop.xlane.xlu1 %4808 }
0x2406   : > { %v4810_v35 = vmul.f32 0.032258064, %v4809_v34 }
0x2408   : > { %5910 = vrsqrt.f32 %v4810_v35  ;;  %vm4813_vm3 = vcmp.eq.f32.partialorder %v4810_v35, inf  ;;  %v4816_v38 = vand.u32 2147483648, %v4810_v35  ;;  %vm4815_vm4 = vcmp.eq.f32.partialorder %v4810_v35, 0.0 }
0x2412   : > { %v5911_v36 = vpop.eup %5910 }
0x2413   : > { %v4812_v37 = vmul.f32 %v5911_v36, %v4810_v35 }
0x2415   : > { %v4814_v40 = vsel %vm4813_vm3, %v4810_v35, %v4812_v37 }
0x2416   : > { %v4817_v42 = vsel %vm4815_vm4, %v4816_v38, %v4814_v40 }
0x2417   : > { %v4825_v43 = vadd.f32 1e-06, %v4817_v42 }
0x2419   : > { %5912 = vrcp.f32 %v4825_v43 }
0x2423   : > { %v5913_v47 = vpop.eup %5912 }
0x2424   : > { %v4827_v49 = vmul.f32 %v5913_v47, %v4824_v46 }
0x2426   : > { %v4834_v51 = vadd.f32 %v5144_v48, %v4827_v49 }
0x2428   : > { %4835 = vst.msk [vmem:[%s714_s20] sm:$0xff] %vm725_vm0, %v4834_v51 }
0x2429   : > { %6131 = shalt.err (!%p6128_p5)
}
0x242a   : > { %s6132_s19 = scalar_lea.hbm %s7247_s2, 128  ;;  %s6136_s6 = scalar_lea.hbm %s7408_s15, 256 }
0x242b   : > { %p6133_p6 = scmp.ne.s32.totalorder %s7247_s2, %s6132_s19  ;;  %p6137_p4 = scmp.lt.u32.totalorder %s7247_s2, %s7408_s15 }
0x242c   : > { %p6138_p0 = scmp.lt.u32.totalorder %s6136_s6, %s6132_s19  ;;  %p6140_p7 = scmp.lt.u32.totalorder %s6132_s19, %s7247_s2 }
0x242d   : > { %p6134_p2 = pnand %p6133_p6, %p7409_p11 }
0x242e   : > { %p6139_p8 = por %p6138_p0, %p6137_p4 }
0x242f   : > { %p6135_p12 = pneg %p6134_p2 }
0x2430   : > { %p6141_p10 = por %p6140_p7, %p6139_p8 }
0x2432   : > { %p6142_p1 = pnand %p6141_p10, %p6135_p12 }
0x2434   : > { %6145 = shalt.err (!%p6142_p1)
}
0x2435   : > { %5737 = dma.vmem_to_hbm [thread:$0]  (%p7409_p11), %s7249_s0, 128, %s7247_s2, %s4837_s24  }
0x2436 PF: > { %s7410_s23 = sld [smem:[#allocation21_spill]]  ;;  %s7411_s10 = sld [smem:[#allocation22_spill]] }
0x2437   : > { %p7413_p9 = scmp.ge.s32.totalorder %s6200_s27, 2 }
0x243c   : > { %s4862_s1 = sand.u32 1, %s7410_s23   ;;  %p7412_p13 = scmp.ne.s32.totalorder %s7411_s10, 0 }
0x243d   : > { %s4863_s28 = scalar_lea.sflag [#allocation4], %s4862_s1 }
0x243e   : > { %p5763_p3 = pnand %p7413_p9, %p7412_p13 }
0x2440   : > { %6183 = dma.done.wait (!%p5763_p3), %s4863_s28, 128  }
0x2441   : > { %6185 = vsyncadd (!%p5763_p3), %s4863_s28, 4294967168  ;;  %s7414_s27 = sld [smem:[#allocation23_spill]]  ;;  %s7415_s30 = sld [smem:[#allocation25_spill]] }
0x2442   : > { %s7416_s24 = smov %s6192_s25  ;;  %s7417_s25 = smov %s6196_s26 }
0x2447   : > { %p37_p5 = scmp.ge.s32.totalorder %s7414_s27, 4   ;;  %s7418_s26 = smov %s7415_s30 }
0x2449   :  { %39 = sbr.rel (!%p37_p5) target bundleno = 23 (0x17), region = 193 }
0x2450   :  { %4868 = vsyncpa [#allocation3], 1 }
0x2451   :  { %4870 = vsyncpa [#allocation3 + $0x1], 1 }
0x2452   :  { %4871 = vsyncpa [#allocation6], 1 }
0x2453   :  { %4873 = vsyncpa [#allocation6 + $0x1], 1 }
0x2454   :  { %4874 = vsyncpa [#allocation9], 1 }
0x2455   :  { %4876 = vsyncpa [#allocation9 + $0x1], 1 }
0x2456   :  { %4877 = vsyncpa [#allocation12], 1 }
0x2457   :  { %4878 = vsyncpa [#allocation4], 1 }
0x2458   :  { %4880 = vsyncpa [#allocation4 + $0x1], 1 }

</bundles_post_ra>
